<compile_context>
chip_gen: v7x
topology: tpu7x:2x2x1
jax: 0.10.0
libtpu: 0.0.40
codegen_flags: <defaults>
</compile_context>

<pallas_src>
import jax
import jax.numpy as jnp
from jax.experimental import pallas as pl
from jax.experimental.pallas import tpu as pltpu

_EPS = 1e-5
_LANE = 128


def _round_up(v, m):
    return (v + m - 1) // m * m


def _reflect_pad_hw(x):
    """1-pixel ReflectionPad2d on an (H, W, C) value (mirror, edge excluded)."""
    x = jnp.concatenate([x[1:2], x, x[-2:-1]], axis=0)
    x = jnp.concatenate([x[:, 1:2], x, x[:, -2:-1]], axis=1)
    return x


def _conv3x3_instnorm(x, w9c):
    """x: (H, W, C) f32; w9c: (9C, C) f32 pre-folded conv weight.
    Returns InstanceNorm2d(conv3x3(reflect_pad1(x))) as (H, W, C) f32."""
    H, W, C = x.shape
    xp = _reflect_pad_hw(x)                                   # (H+2, W+2, C)
    # im2col: single MXU matmul with contraction K = 9C.
    cols = [
        xp[ky:ky + H, kx:kx + W, :].reshape(H * W, C)
        for ky in range(3) for kx in range(3)
    ]
    patches = jnp.concatenate(cols, axis=-1)                  # (H*W, 9C)
    acc = jnp.dot(patches, w9c, preferred_element_type=jnp.float32)  # (H*W, C)
    # One-pass per-(instance, channel) stats over H*W, biased variance.
    inv_n = 1.0 / float(H * W)
    mean = jnp.sum(acc, axis=0, keepdims=True) * inv_n
    ex2 = jnp.sum(acc * acc, axis=0, keepdims=True) * inv_n
    var = jnp.maximum(ex2 - mean * mean, 0.0)
    y = (acc - mean) * jax.lax.rsqrt(var + _EPS)
    return y.reshape(H, W, C)


def _fused_resblock_kernel(x_ref, w1_ref, w2_ref, out_ref):
    """Full ResnetBlock for one batch element; intermediate h stays in VMEM."""
    x = x_ref[0].astype(jnp.float32)                          # (H, W, C)
    h = jnp.maximum(_conv3x3_instnorm(x, w1_ref[...]), 0.0)   # conv1+IN+ReLU
    y = _conv3x3_instnorm(h, w2_ref[...])                     # conv2+IN
    out_ref[0] = (y + x).astype(out_ref.dtype)                # +residual


def resnet_block_forward(x_nchw, w1_oihw, b1, w2_oihw, b2):
    """ResnetBlock forward. x_nchw: (N, C, H, W) float32.

    b1/b2 are accepted for API parity with nn.Conv2d(bias=True) but are not
    used: the affine-less InstanceNorm immediately after each conv subtracts
    the per-channel mean, which cancels a per-channel bias exactly."""
    del b1, b2
    N, C, H, W = x_nchw.shape
    Cp = _round_up(C, _LANE)  # lane-dense channel dim (multiple of 128)

    x = jnp.transpose(x_nchw, (0, 2, 3, 1))                   # NCHW -> NHWC

    def fold_weight(w_oihw):
        # (O, I, 3, 3) -> (3, 3, I, O), zero-pad channels, fold to (9*Cp, Cp).
        w = jnp.transpose(w_oihw, (2, 3, 1, 0)).astype(jnp.float32)
        if Cp != C:
            w = jnp.pad(w, ((0, 0), (0, 0), (0, Cp - C), (0, Cp - C)))
        return w.reshape(9 * Cp, Cp)

    w1f = fold_weight(w1_oihw)
    w2f = fold_weight(w2_oihw)

    if Cp != C:
        x = jnp.pad(x, ((0, 0), (0, 0), (0, 0), (0, Cp - C)))

    out = pl.pallas_call(
        _fused_resblock_kernel,
        out_shape=jax.ShapeDtypeStruct((N, H, W, Cp), jnp.float32),
        grid_spec=pltpu.PrefetchScalarGridSpec(
            num_scalar_prefetch=0,
            grid=(N,),
            in_specs=[
                pl.BlockSpec((1, H, W, Cp), lambda n: (n, 0, 0, 0)),
                pl.BlockSpec((9 * Cp, Cp), lambda n: (0, 0)),
                pl.BlockSpec((9 * Cp, Cp), lambda n: (0, 0)),
            ],
            out_specs=pl.BlockSpec((1, H, W, Cp), lambda n: (n, 0, 0, 0)),
        ),
        compiler_params=pltpu.CompilerParams(
            dimension_semantics=("parallel",),
            vmem_limit_bytes=100 * 1024 * 1024,
        ),
    )(x, w1f, w2f)

    if Cp != C:
        out = out[..., :C]
    return jnp.transpose(out, (0, 3, 1, 2))                   # NHWC -> NCHW


# ---------------- pure-JAX reference (for correctness check) ----------------
def _ref_forward(x, w1, b1, w2, b2):
    def conv(inp, w, b):
        xp = jnp.pad(inp, ((0, 0), (0, 0), (1, 1), (1, 1)), mode="reflect")
        y = jax.lax.conv_general_dilated(
            xp, w, (1, 1), "VALID",
            dimension_numbers=("NCHW", "OIHW", "NCHW"))
        return y + b[None, :, None, None]

    def inorm(v):
        m = jnp.mean(v, axis=(2, 3), keepdims=True)
        var = jnp.mean((v - m) ** 2, axis=(2, 3), keepdims=True)
        return (v - m) * jax.lax.rsqrt(var + _EPS)

    h = jnp.maximum(inorm(conv(x, w1, b1)), 0.0)
    return inorm(conv(h, w2, b2)) + x


if __name__ == "__main__":
    N, C, H, W = 2, 4, 16, 16
    key = jax.random.PRNGKey(0)
    kx, k1, kb1, k2, kb2 = jax.random.split(key, 5)

    x = jax.random.normal(kx, (N, C, H, W), dtype=jnp.float32)
    # Conv2d weights in PyTorch layout (out_ch, in_ch, 3, 3), deterministic.
    w1 = jax.random.normal(k1, (C, C, 3, 3), dtype=jnp.float32) * 0.1
    b1 = jax.random.normal(kb1, (C,), dtype=jnp.float32) * 0.1
    w2 = jax.random.normal(k2, (C, C, 3, 3), dtype=jnp.float32) * 0.1
    b2 = jax.random.normal(kb2, (C,), dtype=jnp.float32) * 0.1

    out = resnet_block_forward(x, w1, b1, w2, b2)
    out = jax.block_until_ready(out)

    ref = jax.block_until_ready(_ref_forward(x, w1, b1, w2, b2))
    assert out.shape == (N, C, H, W)
    assert jnp.allclose(out, ref, atol=1e-4, rtol=1e-4), (
        float(jnp.max(jnp.abs(out - ref))))

    print("KERNEL_OK")
</pallas_src>

<mosaic_0001>
module attributes {stable_mosaic.version = 11 : i64} {
  func.func @_fused_resblock_kernel(%arg0: i32, %arg1: memref<1x16x16x128xf32, #tpu.memory_space<vmem>>, %arg2: memref<1152x128xf32, #tpu.memory_space<vmem>>, %arg3: memref<1152x128xf32, #tpu.memory_space<vmem>>, %arg4: memref<1x16x16x128xf32, #tpu.memory_space<vmem>>) attributes {dimension_semantics = [#tpu.dimension_semantics<parallel>], iteration_bounds = array<i64: 2>, scalar_prefetch = 0 : i64, scratch_operands = 0 : i64, tpu.core_type = #tpu.core_type<tc>, window_params = [{transform_indices = @transform_0, window_bounds = array<i64: 1, 16, 16, 128>}, {pipeline_mode = #tpu.pipeline_mode<synchronous>, transform_indices = @transform_1, window_bounds = array<i64: 1152, 128>}, {pipeline_mode = #tpu.pipeline_mode<synchronous>, transform_indices = @transform_2, window_bounds = array<i64: 1152, 128>}, {transform_indices = @transform_3, window_bounds = array<i64: 1, 16, 16, 128>}]} {
    %c0 = arith.constant 0 : index
    %c0_0 = arith.constant 0 : index
    %c0_1 = arith.constant 0 : index
    %c0_2 = arith.constant 0 : index
    %0 = vector.load %arg1[%c0, %c0_0, %c0_1, %c0_2] : memref<1x16x16x128xf32, #tpu.memory_space<vmem>>, vector<1x16x16x128xf32>
    %1 = vector.shape_cast %0 : vector<1x16x16x128xf32> to vector<16x16x128xf32>
    %c0_3 = arith.constant 0 : index
    %c0_4 = arith.constant 0 : index
    %2 = vector.load %arg2[%c0_3, %c0_4] : memref<1152x128xf32, #tpu.memory_space<vmem>>, vector<1152x128xf32>
    %3 = vector.extract_strided_slice %1 {offsets = [1, 0, 0], sizes = [1, 16, 128], strides = [1, 1, 1]} : vector<16x16x128xf32> to vector<1x16x128xf32>
    %4 = vector.extract_strided_slice %1 {offsets = [14, 0, 0], sizes = [1, 16, 128], strides = [1, 1, 1]} : vector<16x16x128xf32> to vector<1x16x128xf32>
    %5 = tpu.concatenate %3, %1, %4 in 0 : vector<1x16x128xf32>, vector<16x16x128xf32>, vector<1x16x128xf32> -> vector<18x16x128xf32>
    %6 = vector.extract_strided_slice %5 {offsets = [0, 1, 0], sizes = [18, 1, 128], strides = [1, 1, 1]} : vector<18x16x128xf32> to vector<18x1x128xf32>
    %7 = vector.extract_strided_slice %5 {offsets = [0, 14, 0], sizes = [18, 1, 128], strides = [1, 1, 1]} : vector<18x16x128xf32> to vector<18x1x128xf32>
    %8 = tpu.concatenate %6, %5, %7 in 1 : vector<18x1x128xf32>, vector<18x16x128xf32>, vector<18x1x128xf32> -> vector<18x18x128xf32>
    %9 = vector.extract_strided_slice %8 {offsets = [0, 0, 0], sizes = [16, 16, 128], strides = [1, 1, 1]} : vector<18x18x128xf32> to vector<16x16x128xf32>
    %10 = vector.shape_cast %9 : vector<16x16x128xf32> to vector<256x128xf32>
    %11 = vector.extract_strided_slice %8 {offsets = [0, 1, 0], sizes = [16, 16, 128], strides = [1, 1, 1]} : vector<18x18x128xf32> to vector<16x16x128xf32>
    %12 = vector.shape_cast %11 : vector<16x16x128xf32> to vector<256x128xf32>
    %13 = vector.extract_strided_slice %8 {offsets = [0, 2, 0], sizes = [16, 16, 128], strides = [1, 1, 1]} : vector<18x18x128xf32> to vector<16x16x128xf32>
    %14 = vector.shape_cast %13 : vector<16x16x128xf32> to vector<256x128xf32>
    %15 = vector.extract_strided_slice %8 {offsets = [1, 0, 0], sizes = [16, 16, 128], strides = [1, 1, 1]} : vector<18x18x128xf32> to vector<16x16x128xf32>
    %16 = vector.shape_cast %15 : vector<16x16x128xf32> to vector<256x128xf32>
    %17 = vector.extract_strided_slice %8 {offsets = [1, 1, 0], sizes = [16, 16, 128], strides = [1, 1, 1]} : vector<18x18x128xf32> to vector<16x16x128xf32>
    %18 = vector.shape_cast %17 : vector<16x16x128xf32> to vector<256x128xf32>
    %19 = vector.extract_strided_slice %8 {offsets = [1, 2, 0], sizes = [16, 16, 128], strides = [1, 1, 1]} : vector<18x18x128xf32> to vector<16x16x128xf32>
    %20 = vector.shape_cast %19 : vector<16x16x128xf32> to vector<256x128xf32>
    %21 = vector.extract_strided_slice %8 {offsets = [2, 0, 0], sizes = [16, 16, 128], strides = [1, 1, 1]} : vector<18x18x128xf32> to vector<16x16x128xf32>
    %22 = vector.shape_cast %21 : vector<16x16x128xf32> to vector<256x128xf32>
    %23 = vector.extract_strided_slice %8 {offsets = [2, 1, 0], sizes = [16, 16, 128], strides = [1, 1, 1]} : vector<18x18x128xf32> to vector<16x16x128xf32>
    %24 = vector.shape_cast %23 : vector<16x16x128xf32> to vector<256x128xf32>
    %25 = vector.extract_strided_slice %8 {offsets = [2, 2, 0], sizes = [16, 16, 128], strides = [1, 1, 1]} : vector<18x18x128xf32> to vector<16x16x128xf32>
    %26 = vector.shape_cast %25 : vector<16x16x128xf32> to vector<256x128xf32>
    %27 = tpu.concatenate %10, %12, %14, %16, %18, %20, %22, %24, %26 in 1 : vector<256x128xf32>, vector<256x128xf32>, vector<256x128xf32>, vector<256x128xf32>, vector<256x128xf32>, vector<256x128xf32>, vector<256x128xf32>, vector<256x128xf32>, vector<256x128xf32> -> vector<256x1152xf32>
    %cst = arith.constant dense<0.000000e+00> : vector<256x128xf32>
    %28 = tpu.matmul %27, %2, %cst {dimension_numbers = #tpu.dot_dimension_numbers<[1], [0], [0], [1], [0, 0, 1, 1], [], []>} : vector<256x1152xf32>, vector<1152x128xf32>, vector<256x128xf32> -> vector<256x128xf32>
    %cst_5 = arith.constant dense<0.000000e+00> : vector<128xf32>
    %29 = vector.multi_reduction <add>, %28, %cst_5 [0] : vector<256x128xf32> to vector<128xf32>
    %30 = vector.shape_cast %29 : vector<128xf32> to vector<1x128xf32>
    %cst_6 = arith.constant 3.906250e-03 : f32
    %31 = vector.broadcast %cst_6 : f32 to vector<1x128xf32>
    %32 = arith.mulf %30, %31 : vector<1x128xf32>
    %33 = arith.mulf %28, %28 : vector<256x128xf32>
    %cst_7 = arith.constant dense<0.000000e+00> : vector<128xf32>
    %34 = vector.multi_reduction <add>, %33, %cst_7 [0] : vector<256x128xf32> to vector<128xf32>
    %35 = vector.shape_cast %34 : vector<128xf32> to vector<1x128xf32>
    %cst_8 = arith.constant 3.906250e-03 : f32
    %36 = vector.broadcast %cst_8 : f32 to vector<1x128xf32>
    %37 = arith.mulf %35, %36 : vector<1x128xf32>
    %38 = arith.mulf %32, %32 : vector<1x128xf32>
    %39 = arith.subf %37, %38 : vector<1x128xf32>
    %cst_9 = arith.constant 0.000000e+00 : f32
    %40 = vector.broadcast %cst_9 : f32 to vector<1x128xf32>
    %41 = arith.maximumf %39, %40 : vector<1x128xf32>
    %42 = vector.broadcast %32 : vector<1x128xf32> to vector<256x128xf32>
    %43 = arith.subf %28, %42 : vector<256x128xf32>
    %cst_10 = arith.constant 9.99999974E-6 : f32
    %44 = vector.broadcast %cst_10 : f32 to vector<1x128xf32>
    %45 = arith.addf %41, %44 : vector<1x128xf32>
    %46 = math.rsqrt %45 : vector<1x128xf32>
    %47 = vector.broadcast %46 : vector<1x128xf32> to vector<256x128xf32>
    %48 = arith.mulf %43, %47 : vector<256x128xf32>
    %49 = vector.shape_cast %48 : vector<256x128xf32> to vector<16x16x128xf32>
    %cst_11 = arith.constant 0.000000e+00 : f32
    %50 = vector.broadcast %cst_11 : f32 to vector<16x16x128xf32>
    %51 = arith.maximumf %49, %50 : vector<16x16x128xf32>
    %c0_12 = arith.constant 0 : index
    %c0_13 = arith.constant 0 : index
    %52 = vector.load %arg3[%c0_12, %c0_13] : memref<1152x128xf32, #tpu.memory_space<vmem>>, vector<1152x128xf32>
    %53 = vector.extract_strided_slice %51 {offsets = [1, 0, 0], sizes = [1, 16, 128], strides = [1, 1, 1]} : vector<16x16x128xf32> to vector<1x16x128xf32>
    %54 = vector.extract_strided_slice %51 {offsets = [14, 0, 0], sizes = [1, 16, 128], strides = [1, 1, 1]} : vector<16x16x128xf32> to vector<1x16x128xf32>
    %55 = tpu.concatenate %53, %51, %54 in 0 : vector<1x16x128xf32>, vector<16x16x128xf32>, vector<1x16x128xf32> -> vector<18x16x128xf32>
    %56 = vector.extract_strided_slice %55 {offsets = [0, 1, 0], sizes = [18, 1, 128], strides = [1, 1, 1]} : vector<18x16x128xf32> to vector<18x1x128xf32>
    %57 = vector.extract_strided_slice %55 {offsets = [0, 14, 0], sizes = [18, 1, 128], strides = [1, 1, 1]} : vector<18x16x128xf32> to vector<18x1x128xf32>
    %58 = tpu.concatenate %56, %55, %57 in 1 : vector<18x1x128xf32>, vector<18x16x128xf32>, vector<18x1x128xf32> -> vector<18x18x128xf32>
    %59 = vector.extract_strided_slice %58 {offsets = [0, 0, 0], sizes = [16, 16, 128], strides = [1, 1, 1]} : vector<18x18x128xf32> to vector<16x16x128xf32>
    %60 = vector.shape_cast %59 : vector<16x16x128xf32> to vector<256x128xf32>
    %61 = vector.extract_strided_slice %58 {offsets = [0, 1, 0], sizes = [16, 16, 128], strides = [1, 1, 1]} : vector<18x18x128xf32> to vector<16x16x128xf32>
    %62 = vector.shape_cast %61 : vector<16x16x128xf32> to vector<256x128xf32>
    %63 = vector.extract_strided_slice %58 {offsets = [0, 2, 0], sizes = [16, 16, 128], strides = [1, 1, 1]} : vector<18x18x128xf32> to vector<16x16x128xf32>
    %64 = vector.shape_cast %63 : vector<16x16x128xf32> to vector<256x128xf32>
    %65 = vector.extract_strided_slice %58 {offsets = [1, 0, 0], sizes = [16, 16, 128], strides = [1, 1, 1]} : vector<18x18x128xf32> to vector<16x16x128xf32>
    %66 = vector.shape_cast %65 : vector<16x16x128xf32> to vector<256x128xf32>
    %67 = vector.extract_strided_slice %58 {offsets = [1, 1, 0], sizes = [16, 16, 128], strides = [1, 1, 1]} : vector<18x18x128xf32> to vector<16x16x128xf32>
    %68 = vector.shape_cast %67 : vector<16x16x128xf32> to vector<256x128xf32>
    %69 = vector.extract_strided_slice %58 {offsets = [1, 2, 0], sizes = [16, 16, 128], strides = [1, 1, 1]} : vector<18x18x128xf32> to vector<16x16x128xf32>
    %70 = vector.shape_cast %69 : vector<16x16x128xf32> to vector<256x128xf32>
    %71 = vector.extract_strided_slice %58 {offsets = [2, 0, 0], sizes = [16, 16, 128], strides = [1, 1, 1]} : vector<18x18x128xf32> to vector<16x16x128xf32>
    %72 = vector.shape_cast %71 : vector<16x16x128xf32> to vector<256x128xf32>
    %73 = vector.extract_strided_slice %58 {offsets = [2, 1, 0], sizes = [16, 16, 128], strides = [1, 1, 1]} : vector<18x18x128xf32> to vector<16x16x128xf32>
    %74 = vector.shape_cast %73 : vector<16x16x128xf32> to vector<256x128xf32>
    %75 = vector.extract_strided_slice %58 {offsets = [2, 2, 0], sizes = [16, 16, 128], strides = [1, 1, 1]} : vector<18x18x128xf32> to vector<16x16x128xf32>
    %76 = vector.shape_cast %75 : vector<16x16x128xf32> to vector<256x128xf32>
    %77 = tpu.concatenate %60, %62, %64, %66, %68, %70, %72, %74, %76 in 1 : vector<256x128xf32>, vector<256x128xf32>, vector<256x128xf32>, vector<256x128xf32>, vector<256x128xf32>, vector<256x128xf32>, vector<256x128xf32>, vector<256x128xf32>, vector<256x128xf32> -> vector<256x1152xf32>
    %cst_14 = arith.constant dense<0.000000e+00> : vector<256x128xf32>
    %78 = tpu.matmul %77, %52, %cst_14 {dimension_numbers = #tpu.dot_dimension_numbers<[1], [0], [0], [1], [0, 0, 1, 1], [], []>} : vector<256x1152xf32>, vector<1152x128xf32>, vector<256x128xf32> -> vector<256x128xf32>
    %cst_15 = arith.constant dense<0.000000e+00> : vector<128xf32>
    %79 = vector.multi_reduction <add>, %78, %cst_15 [0] : vector<256x128xf32> to vector<128xf32>
    %80 = vector.shape_cast %79 : vector<128xf32> to vector<1x128xf32>
    %cst_16 = arith.constant 3.906250e-03 : f32
    %81 = vector.broadcast %cst_16 : f32 to vector<1x128xf32>
    %82 = arith.mulf %80, %81 : vector<1x128xf32>
    %83 = arith.mulf %78, %78 : vector<256x128xf32>
    %cst_17 = arith.constant dense<0.000000e+00> : vector<128xf32>
    %84 = vector.multi_reduction <add>, %83, %cst_17 [0] : vector<256x128xf32> to vector<128xf32>
    %85 = vector.shape_cast %84 : vector<128xf32> to vector<1x128xf32>
    %cst_18 = arith.constant 3.906250e-03 : f32
    %86 = vector.broadcast %cst_18 : f32 to vector<1x128xf32>
    %87 = arith.mulf %85, %86 : vector<1x128xf32>
    %88 = arith.mulf %82, %82 : vector<1x128xf32>
    %89 = arith.subf %87, %88 : vector<1x128xf32>
    %cst_19 = arith.constant 0.000000e+00 : f32
    %90 = vector.broadcast %cst_19 : f32 to vector<1x128xf32>
    %91 = arith.maximumf %89, %90 : vector<1x128xf32>
    %92 = vector.broadcast %82 : vector<1x128xf32> to vector<256x128xf32>
    %93 = arith.subf %78, %92 : vector<256x128xf32>
    %cst_20 = arith.constant 9.99999974E-6 : f32
    %94 = vector.broadcast %cst_20 : f32 to vector<1x128xf32>
    %95 = arith.addf %91, %94 : vector<1x128xf32>
    %96 = math.rsqrt %95 : vector<1x128xf32>
    %97 = vector.broadcast %96 : vector<1x128xf32> to vector<256x128xf32>
    %98 = arith.mulf %93, %97 : vector<256x128xf32>
    %99 = vector.shape_cast %98 : vector<256x128xf32> to vector<16x16x128xf32>
    %100 = arith.addf %99, %1 : vector<16x16x128xf32>
    %c0_21 = arith.constant 0 : index
    %c0_22 = arith.constant 0 : index
    %c0_23 = arith.constant 0 : index
    %c0_24 = arith.constant 0 : index
    %101 = vector.load %arg4[%c0_21, %c0_22, %c0_23, %c0_24] : memref<1x16x16x128xf32, #tpu.memory_space<vmem>>, vector<1x16x16x128xf32>
    %102 = vector.shape_cast %101 : vector<1x16x16x128xf32> to vector<16x16x128xf32>
    %103 = vector.shape_cast %100 : vector<16x16x128xf32> to vector<1x16x16x128xf32>
    tpu.vector_store %arg4[%c0_21, %c0_22, %c0_23, %c0_24], %103 {strides = array<i32>} : memref<1x16x16x128xf32, #tpu.memory_space<vmem>>, vector<1x16x16x128xf32>,
    return
  }
  func.func @transform_0(%arg0: i32) -> (i32, i32, i32, i32) {
    %c0_i32 = arith.constant 0 : i32
    %c0_i32_0 = arith.constant 0 : i32
    %c0_i32_1 = arith.constant 0 : i32
    %c0_i32_2 = arith.constant 0 : i32
    return %arg0, %c0_i32, %c0_i32_0, %c0_i32_1 : i32, i32, i32, i32
  }
  func.func @transform_1(%arg0: i32) -> (i32, i32) {
    %c0_i32 = arith.constant 0 : i32
    %c0_i32_0 = arith.constant 0 : i32
    %c0_i32_1 = arith.constant 0 : i32
    return %c0_i32, %c0_i32_0 : i32, i32
  }
  func.func @transform_2(%arg0: i32) -> (i32, i32) {
    %c0_i32 = arith.constant 0 : i32
    %c0_i32_0 = arith.constant 0 : i32
    %c0_i32_1 = arith.constant 0 : i32
    return %c0_i32, %c0_i32_0 : i32, i32
  }
  func.func @transform_3(%arg0: i32) -> (i32, i32, i32, i32) {
    %c0_i32 = arith.constant 0 : i32
    %c0_i32_0 = arith.constant 0 : i32
    %c0_i32_1 = arith.constant 0 : i32
    %c0_i32_2 = arith.constant 0 : i32
    return %arg0, %c0_i32, %c0_i32_0, %c0_i32_1 : i32, i32, i32, i32
  }
}

</mosaic_0001>

<bundles_post_ra>
// kernel: tpu_custom_call.1
= control target key start
LH: loop header
LB: loop body
LE: loop exit
PB: predicated region body
PF: predicated region fallthrough
CT: control target
= control target key end

     0   :  { %8 = vsyncpa [#allocation3], 0  ;;  %s8640_s0 = inlined_call_operand.hbm [shape: f32[2,16,16,128], index: 0, kind: input, shape index: {}]   ;;  %s8641_s1 = inlined_call_operand.hbm [shape: f32[1152,128], index: 1, kind: input, shape index: {}]   ;;  %s8642_s2 = inlined_call_operand.hbm [shape: f32[1152,128], index: 2, kind: input, shape index: {}]   ;;  %s8643_s3 = inlined_call_operand.hbm [shape: f32[2,16,16,128], index: 3, kind: output, shape index: {}]  }
   0x1   :  { %10 = vsyncpa [#allocation3 + $0x1], 0 }
   0x2   :  { %11 = vsyncpa [#allocation6], 0 }
   0x3   :  { %12 = vsyncpa [#allocation4], 0 }
   0x4   :  { %14 = vsyncpa [#allocation4 + $0x1], 0  ;;  %s5726_s12 = smov 0   ;;  %s5728_s13 = smov 0  }
   0x5   :  { %s5730_s14 = smov 0   ;;  %s5732_s15 = smov 0  }
   0x6 LB: > { %s5747_s16 = sadd.s32 4294967295, %s5695_s15   ;;  %s4307_s17 = sadd.s32 4294967294, %s5695_s15   ;;  %s5695_s15 = sphi %s5732_s15, %s9154_s15   ;;  %s5691_s14 = sphi %s5730_s14, %s9153_s14   ;;  %s5687_s13 = sphi %s5728_s13, %s9152_s13   ;;  %s5683_s12 = sphi %s5726_s12, %s9151_s12  }
   0x7   : > { %p40_p0 = scmp.ne.s32.totalorder %s5687_s13, %s5683_s12  ;;  %p8644_p1 = scmp.eq.s32.totalorder %s5747_s16, 0 }
   0x8   : > { %p112_p3 = scmp.eq.s32.totalorder %s4307_s17, 1  ;;  %p4308_p5 = scmp.ge.s32.totalorder %s5695_s15, 1 }
   0x9   : > { %p5756_p4 = por %p8644_p1, %p40_p0  ;;  %p119_p7 = scmp.lt.s32.totalorder %s5695_s15, 3 }
   0xa   : > { %p5761_p6 = por %p112_p3, %p40_p0  ;;  %s5697_s21 = smov [#allocation5]  }
   0xb   : > { %s8829_s18 = scalar_select %p5756_p4, 1, 0 }
   0xc   : > { %s8830_s19 = scalar_select %p5761_p6, 1, 0 }
   0xd   : > { %p5766_p8 = pnand %p4308_p5, %p119_p7  ;;  %s131_s22 = sshll.u32 %s5697_s21, 4  ;;  %s5770_s22 = int_to_ptr.vmem [resolvable:$true] %s131_s22 }
   0xe   : > { %s5698_s24 = smov [#allocation7]   ;;  %s5539_s28 = scalar_lea.hbm %s8641_s1, 18432 }
   0xf   : > { %p5443_p9 = pneg %p5766_p8  ;;  %s144_s25 = sshll.u32 %s5698_s24, 4  ;;  %s5781_s25 = int_to_ptr.vmem [resolvable:$true] %s144_s25 }
  0x10   : > { %p5540_p12 = scmp.ne.s32.totalorder %s8641_s1, %s5539_s28  ;;  %p5546_p5 = scmp.lt.u32.totalorder %s5539_s28, %s8641_s1 }
  0x11   : > { %p5777_p11 = pnand %p5443_p9, %p8644_p1 }
  0x13   : > { %p5541_p13 = pneg %p5777_p11 }
  0x15   : > { %p5542_p0 = pnand %p5541_p13, %p5540_p12 }
  0x17   : > { %p5543_p3 = pneg %p5542_p0 }
  0x19   : > { %p5548_p7 = pnand %p5546_p5, %p5543_p3 }
  0x1b   : > { %5551 = shalt.err (!%p5548_p7)
}
  0x1c   : > { %s5552_s6 = scalar_lea.vmem %s5770_s22, 18432  ;;  %p5560_p2 = scmp.lt.s32.totalorder %s5770_s22, %s5770_s22 }
  0x1d   : > { %p5553_p9 = scmp.ne.s32.totalorder %s5770_s22, %s5552_s6  ;;  %p5561_p12 = scmp.lt.s32.totalorder %s5552_s6, %s5552_s6 }
  0x1f   : > { %p5555_p10 = pnand %p5553_p9, %p5541_p13  ;;  %p5562_p0 = por %p5561_p12, %p5560_p2 }
  0x21   : > { %p5556_p1 = pneg %p5555_p10 }
  0x23   : > { %p5563_p6 = pnand %p5562_p0, %p5556_p1 }
  0x25   : > { %5566 = shalt.err (!%p5563_p6)
}
  0x26   : > { %s5699_s7 = smov 128   ;;  %s5700_s8 = smov 8  }
  0x27   : > { %5446 = dma.hbm_to_vmem [thread:$0]  (!%p5777_p11), %s8641_s1, 18432, %s5770_s22, [#allocation6], %s5699_s7, %s5699_s7, %s5700_s8  }
  0x28   : > { %s5567_s21 = scalar_lea.hbm %s8642_s2, 18432 }
  0x29   : > { %p5568_p1 = scmp.ne.s32.totalorder %s8642_s2, %s5567_s21  ;;  %p5574_p10 = scmp.lt.u32.totalorder %s5567_s21, %s8642_s2 }
  0x2b   : > { %p5570_p2 = pnand %p5568_p1, %p5541_p13 }
  0x2d   : > { %p5571_p6 = pneg %p5570_p2 }
  0x2f   : > { %p5576_p3 = pnand %p5574_p10, %p5571_p6 }
  0x31   : > { %5579 = shalt.err (!%p5576_p3)
}
  0x32   : > { %s5580_s22 = scalar_lea.vmem %s5781_s25, 18432  ;;  %p5588_p12 = scmp.lt.s32.totalorder %s5781_s25, %s5781_s25 }
  0x33   : > { %p5581_p5 = scmp.ne.s32.totalorder %s5781_s25, %s5580_s22  ;;  %p5589_p0 = scmp.lt.s32.totalorder %s5580_s22, %s5580_s22 }
  0x35   : > { %p5583_p7 = pnand %p5581_p5, %p5541_p13  ;;  %p5590_p1 = por %p5589_p0, %p5588_p12 }
  0x37   : > { %p5584_p9 = pneg %p5583_p7 }
  0x39   : > { %p5591_p2 = pnand %p5590_p1, %p5584_p9 }
  0x3b   : > { %5594 = shalt.err (!%p5591_p2)
}
  0x3c   : > { %5449 = dma.hbm_to_vmem [thread:$0]  (!%p5777_p11), %s8642_s2, 18432, %s5781_s25, [#allocation6], %s5699_s7, %s5699_s7, %s5700_s8  }
  0x3d   : > { %s5842_s23 = sadd.s32 1, %s5695_s15   ;;  %s27_s4 = sadd.s32 1, %s5691_s14 }
  0x3e   : > { %s24_s5 = ssub.s32 %s5695_s15, %s5842_s23  ;;  %p34_p13 = scmp.ne.s32.totalorder %s5691_s14, %s5687_s13 }
  0x3f   : > { %p25_p6 = scmp.eq.s32.totalorder %s24_s5, 0  ;;  %p35_p10 = scmp.eq.s32.totalorder %s5695_s15, 0 }
  0x40   : > { %p8833_p3 = scmp.eq.s32.totalorder %s5747_s16, 1  ;;  %p5460_p7 = scmp.lt.s32.totalorder %s5695_s15, 2 }
  0x41   : > { %s5858_s9 = scalar_select %p25_p6, %s5691_s14, %s27_s4  }
  0x42   : > { %p5852_p5 = por %p8833_p3, %p34_p13  ;;  %p36_p9 = por %p35_p10, %p34_p13 }
  0x43   : > { %s158_s10 = sand.u32 1, %s5691_s14   ;;  %s4325_s25 = sshll.u32 %s5695_s15, 12 }
  0x44   : > { %s8834_s6 = scalar_select %p5852_p5, 1, 0 }
  0x45   : > { %s4312_s11 = sshll.u32 %s158_s10, 8  ;;  %s5865_s24 = scalar_lea.hbm %s8640_s0, %s4325_s25 }
  0x46   : > { %s162_s26 = scalar_lea.vmem [#allocation2], %s4312_s11  ;;  %p5869_p11 = pnand %p5460_p7, %p36_p9 }
  0x47   : > { %s169_s27 = sshll.u32 %s162_s26, 4  ;;  %s5873_s22 = scalar_lea.sflag [#allocation3], %s158_s10  ;;  %s5867_s27 = int_to_ptr.vmem [resolvable:$true] %s169_s27 }
  0x48   : > { %s5595_s29 = scalar_lea.hbm %s5865_s24, 4096  ;;  %p5597_p0 = pneg %p5869_p11 }
  0x49   : > { %p5596_p12 = scmp.ne.s32.totalorder %s5865_s24, %s5595_s29  ;;  %s5600_s5 = scalar_lea.hbm %s8640_s0, 8192 }
  0x4a   : > { %p5601_p13 = scmp.lt.u32.totalorder %s5865_s24, %s8640_s0  ;;  %p5602_p6 = scmp.lt.u32.totalorder %s5600_s5, %s5595_s29 }
  0x4b   : > { %p5598_p1 = pnand %p5597_p0, %p5596_p12  ;;  %p5604_p3 = scmp.lt.u32.totalorder %s5595_s29, %s5865_s24 }
  0x4c   : > { %p5603_p10 = por %p5602_p6, %p5601_p13 }
  0x4d   : > { %p5599_p2 = pneg %p5598_p1 }
  0x4e   : > { %p5605_p7 = por %p5604_p3, %p5603_p10 }
  0x50   : > { %p5606_p9 = pnand %p5605_p7, %p5599_p2 }
  0x52   : > { %5609 = shalt.err (!%p5606_p9)
}
  0x53   : > { %s5610_s10 = scalar_lea.vmem %s5867_s27, 4096  ;;  %s5701_s17 = smov [#allocation2]  }
  0x54   : > { %p5611_p12 = scmp.ne.s32.totalorder %s5867_s27, %s5610_s10  ;;  %s5615_s21 = sshll.u32 %s5701_s17, 4  ;;  %s5616_s21 = int_to_ptr.vmem [resolvable:$false] %s5615_s21 }
  0x55   : > { %s5617_s26 = scalar_lea.vmem %s5616_s21, 8192  ;;  %p5618_p4 = scmp.lt.s32.totalorder %s5867_s27, %s5616_s21 }
  0x56   : > { %p5613_p1 = pnand %p5611_p12, %p5597_p0  ;;  %p5619_p13 = scmp.lt.s32.totalorder %s5617_s26, %s5610_s10 }
  0x58   : > { %p5614_p5 = pneg %p5613_p1  ;;  %p5620_p6 = por %p5619_p13, %p5618_p4 }
  0x5a   : > { %p5621_p10 = pnand %p5620_p6, %p5614_p5 }
  0x5c   : > { %5624 = shalt.err (!%p5621_p10)
}
  0x5d   : > { %5453 = dma.hbm_to_vmem [thread:$0]  (!%p5869_p11), %s5865_s24, 4096, %s5867_s27, %s5873_s22, %s5699_s7, %s5699_s7, %s5700_s8  }
  0x5e   : > { %181 = sbr.rel (%p5766_p8) target bundleno = 1776 (0x6f0), region = 32 }
  0x65   : > { %s5907_s29 = sand.u32 1, %s5687_s13   ;;  %p8836_p4 = scmp.ne.s32.totalorder %s8829_s18, 0 }
  0x66   : > { %s4316_s30 = sshll.u32 %s5907_s29, 8  ;;  %s184_s4 = scalar_lea.sflag [#allocation3], %s5907_s29 }
  0x67   : > { %s5913_s28 = scalar_lea.vmem [#allocation2], %s4316_s30 }
  0x68   : > { %5670 = dma.done.wait (%p8836_p4), %s184_s4, 4096  }
  0x69   : > { %5672 = vsyncadd (%p8836_p4), %s184_s4, 4294963200  ;;  %p8837_p5 = scmp.eq.s32.totalorder %s5747_s16, 0 }
  0x6b   : > { %5674 = dma.done.wait (%p8837_p5), [#allocation6], 36864   ;;  %p8838_p8 = pmov %p8837_p5 }
  0x6c   : > { %v8647_v0 = vmov 0.0|0.0   ;;  %v250_v1 = vld [vmem:[#allocation5] sm:$0xff]  ;;  %v251_v2 = vld [vmem:[#allocation5 + $0x8] sm:$0xff]  ;;  %v252_v3 = vld [vmem:[#allocation5 + $0x10] sm:$0xff]  ;;  %vm458_vm0 = vcmask 1040384   ;;  %vm649_vm1 = vcmask 1046528  }
  0x6d   : > { %5676 = vsyncadd (%p8838_p8), [#allocation6], 4294930432  ;;  %4583 = vmatprep.subr.bf16.mxu0 %v8647_v0  ;;  %v4584_v4 = vpack.c.bf16 %v251_v2, %v250_v1  ;;  %v253_v5 = vld [vmem:[#allocation5 + $0x18] sm:$0xff]  ;;  %v254_v7 = vld [vmem:[#allocation5 + $0x20] sm:$0xff]  ;;  %vm755_vm2 = vcmask 1045504   ;;  %s8484_s18 = scalar_lea.vmem [#allocation8], %s4316_s30 }
  0x6e   : > { %v4587_v6 = vpack.c.bf16 %v253_v5, %v252_v3  ;;  %v255_v8 = vld [vmem:[#allocation5 + $0x28] sm:$0xff]  ;;  %v256_v10 = vld [vmem:[#allocation5 + $0x30] sm:$0xff]  ;;  %v257_v11 = vld [vmem:[#allocation5 + $0x38] sm:$0xff]  ;;  %s4326_s20 = sshll.u32 %s5747_s16, 12  ;;  %s4215_s7 = sshll.u32 %s8484_s18, 4  ;;  %s8576_s7 = int_to_ptr.vmem [resolvable:$true] %s4215_s7 }
  0x6f   : > { %4585 = vmatpush1.bf16.msra.mxu0 %v4584_v4  ;;  %v4590_v9 = vpack.c.bf16 %v255_v8, %v254_v7  ;;  %v220_v12 = vld [vmem:[%s5913_s28 + $0x10] sm:$0xff]  ;;  %v4593_v13 = vpack.c.bf16 %v257_v11, %v256_v10  ;;  %v5928_v14 = vld [vmem:[%s5913_s28 + $0x18] sm:$0xff]  ;;  %v258_v17 = vld [vmem:[#allocation5 + $0x40] sm:$0xff]  ;;  %s8572_s27 = scalar_lea.hbm %s8643_s3, %s4326_s20  ;;  %s4202_s16 = scalar_lea.sflag [#allocation4], %s5907_s29 }
  0x70   : > { %4586 = vmatprep.subr.bf16.mxu0 %v8647_v0  ;;  %v410_v15 = vrot.slane %v220_v12, 1  ;;  %v459_v16 = vrot.slane %v220_v12, 7  ;;  %v259_v18 = vld [vmem:[#allocation5 + $0x48] sm:$0xff]  ;;  %v460_v19 = vrot.slane %v5928_v14, 7  ;;  %v260_v25 = vld [vmem:[#allocation5 + $0x50] sm:$0xff]  ;;  %v261_v26 = vld [vmem:[#allocation5 + $0x58] sm:$0xff] }
  0x71   : > { %v4596_v23 = vpack.c.bf16 %v259_v18, %v258_v17  ;;  %v4599_v28 = vpack.c.bf16 %v261_v26, %v260_v25  ;;  %v262_v29 = vld [vmem:[#allocation5 + $0x60] sm:$0xff]  ;;  %v263_v30 = vld [vmem:[#allocation5 + $0x68] sm:$0xff]  ;;  %v264_v32 = vld [vmem:[#allocation5 + $0x70] sm:$0xff]  ;;  %v555_v55 = vrot.slane %v5928_v14, 5  ;;  %s5625_s22 = scalar_lea.vmem %s8576_s7, 4096  ;;  %p9148_p0 = scmp.ne.s32.totalorder %s8834_s6, 0 }
  0x72   : > { %v5933_v20 = vsel %vm458_vm0, %v410_v15, %v459_v16  ;;  %v5938_v21 = vsel %vm458_vm0, %v459_v16, %v460_v19  ;;  %v4602_v31 = vpack.c.bf16 %v263_v30, %v262_v29  ;;  %v265_v33 = vld [vmem:[#allocation5 + $0x78] sm:$0xff]  ;;  %v266_v35 = vld [vmem:[#allocation5 + $0x80] sm:$0xff]  ;;  %v267_v36 = vld [vmem:[#allocation5 + $0x88] sm:$0xff]  ;;  %p5626_p11 = scmp.ne.s32.totalorder %s8576_s7, %s5625_s22  ;;  %s5703_s5 = smov [#allocation8]  }
  0x73   : > { %4588 = vmatpush1.bf16.msra.mxu0 %v4587_v6  ;;  %v650_v22 = vrot.slane %v5933_v20, 1  ;;  %v651_v24 = vrot.slane %v5938_v21, 1  ;;  %v4605_v34 = vpack.c.bf16 %v265_v33, %v264_v32  ;;  %v4608_v37 = vpack.c.bf16 %v267_v36, %v266_v35  ;;  %v268_v38 = vld [vmem:[#allocation5 + $0x90] sm:$0xff]  ;;  %v269_v39 = vld [vmem:[#allocation5 + $0x98] sm:$0xff]  ;;  %v270_v41 = vld [vmem:[#allocation5 + $0xa0] sm:$0xff]  ;;  %s5629_s11 = sshll.u32 %s5703_s5, 4  ;;  %s5630_s11 = int_to_ptr.vmem [resolvable:$false] %s5629_s11 }
  0x74   : > { %4589 = vmatprep.subr.bf16.mxu0 %v8647_v0  ;;  %v4611_v40 = vpack.c.bf16 %v269_v39, %v268_v38  ;;  %v271_v42 = vld [vmem:[#allocation5 + $0xa8] sm:$0xff]  ;;  %v272_v44 = vld [vmem:[#allocation5 + $0xb0] sm:$0xff]  ;;  %v273_v45 = vld [vmem:[#allocation5 + $0xb8] sm:$0xff]  ;;  %v603_v61 = vsel %vm458_vm0, %v460_v19, %v555_v55  ;;  %v756_v10 = vrot.slane %v5933_v20, 2  ;;  %v757_v11 = vrot.slane %v5938_v21, 2  ;;  %p5627_p2 = pnand %p5626_p11, %p9148_p0  ;;  %s5631_s25 = scalar_lea.vmem %s5630_s11, 8192 }
  0x75   : > { %v5946_v27 = vsel %vm649_vm1, %v650_v22, %v651_v24  ;;  %v4614_v43 = vpack.c.bf16 %v271_v42, %v270_v41  ;;  %v4617_v46 = vpack.c.bf16 %v273_v45, %v272_v44  ;;  %v274_v47 = vld [vmem:[#allocation5 + $0xc0] sm:$0xff]  ;;  %v275_v48 = vld [vmem:[#allocation5 + $0xc8] sm:$0xff]  ;;  %v276_v50 = vld [vmem:[#allocation5 + $0xd0] sm:$0xff]  ;;  %v653_v5 = vrot.slane %v603_v61, 1  ;;  %p5632_p7 = scmp.lt.s32.totalorder %s8576_s7, %s5630_s11  ;;  %p5633_p9 = scmp.lt.s32.totalorder %s5631_s25, %s5625_s22 }
  0x76   : > { %941 = vmatprep.mubr.f32.mxu0 %v5946_v27  ;;  %v4620_v49 = vpack.c.bf16 %v275_v48, %v274_v47  ;;  %v277_v51 = vld [vmem:[#allocation5 + $0xd8] sm:$0xff]  ;;  %v278_v53 = vld [vmem:[#allocation5 + $0xe0] sm:$0xff]  ;;  %v279_v54 = vld [vmem:[#allocation5 + $0xe8] sm:$0xff]  ;;  %v5986_v18 = vsel %vm755_vm2, %v756_v10, %v757_v11  ;;  %v759_v22 = vrot.slane %v603_v61, 2  ;;  %p5628_p3 = pneg %p5627_p2 }
  0x77   : > { %4591 = vmatpush1.bf16.msra.mxu0 %v4590_v9  ;;  %v4623_v52 = vpack.c.bf16 %v277_v51, %v276_v50  ;;  %v218_v56 = vld [vmem:[%s5913_s28] sm:$0xff]  ;;  %v219_v57 = vld [vmem:[%s5913_s28 + $0x8] sm:$0xff]  ;;  %v4626_v58 = vpack.c.bf16 %v279_v54, %v278_v53  ;;  %v280_v59 = vld [vmem:[#allocation5 + $0xf0] sm:$0xff]  ;;  %v5978_v12 = vsel %vm649_vm1, %v651_v24, %v653_v5  ;;  %4455 = vmatprep.mubr.f32.mxu1 %v5986_v18  ;;  %p5634_p12 = por %p5633_p9, %p5632_p7 }
  0x78   : > { %4592 = vmatprep.subr.bf16.mxu0 %v8647_v0  ;;  %v281_v60 = vld [vmem:[#allocation5 + $0xf8] sm:$0xff]  ;;  %v411_v62 = vrot.slane %v218_v56, 1  ;;  %v462_v63 = vrot.slane %v218_v56, 7  ;;  %v463_v1 = vrot.slane %v219_v57, 7  ;;  %v282_v3 = vld [vmem:[#allocation5 + $0x100] sm:$0xff]  ;;  %v283_v4 = vld [vmem:[#allocation5 + $0x108] sm:$0xff] }
  0x79   : > { %v4629_v2 = vpack.c.bf16 %v281_v60, %v280_v59  ;;  %v556_v8 = vrot.slane %v219_v57, 5  ;;  %v4632_v9 = vpack.c.bf16 %v283_v4, %v282_v3  ;;  %v284_v15 = vld [vmem:[#allocation5 + $0x110] sm:$0xff]  ;;  %v285_v16 = vld [vmem:[#allocation5 + $0x118] sm:$0xff]  ;;  %v286_v25 = vld [vmem:[#allocation5 + $0x120] sm:$0xff]  ;;  %p5635_p1 = pnand %p5634_p12, %p5628_p3 }
  0x7a   : > { %v5967_v6 = vsel %vm458_vm0, %v462_v63, %v463_v1  ;;  %v5970_v7 = vsel %vm458_vm0, %v411_v62, %v462_v63  ;;  %v4635_v19 = vpack.c.bf16 %v285_v16, %v284_v15  ;;  %v287_v26 = vld [vmem:[#allocation5 + $0x128] sm:$0xff]  ;;  %v222_v29 = vld [vmem:[%s5913_s28 + $0x20] sm:$0xff]  ;;  %v288_v33 = vld [vmem:[#allocation5 + $0x130] sm:$0xff] }
  0x7b   : > { %4594 = vmatpush1.bf16.msra.mxu0 %v4593_v13  ;;  %v655_v13 = vrot.slane %v5970_v7, 1  ;;  %v656_v14 = vrot.slane %v5967_v6, 1  ;;  %v5983_v17 = vsel %vm458_vm0, %v463_v1, %v556_v8  ;;  %v223_v30 = vld [vmem:[%s5913_s28 + $0x28] sm:$0xff]  ;;  %v412_v35 = vrot.slane %v222_v29, 1  ;;  %v290_v39 = vld [vmem:[#allocation5 + $0x140] sm:$0xff]  ;;  %v224_v44 = vld [vmem:[%s5913_s28 + $0x30] sm:$0xff] }
  0x7c   : > { %4595 = vmatprep.subr.bf16.mxu0 %v8647_v0  ;;  %v658_v24 = vrot.slane %v5983_v17, 1  ;;  %v465_v36 = vrot.slane %v222_v29, 7  ;;  %v225_v45 = vld [vmem:[%s5913_s28 + $0x38] sm:$0xff]  ;;  %v468_v53 = vrot.slane %v224_v44, 7  ;;  %v295_v59 = vld [vmem:[#allocation5 + $0x168] sm:$0xff]  ;;  %v226_v63 = vld [vmem:[%s5913_s28 + $0x40] sm:$0xff] }
  0x7d   : > { %v293_v50 = vld [vmem:[#allocation5 + $0x158] sm:$0xff]  ;;  %v469_v54 = vrot.slane %v225_v45, 7  ;;  %v558_v62 = vrot.slane %v225_v45, 5  ;;  %v227_v1 = vld [vmem:[%s5913_s28 + $0x48] sm:$0xff]  ;;  %v296_v8 = vld [vmem:[#allocation5 + $0x170] sm:$0xff] }
  0x7e   : > { %v6004_v32 = vsel %vm649_vm1, %v656_v14, %v658_v24  ;;  %v6014_v42 = vsel %vm458_vm0, %v412_v35, %v465_v36  ;;  %v299_v24 = vld [vmem:[#allocation5 + $0x188] sm:$0xff]  ;;  %v559_v29 = vrot.slane %v227_v1, 5 }
  0x7f   : > { %4597 = vmatpush1.bf16.msra.mxu0 %v4596_v23  ;;  %v5992_v23 = vsel %vm649_vm1, %v655_v13, %v656_v14  ;;  %8840 = vst [vmem:[#allocation13_spill] sm:$0xff] %v6014_v42  ;;  %v660_v47 = vrot.slane %v6014_v42, 1  ;;  %v6034_v60 = vsel %vm458_vm0, %v468_v53, %v469_v54  ;;  %v6050_v10 = vsel %vm458_vm0, %v469_v54, %v558_v62  ;;  %v230_v54 = vld [vmem:[%s5913_s28 + $0x60] sm:$0xff] }
  0x80   : > { %4598 = vmatprep.subr.bf16.mxu0 %v8647_v0  ;;  %8841 = vst [vmem:[#allocation14_spill] sm:$0xff] %v6034_v60  ;;  %v666_v5 = vrot.slane %v6034_v60, 1  ;;  %v471_v13 = vrot.slane %v226_v63, 7  ;;  %v472_v14 = vrot.slane %v227_v1, 7  ;;  %v305_v1 = vld [vmem:[#allocation5 + $0x1b8] sm:$0xff] }
  0x83   : > { %4600 = vmatpush1.bf16.msra.mxu0 %v4599_v28  ;;  %v5997_v28 = vsel %vm755_vm2, %v757_v11, %v759_v22  ;;  %v414_v11 = vrot.slane %v226_v63, 1  ;;  %v298_v22 = vld [vmem:[#allocation5 + $0x180] sm:$0xff]  ;;  %v304_v63 = vld [vmem:[#allocation5 + $0x1b0] sm:$0xff] }
  0x84   : > { %4601 = vmatprep.subr.bf16.mxu0 %v8647_v0 }
  0x87   : > { %4603 = vmatpush1.bf16.msra.mxu0 %v4602_v31  ;;  %v4638_v31 = vpack.c.bf16 %v287_v26, %v286_v25  ;;  %v6060_v25 = vsel %vm458_vm0, %v471_v13, %v472_v14  ;;  %v6063_v26 = vsel %vm458_vm0, %v414_v11, %v471_v13 }
  0x88   : > { %4604 = vmatprep.subr.bf16.mxu0 %v8647_v0  ;;  %8842 = vst [vmem:[#allocation15_spill] sm:$0xff] %v6060_v25  ;;  %v670_v35 = vrot.slane %v6063_v26, 1 }
  0x8b   : > { %4606 = vmatpush1.bf16.msra.mxu0 %v4605_v34  ;;  %v289_v34 = vld [vmem:[#allocation5 + $0x138] sm:$0xff] }
  0x8c   : > { %4607 = vmatprep.subr.bf16.mxu0 %v8647_v0  ;;  %v4641_v38 = vpack.c.bf16 %v289_v34, %v288_v33  ;;  %v4656_v33 = vpack.c.bf16 %v299_v24, %v298_v22 }
  0x8f   : > { %4609 = vmatpush1.bf16.msra.mxu0 %v4608_v37  ;;  %v466_v37 = vrot.slane %v223_v30, 7 }
  0x90   : > { %4610 = vmatprep.subr.bf16.mxu0 %v8647_v0 }
  0x91   : > { %v6011_v41 = vsel %vm458_vm0, %v465_v36, %v466_v37  ;;  %v671_v36 = vrot.slane %v6060_v25, 1 }
  0x92   : > { %8839 = vst [vmem:[#allocation12_spill] sm:$0xff] %v6011_v41  ;;  %v661_v48 = vrot.slane %v6011_v41, 1 }
  0x93   : > { %4612 = vmatpush1.bf16.msra.mxu0 %v4611_v40  ;;  %v291_v40 = vld [vmem:[#allocation5 + $0x148] sm:$0xff] }
  0x94   : > { %4613 = vmatprep.subr.bf16.mxu0 %v8647_v0  ;;  %v6029_v56 = vsel %vm649_vm1, %v660_v47, %v661_v48 }
  0x97   : > { %4615 = vmatpush1.bf16.msra.mxu0 %v4614_v43  ;;  %v557_v43 = vrot.slane %v223_v30, 5  ;;  %v228_v30 = vld [vmem:[%s5913_s28 + $0x50] sm:$0xff] }
  0x98   : > { %4616 = vmatprep.subr.bf16.mxu0 %v8647_v0 }
  0x99   : > { %v6024_v51 = vsel %vm458_vm0, %v466_v37, %v557_v43  ;;  %v300_v37 = vld [vmem:[#allocation5 + $0x190] sm:$0xff]  ;;  %v474_v43 = vrot.slane %v228_v30, 7 }
  0x9a   : > { %v663_v57 = vrot.slane %v6024_v51, 1 }
  0x9b   : > { %4618 = vmatpush1.bf16.msra.mxu0 %v4617_v46  ;;  %v4644_v46 = vpack.c.bf16 %v291_v40, %v290_v39  ;;  %v6076_v39 = vsel %vm458_vm0, %v472_v14, %v559_v29  ;;  %v415_v40 = vrot.slane %v228_v30, 1  ;;  %v306_v14 = vld [vmem:[#allocation5 + $0x1c0] sm:$0xff]  ;;  %v232_v29 = vld [vmem:[%s5913_s28 + $0x70] sm:$0xff]  ;;  %v233_v30 = vld [vmem:[%s5913_s28 + $0x78] sm:$0xff] }
  0x9c   : > { %4619 = vmatprep.subr.bf16.mxu0 %v8647_v0  ;;  %v6044_v3 = vsel %vm649_vm1, %v661_v48, %v663_v57  ;;  %v673_v47 = vrot.slane %v6076_v39, 1  ;;  %v302_v48 = vld [vmem:[#allocation5 + $0x1a0] sm:$0xff] }
  0x9f   : > { %4621 = vmatpush1.bf16.msra.mxu0 %v4620_v49  ;;  %v292_v49 = vld [vmem:[#allocation5 + $0x150] sm:$0xff] }
  0xa0   : > { %4622 = vmatprep.subr.bf16.mxu0 %v8647_v0  ;;  %v4647_v55 = vpack.c.bf16 %v293_v50, %v292_v49  ;;  %v303_v49 = vld [vmem:[#allocation5 + $0x1a8] sm:$0xff] }
  0xa1   : > { %v4662_v57 = vpack.c.bf16 %v303_v49, %v302_v48 }
  0xa3   : > { %4624 = vmatpush1.bf16.msra.mxu0 %v4623_v52  ;;  %v413_v52 = vrot.slane %v224_v44, 1 }
  0xa4   : > { %4625 = vmatprep.subr.bf16.mxu0 %v8647_v0 }
  0xa5   : > { %v6037_v61 = vsel %vm458_vm0, %v413_v52, %v468_v53  ;;  %v6089_v52 = vsel %vm458_vm0, %v415_v40, %v474_v43 }
  0xa6   : > { %v665_v4 = vrot.slane %v6037_v61, 1 }
  0xa7   : > { %4627 = vmatpush1.bf16.msra.mxu0 %v4626_v58  ;;  %v294_v58 = vld [vmem:[#allocation5 + $0x160] sm:$0xff] }
  0xa8   : > { %4628 = vmatprep.subr.bf16.mxu0 %v8647_v0  ;;  %v6055_v16 = vsel %vm649_vm1, %v665_v4, %v666_v5  ;;  %v416_v4 = vrot.slane %v230_v54, 1 }
  0xab   : > { %4630 = vmatpush1.bf16.msra.mxu0 %v4629_v2  ;;  %v4650_v2 = vpack.c.bf16 %v295_v59, %v294_v58  ;;  %v6096_v58 = vsel %vm649_vm1, %v671_v36, %v673_v47  ;;  %v675_v59 = vrot.slane %v6089_v52, 1 }
  0xac   : > { %4631 = vmatprep.subr.bf16.mxu0 %v8647_v0  ;;  %8846 = vst [vmem:[#allocation19_spill] sm:$0xff] %v6096_v58 }
  0xae   : > { %942 = vmatmul.mubr.f32.vlgmr.msra.gmra.mrb[0].mxu0 %v5933_v20 }
  0xaf   : > { %4633 = vmatpush1.bf16.msra.mxu0 %v4632_v9  ;;  %946 = vmatprep.mubr.f32.mxu0 %v5978_v12  ;;  %v297_v9 = vld [vmem:[#allocation5 + $0x178] sm:$0xff] }
  0xb0   : > { %4634 = vmatprep.subr.bf16.mxu0 %v8647_v0  ;;  %v4653_v15 = vpack.c.bf16 %v297_v9, %v296_v8  ;;  %v4665_v9 = vpack.c.bf16 %v305_v1, %v304_v63  ;;  %v235_v63 = vld [vmem:[%s5913_s28 + $0x88] sm:$0xff] }
  0xb2   : > { %947 = vmatmul.mubr.f32.gmra.mrb[2].mxu0 %v5938_v21 }
  0xb3   : > { %951 = vmatprep.mubr.f32.mxu0 %v5992_v23  ;;  %4636 = vmatpush1.bf16.msra.mxu0 %v4635_v19  ;;  %v668_v19 = vrot.slane %v6050_v10, 1 }
  0xb4   : > { %4637 = vmatprep.subr.bf16.mxu0 %v8647_v0 }
  0xb5   : > { %v6070_v34 = vsel %vm649_vm1, %v666_v5, %v668_v19  ;;  %v477_v5 = vrot.slane %v230_v54, 7  ;;  %v311_v54 = vld [vmem:[#allocation5 + $0x1e8] sm:$0xff] }
  0xb6   : > { %952 = vmatmul.mubr.f32.gmra.mrb[4].mxu0 %v5970_v7  ;;  %8843 = vst [vmem:[#allocation16_spill] sm:$0xff] %v6070_v34 }
  0xb7   : > { %956 = vmatprep.mubr.f32.mxu0 %v6004_v32  ;;  %4639 = vmatpush1.bf16.msra.mxu0 %v4638_v31  ;;  %v229_v31 = vld [vmem:[%s5913_s28 + $0x58] sm:$0xff]  ;;  %v6115_v22 = vsel %vm458_vm0, %v416_v4, %v477_v5 }
  0xb8   : > { %4640 = vmatprep.subr.bf16.mxu0 %v8647_v0  ;;  %v475_v44 = vrot.slane %v229_v31, 7  ;;  %v560_v53 = vrot.slane %v229_v31, 5 }
  0xba   : > { %957 = vmatmul.mubr.f32.gmra.mrb[6].mxu0 %v5967_v6  ;;  %v6086_v50 = vsel %vm458_vm0, %v474_v43, %v475_v44  ;;  %v417_v43 = vrot.slane %v232_v29, 1 }
  0xbb   : > { %961 = vmatprep.mubr.f32.mxu0 %v5946_v27  ;;  %4642 = vmatpush1.bf16.msra.mxu0 %v4641_v38  ;;  %v301_v38 = vld [vmem:[#allocation5 + $0x198] sm:$0xff]  ;;  %8845 = vst [vmem:[#allocation18_spill] sm:$0xff] %v6086_v50  ;;  %v676_v62 = vrot.slane %v6086_v50, 1 }
  0xbc   : > { %4643 = vmatprep.subr.bf16.mxu0 %v8647_v0  ;;  %v4659_v45 = vpack.c.bf16 %v301_v38, %v300_v37  ;;  %v308_v37 = vld [vmem:[#allocation5 + $0x1d0] sm:$0xff]  ;;  %v309_v38 = vld [vmem:[#allocation5 + $0x1d8] sm:$0xff] }
  0xbd   : > { %v6107_v11 = vsel %vm649_vm1, %v675_v59, %v676_v62  ;;  %v4671_v47 = vpack.c.bf16 %v309_v38, %v308_v37  ;;  %v562_v59 = vrot.slane %v233_v30, 5  ;;  %v563_v38 = vrot.slane %v235_v63, 5 }
  0xbe   : > { %962 = vmatmul.mubr.f32.gmra.mrb[8].mxu0 %v5933_v20  ;;  %8847 = vst [vmem:[#allocation20_spill] sm:$0xff] %v6107_v11 }
  0xbf   : > { %966 = vmatprep.mubr.f32.mxu0 %v5978_v12  ;;  %4645 = vmatpush1.bf16.msra.mxu0 %v4644_v46  ;;  %v6081_v46 = vsel %vm649_vm1, %v670_v35, %v671_v36  ;;  %v680_v35 = vrot.slane %v6115_v22, 1 }
  0xc0   : > { %4646 = vmatprep.subr.bf16.mxu0 %v8647_v0  ;;  %8844 = vst [vmem:[#allocation17_spill] sm:$0xff] %v6081_v46 }
  0xc2   : > { %967 = vmatmul.mubr.f32.gmra.mrb[10].mxu0 %v5938_v21 }
  0xc3   : > { %971 = vmatprep.mubr.f32.mxu0 %v6029_v56  ;;  %4648 = vmatpush1.bf16.msra.mxu0 %v4647_v55  ;;  %v231_v55 = vld [vmem:[%s5913_s28 + $0x68] sm:$0xff] }
  0xc4   : > { %4649 = vmatprep.subr.bf16.mxu0 %v8647_v0  ;;  %v478_v8 = vrot.slane %v231_v55, 7  ;;  %v561_v24 = vrot.slane %v231_v55, 5 }
  0xc6   : > { %972 = vmatmul.mubr.f32.gmra.mrb[12].mxu0 %v6014_v42  ;;  %v6112_v19 = vsel %vm458_vm0, %v477_v5, %v478_v8  ;;  %v6128_v40 = vsel %vm458_vm0, %v478_v8, %v561_v24 }
  0xc7   : > { %976 = vmatprep.mubr.f32.mxu0 %v6044_v3  ;;  %4651 = vmatpush1.bf16.msra.mxu0 %v4650_v2  ;;  %v6102_v2 = vsel %vm458_vm0, %v475_v44, %v560_v53  ;;  %8848 = vst [vmem:[#allocation21_spill] sm:$0xff] %v6112_v19  ;;  %v681_v36 = vrot.slane %v6112_v19, 1  ;;  %v480_v44 = vrot.slane %v232_v29, 7  ;;  %v683_v49 = vrot.slane %v6128_v40, 1  ;;  %v310_v53 = vld [vmem:[#allocation5 + $0x1e0] sm:$0xff] }
  0xc8   : > { %4652 = vmatprep.subr.bf16.mxu0 %v8647_v0  ;;  %v678_v13 = vrot.slane %v6102_v2, 1  ;;  %v4674_v1 = vpack.c.bf16 %v311_v54, %v310_v53  ;;  %v484_v29 = vrot.slane %v235_v63, 7 }
  0xc9   : > { %v6133_v48 = vsel %vm649_vm1, %v680_v35, %v681_v36  ;;  %v6148_v4 = vsel %vm649_vm1, %v681_v36, %v683_v49 }
  0xca   : > { %977 = vmatmul.mubr.f32.gmra.mrb[14].mxu0 %v6011_v41  ;;  %8850 = vst [vmem:[#allocation23_spill] sm:$0xff] %v6133_v48  ;;  %8851 = vst [vmem:[#allocation24_spill] sm:$0xff] %v6148_v4  ;;  %v6180_v53 = vsel %vm458_vm0, %v484_v29, %v563_v38 }
  0xcb   : > { %981 = vmatprep.mubr.f32.mxu0 %v6055_v16  ;;  %4654 = vmatpush1.bf16.msra.mxu0 %v4653_v15  ;;  %v307_v15 = vld [vmem:[#allocation5 + $0x1c8] sm:$0xff] }
  0xcc   : > { %4655 = vmatprep.subr.bf16.mxu0 %v8647_v0  ;;  %v4668_v31 = vpack.c.bf16 %v307_v15, %v306_v14 }
  0xce   : > { %982 = vmatmul.mubr.f32.gmra.mrb[16].mxu0 %v6037_v61 }
  0xcf   : > { %986 = vmatprep.mubr.f32.mxu0 %v6070_v34  ;;  %4657 = vmatpush1.bf16.msra.mxu0 %v4656_v33  ;;  %v6122_v33 = vsel %vm649_vm1, %v676_v62, %v678_v13  ;;  %v234_v62 = vld [vmem:[%s5913_s28 + $0x80] sm:$0xff]  ;;  %v313_v13 = vld [vmem:[#allocation5 + $0x1f8] sm:$0xff] }
  0xd0   : > { %4658 = vmatprep.subr.bf16.mxu0 %v8647_v0  ;;  %8849 = vst [vmem:[#allocation22_spill] sm:$0xff] %v6122_v33  ;;  %v418_v15 = vrot.slane %v234_v62, 1  ;;  %v483_v24 = vrot.slane %v234_v62, 7 }
  0xd2   : > { %987 = vmatmul.mubr.f32.gmra.mrb[18].mxu0 %v6034_v60  ;;  %v6164_v36 = vsel %vm458_vm0, %v483_v24, %v484_v29  ;;  %v6167_v37 = vsel %vm458_vm0, %v418_v15, %v483_v24  ;;  %v239_v15 = vld [vmem:[%s5913_s28 + $0xa8] sm:$0xff] }
  0xd3   : > { %991 = vmatprep.mubr.f32.mxu0 %v6081_v46  ;;  %4660 = vmatpush1.bf16.msra.mxu0 %v4659_v45  ;;  %v481_v45 = vrot.slane %v233_v30, 7  ;;  %v691_v49 = vrot.slane %v6164_v36, 1 }
  0xd4   : > { %4661 = vmatprep.subr.bf16.mxu0 %v8647_v0 }
  0xd5   : > { %v6138_v55 = vsel %vm458_vm0, %v480_v44, %v481_v45  ;;  %v6154_v14 = vsel %vm458_vm0, %v481_v45, %v562_v59 }
  0xd6   : > { %992 = vmatmul.mubr.f32.gmra.mrb[20].mxu0 %v6063_v26  ;;  %v686_v8 = vrot.slane %v6138_v55, 1  ;;  %v688_v35 = vrot.slane %v6154_v14, 1 }
  0xd7   : > { %996 = vmatprep.mubr.f32.mxu0 %v6096_v58  ;;  %4663 = vmatpush1.bf16.msra.mxu0 %v4662_v57  ;;  %v6141_v57 = vsel %vm458_vm0, %v417_v43, %v480_v44  ;;  %v236_v43 = vld [vmem:[%s5913_s28 + $0x90] sm:$0xff]  ;;  %v237_v44 = vld [vmem:[%s5913_s28 + $0x98] sm:$0xff] }
  0xd8   : > { %4664 = vmatprep.subr.bf16.mxu0 %v8647_v0  ;;  %v685_v5 = vrot.slane %v6141_v57, 1  ;;  %v6174_v45 = vsel %vm649_vm1, %v686_v8, %v688_v35  ;;  %v419_v54 = vrot.slane %v236_v43, 1  ;;  %v486_v59 = vrot.slane %v236_v43, 7 }
  0xd9   : > { %8853 = vst [vmem:[#allocation26_spill] sm:$0xff] %v6174_v45  ;;  %v487_v62 = vrot.slane %v237_v44, 7 }
  0xda   : > { %997 = vmatmul.mubr.f32.gmra.mrb[22].mxu0 %v6060_v25 }
  0xdb   : > { %1001 = vmatprep.mubr.f32.mxu0 %v6107_v11  ;;  %4666 = vmatpush1.bf16.msra.mxu0 %v4665_v9  ;;  %v312_v9 = vld [vmem:[#allocation5 + $0x1f0] sm:$0xff] }
  0xdc   : > { %4667 = vmatprep.subr.bf16.mxu0 %v8647_v0  ;;  %v4677_v30 = vpack.c.bf16 %v313_v13, %v312_v9  ;;  %v564_v9 = vrot.slane %v237_v44, 5  ;;  %v238_v13 = vld [vmem:[%s5913_s28 + $0xa0] sm:$0xff]  ;;  %v490_v44 = vrot.slane %v239_v15, 7 }
  0xdd   : > { %v420_v38 = vrot.slane %v238_v13, 1  ;;  %v489_v43 = vrot.slane %v238_v13, 7 }
  0xde   : > { %1002 = vmatmul.mubr.f32.gmra.mrb[24].mxu0 %v6089_v52  ;;  %v6204_v35 = vsel %vm458_vm0, %v487_v62, %v564_v9  ;;  %v241_v9 = vld [vmem:[%s5913_s28 + $0xb8] sm:$0xff] }
  0xdf   : > { %1006 = vmatprep.mubr.f32.mxu0 %v6122_v33  ;;  %4669 = vmatpush1.bf16.msra.mxu0 %v4668_v31  ;;  %v6159_v31 = vsel %vm649_vm1, %v685_v5, %v686_v8  ;;  %v6189_v5 = vsel %vm458_vm0, %v486_v59, %v487_v62  ;;  %v6192_v8 = vsel %vm458_vm0, %v419_v54, %v486_v59  ;;  %v565_v62 = vrot.slane %v239_v15, 5 }
  0xe0   : > { %4670 = vmatprep.subr.bf16.mxu0 %v8647_v0  ;;  %8852 = vst [vmem:[#allocation25_spill] sm:$0xff] %v6159_v31  ;;  %8855 = vst [vmem:[#allocation28_spill] sm:$0xff] %v6189_v5  ;;  %v695_v29 = vrot.slane %v6192_v8, 1  ;;  %v6213_v54 = vsel %vm458_vm0, %v489_v43, %v490_v44  ;;  %v6216_v59 = vsel %vm458_vm0, %v420_v38, %v489_v43  ;;  %v493_v43 = vrot.slane %v241_v9, 7 }
  0xe1   : > { %8856 = vst [vmem:[#allocation29_spill] sm:$0xff] %v6192_v8  ;;  %8859 = vst [vmem:[#allocation32_spill] sm:$0xff] %v6213_v54 }
  0xe2   : > { %1007 = vmatmul.mubr.f32.gmra.mrb[26].mxu0 %v6086_v50  ;;  %8860 = vst [vmem:[#allocation33_spill] sm:$0xff] %v6216_v59 }
  0xe3   : > { %1011 = vmatprep.mubr.f32.mxu0 %v6133_v48  ;;  %4672 = vmatpush1.bf16.msra.mxu0 %v4671_v47  ;;  %v690_v47 = vrot.slane %v6167_v37, 1 }
  0xe4   : > { %4673 = vmatprep.subr.bf16.mxu0 %v8647_v0 }
  0xe5   : > { %v6185_v63 = vsel %vm649_vm1, %v690_v47, %v691_v49 }
  0xe6   : > { %1012 = vmatmul.mubr.f32.gmra.mrb[28].mxu0 %v6115_v22  ;;  %8854 = vst [vmem:[#allocation27_spill] sm:$0xff] %v6185_v63 }
  0xe7   : > { %1016 = vmatprep.mubr.f32.mxu0 %v6148_v4  ;;  %4675 = vmatpush1.bf16.msra.mxu0 %v4674_v1  ;;  %v693_v1 = vrot.slane %v6180_v53, 1 }
  0xe8   : > { %4676 = vmatprep.subr.bf16.mxu0 %v8647_v0 }
  0xe9   : > { %v6199_v24 = vsel %vm649_vm1, %v691_v49, %v693_v1  ;;  %v698_v49 = vrot.slane %v6204_v35, 1  ;;  %v240_v1 = vld [vmem:[%s5913_s28 + $0xb0] sm:$0xff] }
  0xea   : > { %1017 = vmatmul.mubr.f32.gmra.mrb[30].mxu0 %v6112_v19  ;;  %8857 = vst [vmem:[#allocation30_spill] sm:$0xff] %v6199_v24  ;;  %v421_v38 = vrot.slane %v240_v1, 1  ;;  %v492_v15 = vrot.slane %v240_v1, 7  ;;  %v243_v1 = vld [vmem:[%s5913_s28 + $0xc8] sm:$0xff] }
  0xeb   : > { %1021 = vmatprep.mubr.f32.mxu0 %v6159_v31  ;;  %4678 = vmatpush1.bf16.msra.mxu0 %v4677_v30  ;;  %v696_v30 = vrot.slane %v6189_v5, 1 }
  0xec   : > { %4679 = vmatprep.subr.bf16.mxu0 %v8647_v0  ;;  %v701_v0 = vrot.slane %v6213_v54, 1 }
  0xed   : > { %v6209_v47 = vsel %vm649_vm1, %v695_v29, %v696_v30  ;;  %v6223_v13 = vsel %vm649_vm1, %v696_v30, %v698_v49  ;;  %v700_v29 = vrot.slane %v6216_v59, 1  ;;  %v6237_v49 = vsel %vm458_vm0, %v492_v15, %v493_v43 }
  0xee   : > { %1022 = vmatmul.mubr.f32.gmra.mrb[32].mxu0 %v6141_v57  ;;  %8858 = vst [vmem:[#allocation31_spill] sm:$0xff] %v6209_v47  ;;  %8861 = vst [vmem:[#allocation34_spill] sm:$0xff] %v6223_v13 }
  0xef   : > { %1026 = vmatprep.mubr.f32.mxu0 %v6174_v45  ;;  %8863 = vst [vmem:[#allocation36_spill] sm:$0xff] %v6237_v49  ;;  %v706_v45 = vrot.slane %v6237_v49, 1 }
  0xf2   : > { %1027 = vmatmul.mubr.f32.gmra.mrb[34].mxu0 %v6138_v55 }
  0xf3   : > { %1031 = vmatprep.mubr.f32.mxu0 %v6185_v63  ;;  %v6240_v63 = vsel %vm458_vm0, %v421_v38, %v492_v15  ;;  %v496_v15 = vrot.slane %v243_v1, 7 }
  0xf4   : > { %8864 = vst [vmem:[#allocation37_spill] sm:$0xff] %v6240_v63 }
  0xf6   : > { %1032 = vmatmul.mubr.f32.gmra.mrb[36].mxu0 %v6167_v37 }
  0xf7   : > { %1036 = vmatprep.mubr.f32.mxu0 %v6199_v24  ;;  %v6228_v24 = vsel %vm458_vm0, %v490_v44, %v565_v62  ;;  %v566_v44 = vrot.slane %v241_v9, 5  ;;  %v242_v62 = vld [vmem:[%s5913_s28 + $0xc0] sm:$0xff] }
  0xf8   : > { %v703_v30 = vrot.slane %v6228_v24, 1  ;;  %v422_v38 = vrot.slane %v242_v62, 1  ;;  %v495_v9 = vrot.slane %v242_v62, 7  ;;  %v245_v62 = vld [vmem:[%s5913_s28 + $0xd8] sm:$0xff] }
  0xf9   : > { %v6252_v31 = vsel %vm458_vm0, %v493_v43, %v566_v44  ;;  %v567_v43 = vrot.slane %v243_v1, 5  ;;  %v244_v44 = vld [vmem:[%s5913_s28 + $0xd0] sm:$0xff] }
  0xfa   : > { %1037 = vmatmul.mubr.f32.gmra.mrb[38].mxu0 %v6164_v36  ;;  %v6264_v4 = vsel %vm458_vm0, %v422_v38, %v495_v9  ;;  %v423_v38 = vrot.slane %v244_v44, 1  ;;  %v498_v1 = vrot.slane %v244_v44, 7  ;;  %v247_v44 = vld [vmem:[%s5913_s28 + $0xe8] sm:$0xff] }
  0xfb   : > { %1041 = vmatprep.mubr.f32.mxu0 %v6209_v47  ;;  %v6233_v47 = vsel %vm649_vm1, %v700_v29, %v701_v0  ;;  %v705_v29 = vrot.slane %v6240_v63, 1  ;;  %8868 = vst [vmem:[#allocation41_spill] sm:$0xff] %v6264_v4  ;;  %v6276_v33 = vsel %vm458_vm0, %v496_v15, %v567_v43  ;;  %v246_v43 = vld [vmem:[%s5913_s28 + $0xe0] sm:$0xff] }
  0xfc   : > { %8862 = vst [vmem:[#allocation35_spill] sm:$0xff] %v6233_v47  ;;  %v6288_v11 = vsel %vm458_vm0, %v423_v38, %v498_v1  ;;  %v424_v34 = vrot.slane %v246_v43, 1  ;;  %v501_v38 = vrot.slane %v246_v43, 7 }
  0xfd   : > { %8872 = vst [vmem:[#allocation45_spill] sm:$0xff] %v6288_v11 }
  0xfe   : > { %1042 = vmatmul.mubr.f32.gmra.mrb[40].mxu0 %v6192_v8 }
  0xff   : > { %1046 = vmatprep.mubr.f32.mxu0 %v6223_v13  ;;  %v6247_v13 = vsel %vm649_vm1, %v701_v0, %v703_v30  ;;  %v708_v0 = vrot.slane %v6252_v31, 1  ;;  %v6261_v30 = vsel %vm458_vm0, %v495_v9, %v496_v15  ;;  %v499_v9 = vrot.slane %v245_v62, 7 }
 0x100   : > { %8865 = vst [vmem:[#allocation38_spill] sm:$0xff] %v6247_v13  ;;  %8867 = vst [vmem:[#allocation40_spill] sm:$0xff] %v6261_v30  ;;  %v711_v48 = vrot.slane %v6261_v30, 1  ;;  %v568_v15 = vrot.slane %v245_v62, 5 }
 0x102   : > { %1047 = vmatmul.mubr.f32.gmra.mrb[42].mxu0 %v6189_v5  ;;  %v6300_v46 = vsel %vm458_vm0, %v499_v9, %v568_v15 }
 0x103   : > { %1051 = vmatprep.mubr.f32.mxu0 %v6233_v47  ;;  %v6257_v47 = vsel %vm649_vm1, %v705_v29, %v706_v45  ;;  %v710_v29 = vrot.slane %v6264_v4, 1 }
 0x104   : > { %8866 = vst [vmem:[#allocation39_spill] sm:$0xff] %v6257_v47 }
 0x106   : > { %1052 = vmatmul.mubr.f32.gmra.mrb[44].mxu0 %v6216_v59 }
 0x107   : > { %1056 = vmatprep.mubr.f32.mxu0 %v6247_v13  ;;  %v6271_v13 = vsel %vm649_vm1, %v706_v45, %v708_v0  ;;  %v713_v45 = vrot.slane %v6276_v33, 1  ;;  %v6285_v0 = vsel %vm458_vm0, %v498_v1, %v499_v9  ;;  %v502_v1 = vrot.slane %v247_v44, 7 }
 0x108   : > { %8869 = vst [vmem:[#allocation42_spill] sm:$0xff] %v6271_v13  ;;  %8871 = vst [vmem:[#allocation44_spill] sm:$0xff] %v6285_v0  ;;  %v716_v58 = vrot.slane %v6285_v0, 1  ;;  %v569_v9 = vrot.slane %v247_v44, 5 }
 0x10a   : > { %1057 = vmatmul.mubr.f32.gmra.mrb[46].mxu0 %v6213_v54 }
 0x10b   : > { %1061 = vmatprep.mubr.f32.mxu0 %v6257_v47  ;;  %v6281_v47 = vsel %vm649_vm1, %v710_v29, %v711_v48  ;;  %v715_v29 = vrot.slane %v6288_v11, 1 }
 0x10c   : > { %8870 = vst [vmem:[#allocation43_spill] sm:$0xff] %v6281_v47 }
 0x10d   : > { %v6305_v62 = vsel %vm649_vm1, %v715_v29, %v716_v58 }
 0x10e   : > { %1062 = vmatmul.mubr.f32.gmra.mrb[48].mxu0 %v6240_v63  ;;  %8874 = vst [vmem:[#allocation47_spill] sm:$0xff] %v6305_v62 }
 0x10f   : > { %1066 = vmatprep.mubr.f32.mxu0 %v6271_v13  ;;  %v6295_v13 = vsel %vm649_vm1, %v711_v48, %v713_v45  ;;  %v718_v48 = vrot.slane %v6300_v46, 1  ;;  %v6309_v45 = vsel %vm458_vm0, %v501_v38, %v502_v1 }
 0x110   : > { %8873 = vst [vmem:[#allocation46_spill] sm:$0xff] %v6295_v13  ;;  %8875 = vst [vmem:[#allocation48_spill] sm:$0xff] %v6309_v45  ;;  %v721_v29 = vrot.slane %v6309_v45, 1 }
 0x111   : > { %v6317_v15 = vsel %vm649_vm1, %v716_v58, %v718_v48 }
 0x112   : > { %1067 = vmatmul.mubr.f32.gmra.mrb[50].mxu0 %v6237_v49  ;;  %8876 = vst [vmem:[#allocation49_spill] sm:$0xff] %v6317_v15 }
 0x113   : > { %1071 = vmatprep.mubr.f32.mxu0 %v6281_v47  ;;  %v6312_v47 = vsel %vm458_vm0, %v424_v34, %v501_v38  ;;  %v314_v38 = vld [vmem:[#allocation5 + $0x200] sm:$0xff] }
 0x114   : > { %v720_v43 = vrot.slane %v6312_v47, 1 }
 0x116   : > { %1072 = vmatmul.mubr.f32.gmra.mrb[52].mxu0 %v6264_v4  ;;  %v6327_v34 = vsel %vm649_vm1, %v720_v43, %v721_v29  ;;  %v317_v43 = vld [vmem:[#allocation5 + $0x218] sm:$0xff] }
 0x117   : > { %1076 = vmatprep.mubr.f32.mxu0 %v6295_v13  ;;  %v6322_v13 = vsel %vm458_vm0, %v502_v1, %v569_v9  ;;  %8877 = vst [vmem:[#allocation50_spill] sm:$0xff] %v6327_v34  ;;  %v315_v1 = vld [vmem:[#allocation5 + $0x208] sm:$0xff]  ;;  %v316_v9 = vld [vmem:[#allocation5 + $0x210] sm:$0xff] }
 0x118   : > { %v723_v44 = vrot.slane %v6322_v13, 1  ;;  %v4680_v48 = vpack.c.bf16 %v315_v1, %v314_v38  ;;  %v764_v1 = vrot.slane %v5983_v17, 2 }
 0x11a   : > { %1077 = vmatmul.mubr.f32.gmra.mrb[54].mxu0 %v6261_v30  ;;  %v6333_v58 = vsel %vm649_vm1, %v721_v29, %v723_v44  ;;  %v761_v29 = vrot.slane %v5970_v7, 2  ;;  %v762_v44 = vrot.slane %v5967_v6, 2 }
 0x11b   : > { %1081 = vmatprep.mubr.f32.mxu0 %v6305_v62  ;;  %8878 = vst [vmem:[#allocation51_spill] sm:$0xff] %v6333_v58  ;;  %v319_v62 = vld [vmem:[#allocation5 + $0x228] sm:$0xff] }
 0x11c   : > { %v6347_v38 = vsel %vm755_vm2, %v761_v29, %v762_v44  ;;  %v322_v29 = vld [vmem:[#allocation5 + $0x240] sm:$0xff] }
 0x11e   : > { %1082 = vmatmul.mubr.f32.gmra.mrb[56].mxu0 %v6288_v11 }
 0x11f   : > { %1086 = vmatprep.mubr.f32.mxu0 %v6317_v15  ;;  %v318_v15 = vld [vmem:[#allocation5 + $0x220] sm:$0xff] }
 0x122   : > { %1087 = vmatmul.mubr.f32.gmra.mrb[58].mxu0 %v6285_v0 }
 0x123   : > { %1091 = vmatprep.mubr.f32.mxu0 %v6327_v34  ;;  %v4683_v34 = vpack.c.bf16 %v317_v43, %v316_v9  ;;  %v6354_v9 = vsel %vm755_vm2, %v762_v44, %v764_v1  ;;  %v766_v44 = vrot.slane %v6014_v42, 2  ;;  %v767_v1 = vrot.slane %v6011_v41, 2 }
 0x126   : > { %1092 = vmatmul.mubr.f32.gmra.mrb[60].mxu0 %v6312_v47 }
 0x127   : > { %1096 = vmatprep.mubr.f32.mxu0 %v6333_v58  ;;  %v8879_v58 = vmov 0.0|0.0  }
 0x12a   : > { %1097 = vmatmul.mubr.f32.gmra.mrb[62].mxu0 %v6309_v45 }
 0x12b   : > { %1166 = vmatprep.mubr.f32.mxu0 %v5970_v7  ;;  %v320_v7 = vld [vmem:[#allocation5 + $0x230] sm:$0xff] }
 0x12e   : > { %1167 = vmatmul.mubr.f32.vlgmr.msra.gmra.mrb[0].mxu0 %v5986_v18 }
 0x12f   : > { %4681 = vmatpush1.bf16.msra.mxu0 %v4680_v48  ;;  %1171 = vmatprep.mubr.f32.mxu0 %v5967_v6  ;;  %v4686_v48 = vpack.c.bf16 %v319_v62, %v318_v15  ;;  %v321_v6 = vld [vmem:[#allocation5 + $0x238] sm:$0xff]  ;;  %v324_v62 = vld [vmem:[#allocation5 + $0x250] sm:$0xff] }
 0x130   : > { %4682 = vmatprep.subr.bf16.mxu0 %v8879_v58  ;;  %v4689_v43 = vpack.c.bf16 %v321_v6, %v320_v7  ;;  %v325_v15 = vld [vmem:[#allocation5 + $0x258] sm:$0xff]  ;;  %v326_v7 = vld [vmem:[#allocation5 + $0x260] sm:$0xff]  ;;  %v327_v6 = vld [vmem:[#allocation5 + $0x268] sm:$0xff] }
 0x132   : > { %1172 = vmatmul.mubr.f32.gmra.mrb[2].mxu0 %v5997_v28 }
 0x133   : > { %1176 = vmatprep.mubr.f32.mxu0 %v5933_v20  ;;  %4684 = vmatpush1.bf16.msra.mxu0 %v4683_v34  ;;  %v323_v34 = vld [vmem:[#allocation5 + $0x248] sm:$0xff] }
 0x134   : > { %4685 = vmatprep.subr.bf16.mxu0 %v8879_v58  ;;  %v4692_v17 = vpack.c.bf16 %v323_v34, %v322_v29  ;;  %v769_v29 = vrot.slane %v6024_v51, 2  ;;  %v4698_v34 = vpack.c.bf16 %v327_v6, %v326_v7  ;;  %v330_v51 = vld [vmem:[#allocation5 + $0x280] sm:$0xff] }
 0x136   : > { %1177 = vmatmul.mubr.f32.gmra.mrb[4].mxu0 %v6347_v38 }
 0x137   : > { %1181 = vmatprep.mubr.f32.mxu0 %v5938_v21  ;;  %4687 = vmatpush1.bf16.msra.mxu0 %v4686_v48  ;;  %v4695_v48 = vpack.c.bf16 %v325_v15, %v324_v62  ;;  %v6375_v62 = vsel %vm755_vm2, %v767_v1, %v769_v29  ;;  %v771_v15 = vrot.slane %v6037_v61, 2  ;;  %v332_v29 = vld [vmem:[#allocation5 + $0x290] sm:$0xff] }
 0x138   : > { %4688 = vmatprep.subr.bf16.mxu0 %v8879_v58 }
 0x13a   : > { %1182 = vmatmul.mubr.f32.gmra.mrb[6].mxu0 %v6354_v9 }
 0x13b   : > { %1186 = vmatprep.mubr.f32.mxu0 %v6014_v42  ;;  %4690 = vmatpush1.bf16.msra.mxu0 %v4689_v43  ;;  %v6368_v43 = vsel %vm755_vm2, %v766_v44, %v767_v1  ;;  %v772_v44 = vrot.slane %v6034_v60, 2  ;;  %v774_v1 = vrot.slane %v6050_v10, 2  ;;  %v335_v10 = vld [vmem:[#allocation5 + $0x2a8] sm:$0xff] }
 0x13c   : > { %4691 = vmatprep.subr.bf16.mxu0 %v8879_v58 }
 0x13d   : > { %v6383_v7 = vsel %vm755_vm2, %v771_v15, %v772_v44  ;;  %v777_v15 = vrot.slane %v6060_v25, 2 }
 0x13e   : > { %1187 = vmatmul.mubr.f32.gmra.mrb[8].mxu0 %v5986_v18 }
 0x13f   : > { %1191 = vmatprep.mubr.f32.mxu0 %v6011_v41  ;;  %4693 = vmatpush1.bf16.msra.mxu0 %v4692_v17  ;;  %v328_v41 = vld [vmem:[#allocation5 + $0x270] sm:$0xff]  ;;  %v329_v17 = vld [vmem:[#allocation5 + $0x278] sm:$0xff] }
 0x140   : > { %4694 = vmatprep.subr.bf16.mxu0 %v8879_v58  ;;  %v4701_v42 = vpack.c.bf16 %v329_v17, %v328_v41  ;;  %v6390_v41 = vsel %vm755_vm2, %v772_v44, %v774_v1  ;;  %v776_v17 = vrot.slane %v6063_v26, 2  ;;  %v779_v44 = vrot.slane %v6076_v39, 2  ;;  %v336_v1 = vld [vmem:[#allocation5 + $0x2b0] sm:$0xff]  ;;  %v339_v39 = vld [vmem:[#allocation5 + $0x2c8] sm:$0xff] }
 0x142   : > { %1192 = vmatmul.mubr.f32.gmra.mrb[10].mxu0 %v5997_v28 }
 0x143   : > { %1196 = vmatprep.mubr.f32.mxu0 %v6037_v61  ;;  %4696 = vmatpush1.bf16.msra.mxu0 %v4695_v48  ;;  %v331_v48 = vld [vmem:[#allocation5 + $0x288] sm:$0xff] }
 0x144   : > { %4697 = vmatprep.subr.bf16.mxu0 %v8879_v58  ;;  %v4704_v6 = vpack.c.bf16 %v331_v48, %v330_v51  ;;  %v6398_v51 = vsel %vm755_vm2, %v776_v17, %v777_v15  ;;  %v782_v17 = vrot.slane %v6086_v50, 2 }
 0x146   : > { %1197 = vmatmul.mubr.f32.gmra.mrb[12].mxu0 %v6368_v43 }
 0x147   : > { %1201 = vmatprep.mubr.f32.mxu0 %v6034_v60  ;;  %4699 = vmatpush1.bf16.msra.mxu0 %v4698_v34  ;;  %v333_v34 = vld [vmem:[#allocation5 + $0x298] sm:$0xff] }
 0x148   : > { %4700 = vmatprep.subr.bf16.mxu0 %v8879_v58  ;;  %v4707_v60 = vpack.c.bf16 %v333_v34, %v332_v29  ;;  %v6405_v29 = vsel %vm755_vm2, %v777_v15, %v779_v44  ;;  %v781_v34 = vrot.slane %v6089_v52, 2  ;;  %v784_v15 = vrot.slane %v6102_v2, 2  ;;  %v340_v44 = vld [vmem:[#allocation5 + $0x2d0] sm:$0xff]  ;;  %v343_v2 = vld [vmem:[#allocation5 + $0x2e8] sm:$0xff] }
 0x14a   : > { %1202 = vmatmul.mubr.f32.gmra.mrb[14].mxu0 %v6375_v62 }
 0x14b   : > { %1206 = vmatprep.mubr.f32.mxu0 %v6063_v26  ;;  %4702 = vmatpush1.bf16.msra.mxu0 %v4701_v42  ;;  %v334_v42 = vld [vmem:[#allocation5 + $0x2a0] sm:$0xff] }
 0x14c   : > { %4703 = vmatprep.subr.bf16.mxu0 %v8879_v58  ;;  %v4710_v48 = vpack.c.bf16 %v335_v10, %v334_v42  ;;  %v6413_v42 = vsel %vm755_vm2, %v781_v34, %v782_v17  ;;  %v787_v34 = vrot.slane %v6112_v19, 2 }
 0x14e   : > { %1207 = vmatmul.mubr.f32.gmra.mrb[16].mxu0 %v6383_v7 }
 0x14f   : > { %1211 = vmatprep.mubr.f32.mxu0 %v6060_v25  ;;  %4705 = vmatpush1.bf16.msra.mxu0 %v4704_v6  ;;  %v337_v6 = vld [vmem:[#allocation5 + $0x2b8] sm:$0xff] }
 0x150   : > { %4706 = vmatprep.subr.bf16.mxu0 %v8879_v58  ;;  %v4713_v25 = vpack.c.bf16 %v337_v6, %v336_v1  ;;  %v6420_v1 = vsel %vm755_vm2, %v782_v17, %v784_v15  ;;  %v786_v6 = vrot.slane %v6115_v22, 2  ;;  %v789_v17 = vrot.slane %v6128_v40, 2  ;;  %v344_v15 = vld [vmem:[#allocation5 + $0x2f0] sm:$0xff] }
 0x151   : > { %v794_v40 = vrot.slane %v6154_v14, 2 }
 0x152   : > { %1212 = vmatmul.mubr.f32.gmra.mrb[18].mxu0 %v6390_v41 }
 0x153   : > { %1216 = vmatprep.mubr.f32.mxu0 %v6089_v52  ;;  %4708 = vmatpush1.bf16.msra.mxu0 %v4707_v60  ;;  %v338_v60 = vld [vmem:[#allocation5 + $0x2c0] sm:$0xff] }
 0x154   : > { %4709 = vmatprep.subr.bf16.mxu0 %v8879_v58  ;;  %v4716_v10 = vpack.c.bf16 %v339_v39, %v338_v60  ;;  %v6428_v60 = vsel %vm755_vm2, %v786_v6, %v787_v34  ;;  %v792_v6 = vrot.slane %v6138_v55, 2 }
 0x156   : > { %1217 = vmatmul.mubr.f32.gmra.mrb[20].mxu0 %v6398_v51 }
 0x157   : > { %1221 = vmatprep.mubr.f32.mxu0 %v6086_v50  ;;  %4711 = vmatpush1.bf16.msra.mxu0 %v4710_v48  ;;  %v341_v48 = vld [vmem:[#allocation5 + $0x2d8] sm:$0xff] }
 0x158   : > { %4712 = vmatprep.subr.bf16.mxu0 %v8879_v58  ;;  %v4719_v50 = vpack.c.bf16 %v341_v48, %v340_v44  ;;  %v6435_v44 = vsel %vm755_vm2, %v787_v34, %v789_v17  ;;  %v791_v48 = vrot.slane %v6141_v57, 2  ;;  %v6450_v34 = vsel %vm755_vm2, %v792_v6, %v794_v40 }
 0x159   : > { %v807_v40 = vrot.slane %v6213_v54, 2 }
 0x15a   : > { %1222 = vmatmul.mubr.f32.gmra.mrb[22].mxu0 %v6405_v29 }
 0x15b   : > { %1226 = vmatprep.mubr.f32.mxu0 %v6115_v22  ;;  %4714 = vmatpush1.bf16.msra.mxu0 %v4713_v25  ;;  %v342_v25 = vld [vmem:[#allocation5 + $0x2e0] sm:$0xff] }
 0x15c   : > { %4715 = vmatprep.subr.bf16.mxu0 %v8879_v58  ;;  %v4722_v39 = vpack.c.bf16 %v343_v2, %v342_v25  ;;  %v796_v25 = vrot.slane %v6167_v37, 2  ;;  %v797_v2 = vrot.slane %v6164_v36, 2 }
 0x15e   : > { %1227 = vmatmul.mubr.f32.gmra.mrb[24].mxu0 %v6413_v42  ;;  %v6457_v14 = vsel %vm755_vm2, %v796_v25, %v797_v2 }
 0x15f   : > { %1231 = vmatprep.mubr.f32.mxu0 %v6112_v19  ;;  %4717 = vmatpush1.bf16.msra.mxu0 %v4716_v10  ;;  %v345_v10 = vld [vmem:[#allocation5 + $0x2f8] sm:$0xff] }
 0x160   : > { %4718 = vmatprep.subr.bf16.mxu0 %v8879_v58  ;;  %v4725_v19 = vpack.c.bf16 %v345_v10, %v344_v15  ;;  %v802_v15 = vrot.slane %v6189_v5, 2 }
 0x162   : > { %1232 = vmatmul.mubr.f32.gmra.mrb[26].mxu0 %v6420_v1 }
 0x163   : > { %1236 = vmatprep.mubr.f32.mxu0 %v6141_v57  ;;  %4720 = vmatpush1.bf16.msra.mxu0 %v4719_v50  ;;  %v6443_v50 = vsel %vm755_vm2, %v791_v48, %v792_v6  ;;  %v806_v6 = vrot.slane %v6216_v59, 2 }
 0x164   : > { %4721 = vmatprep.subr.bf16.mxu0 %v8879_v58 }
 0x165   : > { %v6483_v25 = vsel %vm755_vm2, %v806_v6, %v807_v40 }
 0x166   : > { %1237 = vmatmul.mubr.f32.gmra.mrb[28].mxu0 %v6428_v60 }
 0x167   : > { %1241 = vmatprep.mubr.f32.mxu0 %v6138_v55  ;;  %4723 = vmatpush1.bf16.msra.mxu0 %v4722_v39  ;;  %v801_v39 = vrot.slane %v6192_v8, 2 }
 0x168   : > { %4724 = vmatprep.subr.bf16.mxu0 %v8879_v58 }
 0x169   : > { %v6470_v10 = vsel %vm755_vm2, %v801_v39, %v802_v15  ;;  %v812_v39 = vrot.slane %v6237_v49, 2 }
 0x16a   : > { %1242 = vmatmul.mubr.f32.gmra.mrb[30].mxu0 %v6435_v44 }
 0x16b   : > { %1246 = vmatprep.mubr.f32.mxu0 %v6167_v37  ;;  %4726 = vmatpush1.bf16.msra.mxu0 %v4725_v19  ;;  %v799_v19 = vrot.slane %v6180_v53, 2  ;;  %v804_v53 = vrot.slane %v6204_v35, 2  ;;  %v809_v35 = vrot.slane %v6228_v24, 2  ;;  %v814_v24 = vrot.slane %v6252_v31, 2  ;;  %v382_v31 = vld [vmem:[#allocation5 + $0x420] sm:$0xff] }
 0x16c   : > { %4727 = vmatprep.subr.bf16.mxu0 %v8879_v58 }
 0x16d   : > { %v6463_v17 = vsel %vm755_vm2, %v797_v2, %v799_v19  ;;  %v6476_v48 = vsel %vm755_vm2, %v802_v15, %v804_v53  ;;  %v6489_v2 = vsel %vm755_vm2, %v807_v40, %v809_v35  ;;  %v811_v19 = vrot.slane %v6240_v63, 2  ;;  %v378_v15 = vld [vmem:[#allocation5 + $0x400] sm:$0xff]  ;;  %v379_v53 = vld [vmem:[#allocation5 + $0x408] sm:$0xff]  ;;  %v380_v40 = vld [vmem:[#allocation5 + $0x410] sm:$0xff] }
 0x16e   : > { %1247 = vmatmul.mubr.f32.gmra.mrb[32].mxu0 %v6443_v50  ;;  %v6502_v35 = vsel %vm755_vm2, %v812_v39, %v814_v24  ;;  %v384_v24 = vld [vmem:[#allocation5 + $0x430] sm:$0xff] }
 0x16f   : > { %1251 = vmatprep.mubr.f32.mxu0 %v6164_v36  ;;  %v6496_v6 = vsel %vm755_vm2, %v811_v19, %v812_v39  ;;  %v819_v39 = vrot.slane %v6276_v33, 2  ;;  %v248_v33 = vld [vmem:[%s5913_s28 + $0xf0] sm:$0xff] }
 0x172   : > { %1252 = vmatmul.mubr.f32.gmra.mrb[34].mxu0 %v6450_v34 }
 0x173   : > { %1256 = vmatprep.mubr.f32.mxu0 %v6192_v8  ;;  %v391_v8 = vld [vmem:[#allocation5 + $0x468] sm:$0xff] }
 0x176   : > { %1257 = vmatmul.mubr.f32.gmra.mrb[36].mxu0 %v6457_v14 }
 0x177   : > { %1261 = vmatprep.mubr.f32.mxu0 %v6189_v5  ;;  %v827_v5 = vrot.slane %v6309_v45, 2 }
 0x17a   : > { %1262 = vmatmul.mubr.f32.gmra.mrb[38].mxu0 %v6463_v17 }
 0x17b   : > { %1266 = vmatprep.mubr.f32.mxu0 %v6216_v59  ;;  %v381_v59 = vld [vmem:[#allocation5 + $0x418] sm:$0xff] }
 0x17c   : > { %v4779_v19 = vpack.c.bf16 %v381_v59, %v380_v40  ;;  %v821_v40 = vrot.slane %v6288_v11, 2 }
 0x17e   : > { %1267 = vmatmul.mubr.f32.gmra.mrb[40].mxu0 %v6470_v10 }
 0x17f   : > { %1271 = vmatprep.mubr.f32.mxu0 %v6213_v54  ;;  %v4775_v54 = vpack.c.bf16 %v379_v53, %v378_v15  ;;  %v383_v15 = vld [vmem:[#allocation5 + $0x428] sm:$0xff] }
 0x180   : > { %v4783_v53 = vpack.c.bf16 %v383_v15, %v382_v31  ;;  %v387_v31 = vld [vmem:[#allocation5 + $0x448] sm:$0xff] }
 0x181   : > { %4776 = vmatprep.subr.bf16.mxu1 %v4775_v54 }
 0x182   : > { %1272 = vmatmul.mubr.f32.gmra.mrb[42].mxu0 %v6476_v48  ;;  %4778 = vmatpush3.bf16.msra.mxu1 %v4775_v54 }
 0x183   : > { %1276 = vmatprep.mubr.f32.mxu0 %v6240_v63  ;;  %v817_v63 = vrot.slane %v6261_v30, 2  ;;  %4780 = vmatprep.subr.bf16.mxu1 %v4779_v19 }
 0x185   : > { %v6515_v59 = vsel %vm755_vm2, %v817_v63, %v819_v39 }
 0x186   : > { %1277 = vmatmul.mubr.f32.gmra.mrb[44].mxu0 %v6483_v25  ;;  %4782 = vmatpush3.bf16.msra.mxu1 %v4779_v19  ;;  %v386_v19 = vld [vmem:[#allocation5 + $0x440] sm:$0xff] }
 0x187   : > { %1281 = vmatprep.mubr.f32.mxu0 %v6237_v49  ;;  %v816_v49 = vrot.slane %v6264_v4, 2  ;;  %4784 = vmatprep.subr.bf16.mxu1 %v4783_v53  ;;  %v4791_v39 = vpack.c.bf16 %v387_v31, %v386_v19  ;;  %v390_v31 = vld [vmem:[#allocation5 + $0x460] sm:$0xff] }
 0x189   : > { %v6509_v54 = vsel %vm755_vm2, %v816_v49, %v817_v63  ;;  %v385_v49 = vld [vmem:[#allocation5 + $0x438] sm:$0xff]  ;;  %v824_v63 = vrot.slane %v6300_v46, 2 }
 0x18a   : > { %1282 = vmatmul.mubr.f32.gmra.mrb[46].mxu0 %v6489_v2  ;;  %4786 = vmatpush3.bf16.msra.mxu1 %v4783_v53  ;;  %v6527_v53 = vld [vmem:[%s5913_s28 + $0xf8] sm:$0xff] }
 0x18b   : > { %1286 = vmatprep.mubr.f32.mxu0 %v6264_v4  ;;  %v4787_v4 = vpack.c.bf16 %v385_v49, %v384_v24  ;;  %v388_v24 = vld [vmem:[#allocation5 + $0x450] sm:$0xff]  ;;  %v389_v46 = vld [vmem:[#allocation5 + $0x458] sm:$0xff] }
 0x18c   : > { %v4795_v19 = vpack.c.bf16 %v389_v46, %v388_v24  ;;  %v392_v24 = vld [vmem:[#allocation5 + $0x470] sm:$0xff] }
 0x18d   : > { %4788 = vmatprep.subr.bf16.mxu1 %v4787_v4 }
 0x18e   : > { %1287 = vmatmul.mubr.f32.gmra.mrb[48].mxu0 %v6496_v6  ;;  %4790 = vmatpush3.bf16.msra.mxu1 %v4787_v4 }
 0x18f   : > { %1291 = vmatprep.mubr.f32.mxu0 %v6261_v30  ;;  %v822_v30 = vrot.slane %v6285_v0, 2  ;;  %4792 = vmatprep.subr.bf16.mxu1 %v4791_v39 }
 0x191   : > { %v6523_v15 = vsel %vm755_vm2, %v821_v40, %v822_v30  ;;  %v6532_v49 = vsel %vm755_vm2, %v822_v30, %v824_v63  ;;  %v826_v40 = vrot.slane %v6312_v47, 2  ;;  %v829_v63 = vrot.slane %v6322_v13, 2  ;;  %v347_v13 = vld [vmem:[#allocation5 + $0x308] sm:$0xff] }
 0x192   : > { %1292 = vmatmul.mubr.f32.gmra.mrb[50].mxu0 %v6502_v35  ;;  %4794 = vmatpush3.bf16.msra.mxu1 %v4791_v39  ;;  %v4799_v39 = vpack.c.bf16 %v391_v8, %v390_v31  ;;  %v348_v8 = vld [vmem:[#allocation5 + $0x310] sm:$0xff]  ;;  %v349_v31 = vld [vmem:[#allocation5 + $0x318] sm:$0xff] }
 0x193   : > { %1296 = vmatprep.mubr.f32.mxu0 %v6288_v11  ;;  %v504_v11 = vrot.slane %v248_v33, 7  ;;  %4796 = vmatprep.subr.bf16.mxu1 %v4795_v19  ;;  %v6543_v30 = vsel %vm755_vm2, %v826_v40, %v827_v5  ;;  %v6554_v46 = vsel %vm755_vm2, %v827_v5, %v829_v63  ;;  %v393_v40 = vld [vmem:[#allocation5 + $0x478] sm:$0xff]  ;;  %v4731_v5 = vpack.c.bf16 %v349_v31, %v348_v8  ;;  %v350_v63 = vld [vmem:[#allocation5 + $0x320] sm:$0xff]  ;;  %v360_v8 = vld [vmem:[#allocation5 + $0x370] sm:$0xff] }
 0x196   : > { %1297 = vmatmul.mubr.f32.gmra.mrb[52].mxu0 %v6509_v54  ;;  %4798 = vmatpush3.bf16.msra.mxu1 %v4795_v19  ;;  %v4803_v19 = vpack.c.bf16 %v393_v40, %v392_v24  ;;  %v356_v40 = vld [vmem:[#allocation5 + $0x350] sm:$0xff] }
 0x197   : > { %1301 = vmatprep.mubr.f32.mxu0 %v6285_v0  ;;  %v425_v0 = vrot.slane %v248_v33, 1  ;;  %v505_v33 = vrot.slane %v6527_v53, 7  ;;  %4800 = vmatprep.subr.bf16.mxu1 %v4799_v39 }
 0x199   : > { %v6537_v4 = vsel %vm458_vm0, %v425_v0, %v504_v11  ;;  %v6549_v0 = vsel %vm458_vm0, %v504_v11, %v505_v33 }
 0x19a   : > { %1302 = vmatmul.mubr.f32.gmra.mrb[54].mxu0 %v6515_v59  ;;  %4802 = vmatpush3.bf16.msra.mxu1 %v4799_v39  ;;  %v351_v39 = vld [vmem:[#allocation5 + $0x328] sm:$0xff] }
 0x19b   : > { %1306 = vmatprep.mubr.f32.mxu0 %v6312_v47  ;;  %4804 = vmatprep.subr.bf16.mxu1 %v4803_v19 }
 0x19e   : > { %1307 = vmatmul.mubr.f32.gmra.mrb[56].mxu0 %v6523_v15  ;;  %4806 = vmatpush3.bf16.msra.mxu1 %v4803_v19  ;;  %v358_v19 = vld [vmem:[#allocation5 + $0x360] sm:$0xff] }
 0x19f   : > { %1311 = vmatprep.mubr.f32.mxu0 %v6309_v45  ;;  %v346_v45 = vld [vmem:[#allocation5 + $0x300] sm:$0xff]  ;;  %4807 = vmatprep.subr.bf16.mxu1 %v8879_v58 }
 0x1a0   : > { %v4728_v11 = vpack.c.bf16 %v347_v13, %v346_v45  ;;  %v352_v45 = vld [vmem:[#allocation5 + $0x330] sm:$0xff] }
 0x1a1   : > { %4456 = vmatmul.mubr.f32.vlgmr.msra.gmra.mrb[0].mxu1 %v5997_v28 }
 0x1a2   : > { %1312 = vmatmul.mubr.f32.gmra.mrb[58].mxu0 %v6532_v49  ;;  %4458 = vmatprep.mubr.f32.mxu1 %v6368_v43 }
 0x1a3   : > { %1316 = vmatprep.mubr.f32.mxu0 %v6537_v4 }
 0x1a5   : > { %4459 = vmatmul.mubr.f32.gmra.mrb[2].mxu1 %v6375_v62 }
 0x1a6   : > { %1317 = vmatmul.mubr.f32.gmra.mrb[60].mxu0 %v6543_v30  ;;  %4461 = vmatprep.mubr.f32.mxu1 %v6383_v7 }
 0x1a7   : > { %1321 = vmatprep.mubr.f32.mxu0 %v6549_v0 }
 0x1a9   : > { %4462 = vmatmul.mubr.f32.gmra.mrb[4].mxu1 %v6390_v41 }
 0x1aa   : > { %1322 = vmatmul.mubr.f32.gmra.mrb[62].mxu0 %v6554_v46  ;;  %4464 = vmatprep.mubr.f32.mxu1 %v6398_v51 }
 0x1ab   : > { %1391 = vmatprep.mubr.f32.mxu0 %v6347_v38  ;;  %v353_v38 = vld [vmem:[#allocation5 + $0x338] sm:$0xff] }
 0x1ad   : > { %4465 = vmatmul.mubr.f32.gmra.mrb[6].mxu1 %v6405_v29 }
 0x1ae   : > { %1392 = vmatmul.mubr.f32.vlgmr.msra.gmra.mrb[0].mxu0 %v5992_v23  ;;  %v4734_v23 = vpack.c.bf16 %v351_v39, %v350_v63  ;;  %4467 = vmatprep.mubr.f32.mxu1 %v6413_v42  ;;  %v8880_v63 = vld [vmem:[#allocation16_spill] sm:$0xff] }
 0x1af   : > { %4729 = vmatpush1.bf16.msra.mxu0 %v4728_v11  ;;  %1396 = vmatprep.mubr.f32.mxu0 %v6354_v9  ;;  %v354_v9 = vld [vmem:[#allocation5 + $0x340] sm:$0xff] }
 0x1b0   : > { %4730 = vmatprep.subr.bf16.mxu0 %v8879_v58 }
 0x1b1   : > { %4468 = vmatmul.mubr.f32.gmra.mrb[8].mxu1 %v6420_v1 }
 0x1b2   : > { %1397 = vmatmul.mubr.f32.gmra.mrb[2].mxu0 %v6004_v32  ;;  %v4737_v32 = vpack.c.bf16 %v353_v38, %v352_v45  ;;  %4470 = vmatprep.mubr.f32.mxu1 %v6428_v60  ;;  %v8881_v45 = vld [vmem:[#allocation17_spill] sm:$0xff] }
 0x1b3   : > { %1401 = vmatprep.mubr.f32.mxu0 %v5986_v18  ;;  %4732 = vmatpush1.bf16.msra.mxu0 %v4731_v5  ;;  %v355_v18 = vld [vmem:[#allocation5 + $0x348] sm:$0xff]  ;;  %v362_v5 = vld [vmem:[#allocation5 + $0x380] sm:$0xff] }
 0x1b4   : > { %4733 = vmatprep.subr.bf16.mxu0 %v8879_v58  ;;  %v4740_v24 = vpack.c.bf16 %v355_v18, %v354_v9  ;;  %v8882_v9 = vld [vmem:[#allocation19_spill] sm:$0xff] }
 0x1b5   : > { %4471 = vmatmul.mubr.f32.gmra.mrb[10].mxu1 %v6435_v44 }
 0x1b6   : > { %1402 = vmatmul.mubr.f32.gmra.mrb[4].mxu0 %v5946_v27  ;;  %4473 = vmatprep.mubr.f32.mxu1 %v6443_v50 }
 0x1b7   : > { %1406 = vmatprep.mubr.f32.mxu0 %v5997_v28  ;;  %4735 = vmatpush1.bf16.msra.mxu0 %v4734_v23  ;;  %v357_v28 = vld [vmem:[#allocation5 + $0x358] sm:$0xff]  ;;  %v364_v23 = vld [vmem:[#allocation5 + $0x390] sm:$0xff] }
 0x1b8   : > { %4736 = vmatprep.subr.bf16.mxu0 %v8879_v58  ;;  %v4743_v13 = vpack.c.bf16 %v357_v28, %v356_v40  ;;  %v8883_v40 = vld [vmem:[#allocation20_spill] sm:$0xff] }
 0x1b9   : > { %4474 = vmatmul.mubr.f32.gmra.mrb[12].mxu1 %v6450_v34 }
 0x1ba   : > { %1407 = vmatmul.mubr.f32.gmra.mrb[6].mxu0 %v5978_v12  ;;  %4476 = vmatprep.mubr.f32.mxu1 %v6457_v14 }
 0x1bb   : > { %1411 = vmatprep.mubr.f32.mxu0 %v6368_v43  ;;  %4738 = vmatpush1.bf16.msra.mxu0 %v4737_v32  ;;  %v359_v43 = vld [vmem:[#allocation5 + $0x368] sm:$0xff]  ;;  %v366_v32 = vld [vmem:[#allocation5 + $0x3a0] sm:$0xff] }
 0x1bc   : > { %4739 = vmatprep.subr.bf16.mxu0 %v8879_v58  ;;  %v4746_v11 = vpack.c.bf16 %v359_v43, %v358_v19  ;;  %v8884_v19 = vld [vmem:[#allocation22_spill] sm:$0xff]  ;;  %v570_v43 = vrot.slane %v6527_v53, 5 }
 0x1bd   : > { %4477 = vmatmul.mubr.f32.gmra.mrb[14].mxu1 %v6463_v17 }
 0x1be   : > { %1412 = vmatmul.mubr.f32.gmra.mrb[8].mxu0 %v6029_v56  ;;  %4479 = vmatprep.mubr.f32.mxu1 %v6470_v10 }
 0x1bf   : > { %1416 = vmatprep.mubr.f32.mxu0 %v6375_v62  ;;  %4741 = vmatpush1.bf16.msra.mxu0 %v4740_v24  ;;  %v361_v62 = vld [vmem:[#allocation5 + $0x378] sm:$0xff]  ;;  %v368_v24 = vld [vmem:[#allocation5 + $0x3b0] sm:$0xff] }
 0x1c0   : > { %4742 = vmatprep.subr.bf16.mxu0 %v8879_v58  ;;  %v4749_v31 = vpack.c.bf16 %v361_v62, %v360_v8  ;;  %v373_v8 = vld [vmem:[#allocation5 + $0x3d8] sm:$0xff] }
 0x1c1   : > { %4480 = vmatmul.mubr.f32.gmra.mrb[16].mxu1 %v6476_v48  ;;  %v8885_v62 = vld [vmem:[#allocation23_spill] sm:$0xff] }
 0x1c2   : > { %1417 = vmatmul.mubr.f32.gmra.mrb[10].mxu0 %v6044_v3  ;;  %4482 = vmatprep.mubr.f32.mxu1 %v6483_v25 }
 0x1c3   : > { %1421 = vmatprep.mubr.f32.mxu0 %v6383_v7  ;;  %4744 = vmatpush1.bf16.msra.mxu0 %v4743_v13  ;;  %v363_v7 = vld [vmem:[#allocation5 + $0x388] sm:$0xff]  ;;  %v370_v13 = vld [vmem:[#allocation5 + $0x3c0] sm:$0xff] }
 0x1c4   : > { %4745 = vmatprep.subr.bf16.mxu0 %v8879_v58  ;;  %v4752_v39 = vpack.c.bf16 %v363_v7, %v362_v5  ;;  %v870_v5 = vrot.slane %v6537_v4, 2  ;;  %v871_v7 = vrot.slane %v6549_v0, 2 }
 0x1c5   : > { %4483 = vmatmul.mubr.f32.gmra.mrb[18].mxu1 %v6489_v2 }
 0x1c6   : > { %1422 = vmatmul.mubr.f32.gmra.mrb[12].mxu0 %v6055_v16  ;;  %4485 = vmatprep.mubr.f32.mxu1 %v6496_v6 }
 0x1c7   : > { %1426 = vmatprep.mubr.f32.mxu0 %v6390_v41  ;;  %4747 = vmatpush1.bf16.msra.mxu0 %v4746_v11  ;;  %v365_v41 = vld [vmem:[#allocation5 + $0x398] sm:$0xff] }
 0x1c8   : > { %4748 = vmatprep.subr.bf16.mxu0 %v8879_v58  ;;  %v4755_v38 = vpack.c.bf16 %v365_v41, %v364_v23  ;;  %v375_v23 = vld [vmem:[#allocation5 + $0x3e8] sm:$0xff]  ;;  %v872_v41 = vsel %vm755_vm2, %v870_v5, %v871_v7 }
 0x1c9   : > { %4486 = vmatmul.mubr.f32.gmra.mrb[20].mxu1 %v6502_v35 }
 0x1ca   : > { %1427 = vmatmul.mubr.f32.gmra.mrb[14].mxu0 %v8880_v63  ;;  %4488 = vmatprep.mubr.f32.mxu1 %v6509_v54 }
 0x1cb   : > { %1431 = vmatprep.mubr.f32.mxu0 %v6398_v51  ;;  %4750 = vmatpush1.bf16.msra.mxu0 %v4749_v31  ;;  %v367_v51 = vld [vmem:[#allocation5 + $0x3a8] sm:$0xff]  ;;  %v6624_v31 = vsel %vm458_vm0, %v505_v33, %v570_v43  ;;  %v8886_v33 = vld [vmem:[#allocation24_spill] sm:$0xff]  ;;  %v8902_v43 = vld [vmem:[#allocation51_spill] sm:$0xff] }
 0x1cc   : > { %4751 = vmatprep.subr.bf16.mxu0 %v8879_v58  ;;  %v4758_v18 = vpack.c.bf16 %v367_v51, %v366_v32  ;;  %v873_v53 = vrot.slane %v6624_v31, 2  ;;  %v377_v32 = vld [vmem:[#allocation5 + $0x3f8] sm:$0xff] }
 0x1cd   : > { %4489 = vmatmul.mubr.f32.gmra.mrb[22].mxu1 %v6515_v59 }
 0x1ce   : > { %1432 = vmatmul.mubr.f32.gmra.mrb[16].mxu0 %v8881_v45  ;;  %4491 = vmatprep.mubr.f32.mxu1 %v6523_v15  ;;  %v874_v51 = vsel %vm755_vm2, %v871_v7, %v873_v53 }
 0x1cf   : > { %1436 = vmatprep.mubr.f32.mxu0 %v6405_v29  ;;  %4753 = vmatpush1.bf16.msra.mxu0 %v4752_v39  ;;  %v369_v29 = vld [vmem:[#allocation5 + $0x3b8] sm:$0xff]  ;;  %v374_v39 = vld [vmem:[#allocation5 + $0x3e0] sm:$0xff] }
 0x1d0   : > { %4754 = vmatprep.subr.bf16.mxu0 %v8879_v58  ;;  %v4761_v28 = vpack.c.bf16 %v369_v29, %v368_v24  ;;  %v8889_v29 = vld [vmem:[#allocation27_spill] sm:$0xff] }
 0x1d1   : > { %4492 = vmatmul.mubr.f32.gmra.mrb[24].mxu1 %v6532_v49 }
 0x1d2   : > { %1437 = vmatmul.mubr.f32.gmra.mrb[18].mxu0 %v8882_v9  ;;  %4494 = vmatprep.mubr.f32.mxu1 %v6543_v30 }
 0x1d3   : > { %1441 = vmatprep.mubr.f32.mxu0 %v6413_v42  ;;  %4756 = vmatpush1.bf16.msra.mxu0 %v4755_v38  ;;  %v371_v42 = vld [vmem:[#allocation5 + $0x3c8] sm:$0xff]  ;;  %v376_v38 = vld [vmem:[#allocation5 + $0x3f0] sm:$0xff] }
 0x1d4   : > { %4757 = vmatprep.subr.bf16.mxu0 %v8879_v58  ;;  %v4764_v11 = vpack.c.bf16 %v371_v42, %v370_v13  ;;  %v4773_v24 = vpack.c.bf16 %v377_v32, %v376_v38  ;;  %v8892_v13 = vld [vmem:[#allocation34_spill] sm:$0xff]  ;;  %v8893_v42 = vld [vmem:[#allocation35_spill] sm:$0xff] }
 0x1d5   : > { %4495 = vmatmul.mubr.f32.gmra.mrb[26].mxu1 %v6554_v46 }
 0x1d6   : > { %1442 = vmatmul.mubr.f32.gmra.mrb[20].mxu0 %v8883_v40  ;;  %4497 = vmatprep.mubr.f32.mxu1 %v872_v41 }
 0x1d7   : > { %1446 = vmatprep.mubr.f32.mxu0 %v6420_v1  ;;  %4759 = vmatpush1.bf16.msra.mxu0 %v4758_v18  ;;  %v372_v1 = vld [vmem:[#allocation5 + $0x3d0] sm:$0xff]  ;;  %v8887_v18 = vld [vmem:[#allocation25_spill] sm:$0xff] }
 0x1d8   : > { %4760 = vmatprep.subr.bf16.mxu0 %v8879_v58 }
 0x1d9   : > { %4498 = vmatmul.mubr.f32.gmra.mrb[28].mxu1 %v874_v51 }
 0x1da   : > { %1447 = vmatmul.mubr.f32.gmra.mrb[22].mxu0 %v8884_v19  ;;  %4500 = vmatprep.mubr.f32.mxu1 %v6543_v30 }
 0x1db   : > { %1451 = vmatprep.mubr.f32.mxu0 %v6428_v60  ;;  %4762 = vmatpush1.bf16.msra.mxu0 %v4761_v28  ;;  %v4767_v60 = vpack.c.bf16 %v373_v8, %v372_v1  ;;  %v8890_v28 = vld [vmem:[#allocation30_spill] sm:$0xff] }
 0x1dc   : > { %4763 = vmatprep.subr.bf16.mxu0 %v8879_v58 }
 0x1dd   : > { %4501 = vmatmul.mubr.f32.gmra.mrb[30].mxu1 %v6554_v46 }
 0x1de   : > { %1452 = vmatmul.mubr.f32.gmra.mrb[24].mxu0 %v8885_v62 }
 0x1df   : > { %1456 = vmatprep.mubr.f32.mxu0 %v6435_v44  ;;  %4765 = vmatpush1.bf16.msra.mxu0 %v4764_v11  ;;  %v4770_v44 = vpack.c.bf16 %v375_v23, %v374_v39  ;;  %v8904_v11 = vld [vmem:[#allocation12_spill] sm:$0xff] }
 0x1e0   : > { %4766 = vmatprep.subr.bf16.mxu0 %v8879_v58 }
 0x1e2   : > { %1457 = vmatmul.mubr.f32.gmra.mrb[26].mxu0 %v8886_v33 }
 0x1e3   : > { %1461 = vmatprep.mubr.f32.mxu0 %v6443_v50  ;;  %4768 = vmatpush1.bf16.msra.mxu0 %v4767_v60  ;;  %v8888_v50 = vld [vmem:[#allocation26_spill] sm:$0xff] }
 0x1e4   : > { %4769 = vmatprep.subr.bf16.mxu0 %v8879_v58 }
 0x1e6   : > { %1462 = vmatmul.mubr.f32.gmra.mrb[28].mxu0 %v8887_v18 }
 0x1e7   : > { %1466 = vmatprep.mubr.f32.mxu0 %v6450_v34  ;;  %4771 = vmatpush1.bf16.msra.mxu0 %v4770_v44  ;;  %v8891_v34 = vld [vmem:[#allocation31_spill] sm:$0xff] }
 0x1e8   : > { %4772 = vmatprep.subr.bf16.mxu0 %v8879_v58 }
 0x1ea   : > { %1467 = vmatmul.mubr.f32.gmra.mrb[30].mxu0 %v8888_v50 }
 0x1eb   : > { %1471 = vmatprep.mubr.f32.mxu0 %v6457_v14  ;;  %4774 = vmatpush1.bf16.msra.mxu0 %v4773_v24  ;;  %v8894_v14 = vld [vmem:[#allocation38_spill] sm:$0xff] }
 0x1ee   : > { %1472 = vmatmul.mubr.f32.gmra.mrb[32].mxu0 %v8889_v29 }
 0x1ef   : > { %1476 = vmatprep.mubr.f32.mxu0 %v6463_v17  ;;  %v8895_v17 = vld [vmem:[#allocation39_spill] sm:$0xff] }
 0x1f2   : > { %1477 = vmatmul.mubr.f32.gmra.mrb[34].mxu0 %v8890_v28 }
 0x1f3   : > { %1481 = vmatprep.mubr.f32.mxu0 %v6470_v10  ;;  %v8896_v10 = vld [vmem:[#allocation42_spill] sm:$0xff] }
 0x1f6   : > { %1482 = vmatmul.mubr.f32.gmra.mrb[36].mxu0 %v8891_v34 }
 0x1f7   : > { %1486 = vmatprep.mubr.f32.mxu0 %v6476_v48  ;;  %v8897_v48 = vld [vmem:[#allocation43_spill] sm:$0xff] }
 0x1fa   : > { %1487 = vmatmul.mubr.f32.gmra.mrb[38].mxu0 %v8892_v13 }
 0x1fb   : > { %1491 = vmatprep.mubr.f32.mxu0 %v6483_v25  ;;  %v8898_v25 = vld [vmem:[#allocation46_spill] sm:$0xff] }
 0x1fe   : > { %1492 = vmatmul.mubr.f32.gmra.mrb[40].mxu0 %v8893_v42 }
 0x1ff   : > { %1496 = vmatprep.mubr.f32.mxu0 %v6489_v2  ;;  %v8899_v2 = vld [vmem:[#allocation47_spill] sm:$0xff] }
 0x202   : > { %1497 = vmatmul.mubr.f32.gmra.mrb[42].mxu0 %v8894_v14 }
 0x203   : > { %1501 = vmatprep.mubr.f32.mxu0 %v6496_v6  ;;  %v8900_v6 = vld [vmem:[#allocation49_spill] sm:$0xff] }
 0x206   : > { %1502 = vmatmul.mubr.f32.gmra.mrb[44].mxu0 %v8895_v17 }
 0x207   : > { %1506 = vmatprep.mubr.f32.mxu0 %v6502_v35  ;;  %v8901_v35 = vld [vmem:[#allocation50_spill] sm:$0xff] }
 0x20a   : > { %1507 = vmatmul.mubr.f32.gmra.mrb[46].mxu0 %v8896_v10 }
 0x20b   : > { %1511 = vmatprep.mubr.f32.mxu0 %v6509_v54  ;;  %v863_v54 = vrot.slane %v6537_v4, 1 }
 0x20e   : > { %1512 = vmatmul.mubr.f32.gmra.mrb[48].mxu0 %v8897_v48 }
 0x20f   : > { %1516 = vmatprep.mubr.f32.mxu0 %v6515_v59  ;;  %v864_v59 = vrot.slane %v6549_v0, 1 }
 0x212   : > { %1517 = vmatmul.mubr.f32.gmra.mrb[50].mxu0 %v8898_v25 }
 0x213   : > { %1521 = vmatprep.mubr.f32.mxu0 %v6523_v15  ;;  %v6676_v15 = vsel %vm649_vm1, %v863_v54, %v864_v59  ;;  %v2217_v54 = vld [vmem:[#allocation7 + $0x30] sm:$0xff] }
 0x216   : > { %1522 = vmatmul.mubr.f32.gmra.mrb[52].mxu0 %v8899_v2 }
 0x217   : > { %1526 = vmatprep.mubr.f32.mxu0 %v6532_v49  ;;  %v866_v49 = vrot.slane %v6624_v31, 1 }
 0x21a   : > { %1527 = vmatmul.mubr.f32.gmra.mrb[54].mxu0 %v8900_v6 }
 0x21b   : > { %1531 = vmatprep.mubr.f32.mxu0 %v6543_v30  ;;  %v6681_v30 = vsel %vm649_vm1, %v864_v59, %v866_v49  ;;  %v2218_v59 = vld [vmem:[#allocation7 + $0x38] sm:$0xff] }
 0x21e   : > { %1532 = vmatmul.mubr.f32.gmra.mrb[56].mxu0 %v8901_v35 }
 0x21f   : > { %1536 = vmatprep.mubr.f32.mxu0 %v6554_v46  ;;  %v8903_v46 = vld [vmem:[#allocation13_spill] sm:$0xff] }
 0x222   : > { %1537 = vmatmul.mubr.f32.gmra.mrb[58].mxu0 %v8902_v43 }
 0x223   : > { %1541 = vmatprep.mubr.f32.mxu0 %v872_v41 }
 0x226   : > { %1542 = vmatmul.mubr.f32.gmra.mrb[60].mxu0 %v6676_v15 }
 0x227   : > { %1546 = vmatprep.mubr.f32.mxu0 %v874_v51 }
 0x22a   : > { %1547 = vmatmul.mubr.f32.gmra.mrb[62].mxu0 %v6681_v30 }
 0x22b   : > { %1616 = vmatprep.mubr.f32.mxu0 %v5946_v27  ;;  %v8905_v27 = vld [vmem:[#allocation14_spill] sm:$0xff] }
 0x22e   : > { %1617 = vmatmul.mubr.f32.vlgmr.msra.gmra.mrb[0].mxu0 %v5933_v20  ;;  %v8906_v20 = vld [vmem:[#allocation15_spill] sm:$0xff] }
 0x22f   : > { %1621 = vmatprep.mubr.f32.mxu0 %v5978_v12  ;;  %v8908_v12 = vld [vmem:[#allocation21_spill] sm:$0xff] }
 0x232   : > { %1622 = vmatmul.mubr.f32.gmra.mrb[2].mxu0 %v5938_v21  ;;  %v8907_v21 = vld [vmem:[#allocation18_spill] sm:$0xff] }
 0x233   : > { %1626 = vmatprep.mubr.f32.mxu0 %v6029_v56  ;;  %v8909_v56 = vld [vmem:[#allocation29_spill] sm:$0xff] }
 0x236   : > { %1627 = vmatmul.mubr.f32.gmra.mrb[4].mxu0 %v8903_v46 }
 0x237   : > { %1631 = vmatprep.mubr.f32.mxu0 %v6044_v3  ;;  %v8911_v3 = vld [vmem:[#allocation33_spill] sm:$0xff] }
 0x23a   : > { %1632 = vmatmul.mubr.f32.gmra.mrb[6].mxu0 %v8904_v11 }
 0x23b   : > { %1636 = vmatprep.mubr.f32.mxu0 %v6055_v16  ;;  %v8912_v16 = vld [vmem:[#allocation32_spill] sm:$0xff] }
 0x23e   : > { %1637 = vmatmul.mubr.f32.gmra.mrb[8].mxu0 %v6037_v61  ;;  %v8910_v61 = vld [vmem:[#allocation28_spill] sm:$0xff] }
 0x23f   : > { %1641 = vmatprep.mubr.f32.mxu0 %v8880_v63  ;;  %v8916_v63 = vld [vmem:[#allocation40_spill] sm:$0xff] }
 0x242   : > { %1642 = vmatmul.mubr.f32.gmra.mrb[10].mxu0 %v8905_v27 }
 0x243   : > { %1646 = vmatprep.mubr.f32.mxu0 %v8881_v45  ;;  %v8917_v45 = vld [vmem:[#allocation45_spill] sm:$0xff] }
 0x246   : > { %1647 = vmatmul.mubr.f32.gmra.mrb[12].mxu0 %v6063_v26  ;;  %v8913_v26 = vld [vmem:[#allocation37_spill] sm:$0xff] }
 0x247   : > { %1651 = vmatprep.mubr.f32.mxu0 %v8882_v9 }
 0x24a   : > { %1652 = vmatmul.mubr.f32.gmra.mrb[14].mxu0 %v8906_v20 }
 0x24b   : > { %1656 = vmatprep.mubr.f32.mxu0 %v8883_v40 }
 0x24e   : > { %1657 = vmatmul.mubr.f32.gmra.mrb[16].mxu0 %v6089_v52 }
 0x24f   : > { %1661 = vmatprep.mubr.f32.mxu0 %v8884_v19  ;;  %v8918_v19 = vld [vmem:[#allocation44_spill] sm:$0xff] }
 0x252   : > { %1662 = vmatmul.mubr.f32.gmra.mrb[18].mxu0 %v8907_v21 }
 0x253   : > { %1666 = vmatprep.mubr.f32.mxu0 %v8885_v62  ;;  %v8919_v62 = vld [vmem:[#allocation48_spill] sm:$0xff] }
 0x256   : > { %1667 = vmatmul.mubr.f32.gmra.mrb[20].mxu0 %v6115_v22  ;;  %v8914_v22 = vld [vmem:[#allocation36_spill] sm:$0xff] }
 0x257   : > { %1671 = vmatprep.mubr.f32.mxu0 %v8886_v33 }
 0x25a   : > { %1672 = vmatmul.mubr.f32.gmra.mrb[22].mxu0 %v8908_v12 }
 0x25b   : > { %1676 = vmatprep.mubr.f32.mxu0 %v8887_v18 }
 0x25e   : > { %1677 = vmatmul.mubr.f32.gmra.mrb[24].mxu0 %v6141_v57  ;;  %v8915_v57 = vld [vmem:[#allocation41_spill] sm:$0xff] }
 0x25f   : > { %1681 = vmatprep.mubr.f32.mxu0 %v8888_v50 }
 0x262   : > { %1682 = vmatmul.mubr.f32.gmra.mrb[26].mxu0 %v6138_v55 }
 0x263   : > { %1686 = vmatprep.mubr.f32.mxu0 %v8889_v29 }
 0x266   : > { %1687 = vmatmul.mubr.f32.gmra.mrb[28].mxu0 %v6167_v37 }
 0x267   : > { %1691 = vmatprep.mubr.f32.mxu0 %v8890_v28  ;;  %v2211_v28 = vld [vmem:[#allocation7] sm:$0xff] }
 0x26a   : > { %1692 = vmatmul.mubr.f32.gmra.mrb[30].mxu0 %v6164_v36 }
 0x26b   : > { %1696 = vmatprep.mubr.f32.mxu0 %v8891_v34  ;;  %v2212_v34 = vld [vmem:[#allocation7 + $0x8] sm:$0xff] }
 0x26e   : > { %1697 = vmatmul.mubr.f32.gmra.mrb[32].mxu0 %v8909_v56 }
 0x26f   : > { %1701 = vmatprep.mubr.f32.mxu0 %v8892_v13  ;;  %v4808_v13 = vpack.c.bf16 %v2212_v34, %v2211_v28  ;;  %v2221_v34 = vld [vmem:[#allocation7 + $0x50] sm:$0xff] }
 0x271   : > { %4809 = vmatpush1.bf16.msra.mxu1 %v4808_v13 }
 0x272   : > { %1702 = vmatmul.mubr.f32.gmra.mrb[34].mxu0 %v8910_v61  ;;  %4810 = vmatprep.subr.bf16.mxu1 %v8879_v58 }
 0x273   : > { %1706 = vmatprep.mubr.f32.mxu0 %v8893_v42 }
 0x274   : > { %v6727_v52 = vpop.f32.mrb[0].mxu1 }
 0x275   : > { %v6730_v55 = vpop.f32.mrb[1].mxu1 }
 0x276   : > { %1707 = vmatmul.mubr.f32.gmra.mrb[36].mxu0 %v8911_v3 }
 0x277   : > { %1711 = vmatprep.mubr.f32.mxu0 %v8894_v14  ;;  %v2213_v14 = vld [vmem:[#allocation7 + $0x10] sm:$0xff] }
 0x278   : > { %v6735_v36 = vpop.f32.mrb[2].mxu1 }
 0x279   : > { %v6737_v37 = vpop.f32.mrb[3].mxu1 }
 0x27a   : > { %1712 = vmatmul.mubr.f32.gmra.mrb[38].mxu0 %v8912_v16 }
 0x27b   : > { %1716 = vmatprep.mubr.f32.mxu0 %v8895_v17  ;;  %v2214_v17 = vld [vmem:[#allocation7 + $0x18] sm:$0xff] }
 0x27c   : > { %v6743_v9 = vpop.f32.mrb[4].mxu1 }
 0x27d   : > { %v6745_v40 = vpop.f32.mrb[5].mxu1 }
 0x27e   : > { %1717 = vmatmul.mubr.f32.gmra.mrb[40].mxu0 %v8913_v26 }
 0x27f   : > { %1721 = vmatprep.mubr.f32.mxu0 %v8896_v10 }
 0x280   : > { %v6751_v1 = vpop.f32.mrb[6].mxu1 }
 0x281   : > { %v6753_v8 = vpop.f32.mrb[7].mxu1 }
 0x282   : > { %1722 = vmatmul.mubr.f32.gmra.mrb[42].mxu0 %v8914_v22 }
 0x283   : > { %1726 = vmatprep.mubr.f32.mxu0 %v8897_v48  ;;  %v4811_v48 = vpack.c.bf16 %v2214_v17, %v2213_v14 }
 0x284   : > { %v6759_v31 = vpop.f32.mrb[8].mxu1 }
 0x285   : > { %v6761_v60 = vpop.f32.mrb[9].mxu1  ;;  %4812 = vmatpush1.bf16.msra.mxu1 %v4811_v48  ;;  %v2223_v48 = vld [vmem:[#allocation7 + $0x60] sm:$0xff] }
 0x286   : > { %1727 = vmatmul.mubr.f32.gmra.mrb[44].mxu0 %v8915_v57  ;;  %4813 = vmatprep.subr.bf16.mxu1 %v8879_v58 }
 0x287   : > { %1731 = vmatprep.mubr.f32.mxu0 %v8898_v25  ;;  %v2215_v25 = vld [vmem:[#allocation7 + $0x20] sm:$0xff] }
 0x288   : > { %v6767_v5 = vpop.f32.mrb[10].mxu1 }
 0x289   : > { %v6769_v7 = vpop.f32.mrb[11].mxu1 }
 0x28a   : > { %1732 = vmatmul.mubr.f32.gmra.mrb[46].mxu0 %v8916_v63 }
 0x28b   : > { %1736 = vmatprep.mubr.f32.mxu0 %v8899_v2  ;;  %v2216_v2 = vld [vmem:[#allocation7 + $0x28] sm:$0xff] }
 0x28e   : > { %1737 = vmatmul.mubr.f32.gmra.mrb[48].mxu0 %v8917_v45  ;;  %v2219_v45 = vld [vmem:[#allocation7 + $0x40] sm:$0xff] }
 0x28f   : > { %1741 = vmatprep.mubr.f32.mxu0 %v8900_v6  ;;  %v4814_v6 = vpack.c.bf16 %v2216_v2, %v2215_v25  ;;  %v2224_v25 = vld [vmem:[#allocation7 + $0x68] sm:$0xff] }
 0x290   : > { %v4826_v2 = vpack.c.bf16 %v2224_v25, %v2223_v48  ;;  %v2231_v48 = vld [vmem:[#allocation7 + $0xa0] sm:$0xff]  ;;  %v2232_v25 = vld [vmem:[#allocation7 + $0xa8] sm:$0xff] }
 0x291   : > { %4815 = vmatpush1.bf16.msra.mxu1 %v4814_v6 }
 0x292   : > { %1742 = vmatmul.mubr.f32.gmra.mrb[50].mxu0 %v8918_v19  ;;  %4816 = vmatprep.subr.bf16.mxu1 %v8879_v58  ;;  %v2220_v19 = vld [vmem:[#allocation7 + $0x48] sm:$0xff] }
 0x293   : > { %1746 = vmatprep.mubr.f32.mxu0 %v8901_v35 }
 0x296   : > { %1747 = vmatmul.mubr.f32.gmra.mrb[52].mxu0 %v6312_v47 }
 0x297   : > { %1751 = vmatprep.mubr.f32.mxu0 %v8902_v43 }
 0x29a   : > { %1752 = vmatmul.mubr.f32.gmra.mrb[54].mxu0 %v8919_v62 }
 0x29b   : > { %1756 = vmatprep.mubr.f32.mxu0 %v6676_v15  ;;  %v4817_v15 = vpack.c.bf16 %v2218_v59, %v2217_v54  ;;  %v2225_v59 = vld [vmem:[#allocation7 + $0x70] sm:$0xff] }
 0x29d   : > { %4818 = vmatpush1.bf16.msra.mxu1 %v4817_v15  ;;  %v2226_v15 = vld [vmem:[#allocation7 + $0x78] sm:$0xff] }
 0x29e   : > { %1757 = vmatmul.mubr.f32.gmra.mrb[56].mxu0 %v6537_v4  ;;  %v6772_v4 = vpop.f32.mrb[12].mxu1  ;;  %4819 = vmatprep.subr.bf16.mxu1 %v8879_v58 }
 0x29f   : > { %1761 = vmatprep.mubr.f32.mxu0 %v6681_v30  ;;  %v6774_v39 = vpop.f32.mrb[13].mxu1 }
 0x2a0   : > { %v6776_v23 = vpop.f32.mrb[14].mxu1 }
 0x2a1   : > { %v6778_v53 = vpop.f32.mrb[15].mxu1 }
 0x2a2   : > { %1762 = vmatmul.mubr.f32.gmra.mrb[58].mxu0 %v6549_v0  ;;  %v6780_v0 = vpop.f32.mrb[16].mxu1 }
 0x2a3   : > { %1766 = vmatprep.mubr.f32.mxu0 %v8901_v35  ;;  %v6782_v33 = vpop.f32.mrb[17].mxu1 }
 0x2a6   : > { %1767 = vmatmul.mubr.f32.gmra.mrb[60].mxu0 %v6312_v47  ;;  %v6784_v47 = vpop.f32.mrb[18].mxu1 }
 0x2a7   : > { %1771 = vmatprep.mubr.f32.mxu0 %v8902_v43  ;;  %v6786_v44 = vpop.f32.mrb[19].mxu1 }
 0x2a8   : > { %v6788_v41 = vpop.f32.mrb[20].mxu1 }
 0x2a9   : > { %v6790_v38 = vpop.f32.mrb[21].mxu1 }
 0x2aa   : > { %1772 = vmatmul.mubr.f32.gmra.mrb[62].mxu0 %v8919_v62  ;;  %v6792_v32 = vpop.f32.mrb[22].mxu1 }
 0x2ab   : > { %v6794_v51 = vpop.f32.mrb[23].mxu1 }
 0x2ac   : > { %v6796_v18 = vpop.f32.mrb[24].mxu1 }
 0x2ad   : > { %v6798_v24 = vpop.f32.mrb[25].mxu1 }
 0x2ae   : > { %v6800_v50 = vpop.f32.mrb[26].mxu1 }
 0x2af   : > { %v6802_v29 = vpop.f32.mrb[27].mxu1 }
 0x2b0   : > { %v6804_v42 = vpop.f32.mrb[28].mxu1 }
 0x2b1   : > { %v6807_v10 = vpop.f32.mrb[29].mxu1 }
 0x2b2   : > { %v6810_v35 = vpop.f32.mrb[30].mxu1 }
 0x2b3   : > { %v6813_v43 = vpop.f32.mrb[31].mxu1 }
 0x301   : > { %v1618_v49 = vpop.f32.mrb[0].mxu0 }
 0x302   : > { %v6817_v30 = vadd.f32 %v6730_v55, %v1618_v49  ;;  %v1620_v46 = vpop.f32.mrb[1].mxu0  ;;  %v4829_v49 = vpack.c.bf16 %v2226_v15, %v2225_v59 }
 0x305   : > { %v1623_v11 = vpop.f32.mrb[2].mxu0 }
 0x306   : > { %v6820_v27 = vadd.f32 %v6727_v52, %v1623_v11  ;;  %v1625_v20 = vpop.f32.mrb[3].mxu0 }
 0x307   : > { %v2339_v20 = vld [vmem:[#allocation7 + $0x400] sm:$0xff] }
 0x308   : > { %v2002_v59 = vadd.f32 %v6820_v27, %v6817_v30 }
 0x309   : > { %v1628_v21 = vpop.f32.mrb[4].mxu0 }
 0x30a   : > { %v6823_v12 = vadd.f32 %v6737_v37, %v1628_v21  ;;  %v1630_v56 = vpop.f32.mrb[5].mxu0  ;;  %v4820_v37 = vpack.c.bf16 %v2220_v19, %v2219_v45  ;;  %v2340_v21 = vld [vmem:[#allocation7 + $0x408] sm:$0xff]  ;;  %v2229_v19 = vld [vmem:[#allocation7 + $0x90] sm:$0xff] }
 0x30b   : > { %v6850_v56 = vpack.c.bf16 %v2340_v21, %v2339_v20 }
 0x30c   : > { %4821 = vmatpush1.bf16.msra.mxu1 %v4820_v37  ;;  %v2230_v37 = vld [vmem:[#allocation7 + $0x98] sm:$0xff] }
 0x30d   : > { %v1633_v61 = vpop.f32.mrb[6].mxu0  ;;  %4822 = vmatprep.subr.bf16.mxu1 %v8879_v58  ;;  %8920 = vst [vmem:[#allocation16_spill] sm:$0xff] %v6850_v56  ;;  %5000 = vmatprep.subr.bf16.mxu0 %v6850_v56 }
 0x30e   : > { %v6826_v3 = vadd.f32 %v6735_v36, %v1633_v61  ;;  %v1635_v16 = vpop.f32.mrb[7].mxu0  ;;  %v2228_v61 = vld [vmem:[#allocation7 + $0x88] sm:$0xff]  ;;  %5002 = vmatpush3.bf16.msra.mxu0 %v6850_v56 }
 0x310   : > { %v2043_v21 = vmul.f32 %v6826_v3, %v6826_v3 }
 0x311   : > { %v1638_v26 = vpop.f32.mrb[8].mxu0 }
 0x312   : > { %v6829_v22 = vadd.f32 %v6745_v40, %v1638_v26  ;;  %v1640_v55 = vpop.f32.mrb[9].mxu0  ;;  %v2222_v40 = vld [vmem:[#allocation7 + $0x58] sm:$0xff] }
 0x313   : > { %v4823_v13 = vpack.c.bf16 %v2222_v40, %v2221_v34  ;;  %v2343_v40 = vld [vmem:[#allocation7 + $0x420] sm:$0xff] }
 0x315   : > { %v1643_v57 = vpop.f32.mrb[10].mxu0  ;;  %4824 = vmatpush1.bf16.msra.mxu1 %v4823_v13  ;;  %v2344_v13 = vld [vmem:[#allocation7 + $0x428] sm:$0xff] }
 0x316   : > { %v6832_v52 = vadd.f32 %v6743_v9, %v1643_v57  ;;  %v1645_v63 = vpop.f32.mrb[11].mxu0  ;;  %4825 = vmatprep.subr.bf16.mxu1 %v8879_v58 }
 0x317   : > { %v2342_v63 = vld [vmem:[#allocation7 + $0x418] sm:$0xff] }
 0x319   : > { %v1648_v62 = vpop.f32.mrb[12].mxu0  ;;  %4827 = vmatpush1.bf16.msra.mxu1 %v4826_v2  ;;  %v4838_v2 = vpack.c.bf16 %v2232_v25, %v2231_v48  ;;  %v2235_v48 = vld [vmem:[#allocation7 + $0xc0] sm:$0xff]  ;;  %v2236_v25 = vld [vmem:[#allocation7 + $0xc8] sm:$0xff] }
 0x31a   : > { %v6835_v28 = vadd.f32 %v6753_v8, %v1648_v62  ;;  %v1650_v36 = vpop.f32.mrb[13].mxu0  ;;  %4828 = vmatprep.subr.bf16.mxu1 %v8879_v58  ;;  %v4835_v62 = vpack.c.bf16 %v2230_v37, %v2229_v19 }
 0x31d   : > { %v1653_v14 = vpop.f32.mrb[14].mxu0  ;;  %4830 = vmatpush1.bf16.msra.mxu1 %v4829_v49 }
 0x31e   : > { %v6839_v17 = vadd.f32 %v6751_v1, %v1653_v14  ;;  %v1655_v9 = vpop.f32.mrb[15].mxu0  ;;  %4831 = vmatprep.subr.bf16.mxu1 %v8879_v58  ;;  %v2041_v14 = vmul.f32 %v6820_v27, %v6820_v27 }
 0x31f   : > { %v6868_v9 = vpack.c.bf16 %v2344_v13, %v2343_v40  ;;  %v2045_v13 = vmul.f32 %v6832_v52, %v6832_v52 }
 0x321   : > { %v1658_v8 = vpop.f32.mrb[16].mxu0  ;;  %8922 = vst [vmem:[#allocation19_spill] sm:$0xff] %v6868_v9 }
 0x322   : > { %v6843_v6 = vadd.f32 %v6761_v60, %v1658_v8  ;;  %v1660_v54 = vpop.f32.mrb[17].mxu0  ;;  %v2227_v60 = vld [vmem:[#allocation7 + $0x80] sm:$0xff]  ;;  %v2042_v8 = vmul.f32 %v6823_v12, %v6823_v12 }
 0x323   : > { %v4832_v16 = vpack.c.bf16 %v2228_v61, %v2227_v60  ;;  %v2233_v61 = vld [vmem:[#allocation7 + $0xb0] sm:$0xff] }
 0x325   : > { %v1663_v1 = vpop.f32.mrb[18].mxu0  ;;  %4833 = vmatpush1.bf16.msra.mxu1 %v4832_v16  ;;  %v2234_v16 = vld [vmem:[#allocation7 + $0xb8] sm:$0xff] }
 0x326   : > { %v6847_v46 = vadd.f32 %v6759_v31, %v1663_v1  ;;  %v1665_v11 = vpop.f32.mrb[19].mxu0  ;;  %v2341_v31 = vld [vmem:[#allocation7 + $0x410] sm:$0xff]  ;;  %4834 = vmatprep.subr.bf16.mxu1 %v8879_v58 }
 0x327   : > { %v6858_v45 = vpack.c.bf16 %v2342_v63, %v2341_v31  ;;  %v2345_v1 = vld [vmem:[#allocation7 + $0x430] sm:$0xff]  ;;  %v2346_v11 = vld [vmem:[#allocation7 + $0x438] sm:$0xff]  ;;  %v2044_v31 = vmul.f32 %v6829_v22, %v6829_v22 }
 0x328   : > { %v6884_v60 = vpack.c.bf16 %v2346_v11, %v2345_v1  ;;  %v2349_v11 = vld [vmem:[#allocation7 + $0x450] sm:$0xff] }
 0x329   : > { %v1668_v26 = vpop.f32.mrb[20].mxu0  ;;  %8921 = vst [vmem:[#allocation17_spill] sm:$0xff] %v6858_v45  ;;  %5004 = vmatprep.subr.bf16.mxu0 %v6858_v45  ;;  %4836 = vmatpush1.bf16.msra.mxu1 %v4835_v62 }
 0x32a   : > { %v6854_v55 = vadd.f32 %v6769_v7, %v1668_v26  ;;  %v1670_v57 = vpop.f32.mrb[21].mxu0  ;;  %5006 = vmatpush3.bf16.msra.mxu0 %v6858_v45  ;;  %4837 = vmatprep.subr.bf16.mxu1 %v8879_v58  ;;  %8923 = vst [vmem:[#allocation20_spill] sm:$0xff] %v6884_v60  ;;  %v2003_v26 = vadd.f32 %v2002_v59, %v6823_v12 }
 0x32b   : > { %5008 = vmatprep.subr.bf16.mxu0 %v6868_v9 }
 0x32c   : > { %v2004_v19 = vadd.f32 %v2003_v26, %v6826_v3  ;;  %v2237_v26 = vld [vmem:[#allocation7 + $0xd0] sm:$0xff] }
 0x32d   : > { %v1673_v36 = vpop.f32.mrb[22].mxu0  ;;  %4839 = vmatpush1.bf16.msra.mxu1 %v4838_v2 }
 0x32e   : > { %v6862_v34 = vadd.f32 %v6767_v5, %v1673_v36  ;;  %v1675_v7 = vpop.f32.mrb[23].mxu0  ;;  %v2040_v5 = vmul.f32 %v6817_v30, %v6817_v30  ;;  %5010 = vmatpush3.bf16.msra.mxu0 %v6868_v9  ;;  %4840 = vmatprep.subr.bf16.mxu1 %v8879_v58  ;;  %v2347_v36 = vld [vmem:[#allocation7 + $0x440] sm:$0xff]  ;;  %v2005_v2 = vadd.f32 %v2004_v19, %v6829_v22 }
 0x32f   : > { %5012 = vmatprep.subr.bf16.mxu0 %v6884_v60  ;;  %v2348_v7 = vld [vmem:[#allocation7 + $0x448] sm:$0xff] }
 0x330   : > { %v2072_v20 = vadd.f32 %v2041_v14, %v2040_v5  ;;  %v6898_v14 = vpack.c.bf16 %v2348_v7, %v2347_v36  ;;  %v2006_v59 = vadd.f32 %v2005_v2, %v6832_v52 }
 0x331   : > { %v1678_v54 = vpop.f32.mrb[24].mxu0 }
 0x332   : > { %v6878_v15 = vadd.f32 %v6774_v39, %v1678_v54  ;;  %v1680_v49 = vpop.f32.mrb[25].mxu0  ;;  %v4841_v39 = vpack.c.bf16 %v2234_v16, %v2233_v61  ;;  %v2073_v57 = vadd.f32 %v2072_v20, %v2042_v8  ;;  %5014 = vmatpush3.bf16.msra.mxu0 %v6884_v60  ;;  %8924 = vst [vmem:[#allocation22_spill] sm:$0xff] %v6898_v14  ;;  %v2350_v20 = vld [vmem:[#allocation7 + $0x458] sm:$0xff] }
 0x333   : > { %v2046_v8 = vmul.f32 %v6835_v28, %v6835_v28  ;;  %5016 = vmatprep.subr.bf16.mxu0 %v6898_v14  ;;  %v2047_v61 = vmul.f32 %v6839_v17, %v6839_v17  ;;  %v6912_v16 = vpack.c.bf16 %v2350_v20, %v2349_v11 }
 0x334   : > { %4842 = vmatpush1.bf16.msra.mxu1 %v4841_v39  ;;  %v2074_v40 = vadd.f32 %v2073_v57, %v2043_v21  ;;  %v2238_v39 = vld [vmem:[#allocation7 + $0xd8] sm:$0xff]  ;;  %v2007_v57 = vadd.f32 %v2006_v59, %v6835_v28  ;;  %v2050_v59 = vmul.f32 %v6854_v55, %v6854_v55 }
 0x335   : > { %v1683_v63 = vpop.f32.mrb[26].mxu0  ;;  %4843 = vmatprep.subr.bf16.mxu1 %v8879_v58  ;;  %8925 = vst [vmem:[#allocation23_spill] sm:$0xff] %v6912_v16 }
 0x336   : > { %v6892_v37 = vadd.f32 %v6772_v4, %v1683_v63  ;;  %v1685_v62 = vpop.f32.mrb[27].mxu0  ;;  %v4844_v4 = vpack.c.bf16 %v2236_v25, %v2235_v48  ;;  %v2075_v5 = vadd.f32 %v2074_v40, %v2044_v31  ;;  %5018 = vmatpush3.bf16.msra.mxu0 %v6898_v14  ;;  %v2048_v63 = vmul.f32 %v6843_v6, %v6843_v6  ;;  %v2351_v40 = vld [vmem:[#allocation7 + $0x460] sm:$0xff] }
 0x337   : > { %5020 = vmatprep.subr.bf16.mxu0 %v6912_v16  ;;  %v2008_v62 = vadd.f32 %v2007_v57, %v6839_v17  ;;  %v2049_v25 = vmul.f32 %v6847_v46, %v6847_v46 }
 0x338   : > { %4845 = vmatpush1.bf16.msra.mxu1 %v4844_v4  ;;  %v2076_v21 = vadd.f32 %v2075_v5, %v2045_v13  ;;  %v2352_v13 = vld [vmem:[#allocation7 + $0x468] sm:$0xff]  ;;  %v2239_v4 = vld [vmem:[#allocation7 + $0xe0] sm:$0xff] }
 0x339   : > { %v1688_v54 = vpop.f32.mrb[28].mxu0  ;;  %4846 = vmatprep.subr.bf16.mxu1 %v8879_v58  ;;  %v6926_v2 = vpack.c.bf16 %v2352_v13, %v2351_v40  ;;  %v2240_v5 = vld [vmem:[#allocation7 + $0xe8] sm:$0xff]  ;;  %v2052_v13 = vmul.f32 %v6878_v15, %v6878_v15 }
 0x33a   : > { %v6906_v49 = vadd.f32 %v6778_v53, %v1688_v54  ;;  %v1690_v1 = vpop.f32.mrb[29].mxu0  ;;  %v4847_v53 = vpack.c.bf16 %v2238_v39, %v2237_v26  ;;  %v2077_v31 = vadd.f32 %v2076_v21, %v2046_v8  ;;  %5022 = vmatpush3.bf16.msra.mxu0 %v6912_v16  ;;  %v2009_v8 = vadd.f32 %v2008_v62, %v6843_v6  ;;  %v2354_v26 = vld [vmem:[#allocation7 + $0x478] sm:$0xff] }
 0x33b   : > { %8926 = vst [vmem:[#allocation24_spill] sm:$0xff] %v6926_v2  ;;  %5024 = vmatprep.subr.bf16.mxu0 %v6926_v2 }
 0x33c   : > { %4848 = vmatpush1.bf16.msra.mxu1 %v4847_v53  ;;  %v2078_v48 = vadd.f32 %v2077_v31, %v2047_v61  ;;  %v2010_v11 = vadd.f32 %v2009_v8, %v6847_v46  ;;  %v2353_v61 = vld [vmem:[#allocation7 + $0x470] sm:$0xff]  ;;  %v2242_v31 = vld [vmem:[#allocation7 + $0xf8] sm:$0xff]  ;;  %v2053_v8 = vmul.f32 %v6892_v37, %v6892_v37 }
 0x33d   : > { %v1693_v19 = vpop.f32.mrb[30].mxu0  ;;  %4849 = vmatprep.subr.bf16.mxu1 %v8879_v58  ;;  %v6938_v57 = vpack.c.bf16 %v2354_v26, %v2353_v61  ;;  %v2241_v53 = vld [vmem:[#allocation7 + $0xf0] sm:$0xff] }
 0x33e   : > { %v6920_v36 = vadd.f32 %v6776_v23, %v1693_v19  ;;  %v1695_v7 = vpop.f32.mrb[31].mxu0  ;;  %v4850_v23 = vpack.c.bf16 %v2240_v5, %v2239_v4  ;;  %v2079_v54 = vadd.f32 %v2078_v48, %v2048_v63  ;;  %5026 = vmatpush3.bf16.msra.mxu0 %v6926_v2  ;;  %v2011_v63 = vadd.f32 %v2010_v11, %v6854_v55 }
 0x33f   : > { %8927 = vst [vmem:[#allocation25_spill] sm:$0xff] %v6938_v57  ;;  %v2051_v19 = vmul.f32 %v6862_v34, %v6862_v34  ;;  %5028 = vmatprep.subr.bf16.mxu0 %v6938_v57 }
 0x340   : > { %4851 = vmatpush1.bf16.msra.mxu1 %v4850_v23  ;;  %v2080_v39 = vadd.f32 %v2079_v54, %v2049_v25  ;;  %v2012_v40 = vadd.f32 %v2011_v63, %v6862_v34  ;;  %v2055_v26 = vmul.f32 %v6920_v36, %v6920_v36 }
 0x341   : > { %v1698_v1 = vpop.f32.mrb[32].mxu0  ;;  %4852 = vmatprep.subr.bf16.mxu1 %v8879_v58 }
 0x342   : > { %v6934_v20 = vadd.f32 %v6782_v33, %v1698_v1  ;;  %v1700_v21 = vpop.f32.mrb[33].mxu0  ;;  %v4853_v33 = vpack.c.bf16 %v2242_v31, %v2241_v53  ;;  %v2081_v62 = vadd.f32 %v2080_v39, %v2050_v59  ;;  %5030 = vmatpush3.bf16.msra.mxu0 %v6938_v57  ;;  %v2013_v5 = vadd.f32 %v2012_v40, %v6878_v15 }
 0x344   : > { %4854 = vmatpush1.bf16.msra.mxu1 %v4853_v33  ;;  %v2082_v4 = vadd.f32 %v2081_v62, %v2051_v19  ;;  %v2014_v59 = vadd.f32 %v2013_v5, %v6892_v37  ;;  %v2056_v63 = vmul.f32 %v6934_v20, %v6934_v20 }
 0x345   : > { %v1703_v7 = vpop.f32.mrb[34].mxu0  ;;  %4855 = vmatprep.subr.bf16.mxu1 %v8879_v58 }
 0x346   : > { %v6948_v48 = vadd.f32 %v6780_v0, %v1703_v7  ;;  %v1705_v25 = vpop.f32.mrb[35].mxu0  ;;  %v2083_v54 = vadd.f32 %v2082_v4, %v2052_v13  ;;  %v2054_v0 = vmul.f32 %v6906_v49, %v6906_v49  ;;  %v2015_v61 = vadd.f32 %v2014_v59, %v6906_v49 }
 0x348   : > { %v2084_v21 = vadd.f32 %v2083_v54, %v2053_v8  ;;  %v2016_v31 = vadd.f32 %v2015_v61, %v6920_v36  ;;  %v2057_v7 = vmul.f32 %v6948_v48, %v6948_v48 }
 0x349   : > { %v1708_v23 = vpop.f32.mrb[36].mxu0 }
 0x34a   : > { %v6959_v1 = vadd.f32 %v6786_v44, %v1708_v23  ;;  %v1710_v11 = vpop.f32.mrb[37].mxu0  ;;  %v2085_v53 = vadd.f32 %v2084_v21, %v2054_v0  ;;  %v2017_v62 = vadd.f32 %v2016_v31, %v6934_v20 }
 0x34c   : > { %v2086_v44 = vadd.f32 %v2085_v53, %v2055_v26  ;;  %v2018_v25 = vadd.f32 %v2017_v62, %v6948_v48  ;;  %v2058_v4 = vmul.f32 %v6959_v1, %v6959_v1 }
 0x34d   : > { %v1713_v39 = vpop.f32.mrb[38].mxu0 }
 0x34e   : > { %v6968_v19 = vadd.f32 %v6784_v47, %v1713_v39  ;;  %v1715_v33 = vpop.f32.mrb[39].mxu0  ;;  %v2087_v13 = vadd.f32 %v2086_v44, %v2056_v63  ;;  %v2019_v23 = vadd.f32 %v2018_v25, %v6959_v1 }
 0x350   : > { %v2088_v47 = vadd.f32 %v2087_v13, %v2057_v7  ;;  %v2059_v54 = vmul.f32 %v6968_v19, %v6968_v19  ;;  %v2020_v11 = vadd.f32 %v2019_v23, %v6968_v19 }
 0x351   : > { %v1718_v40 = vpop.f32.mrb[40].mxu0 }
 0x352   : > { %v6977_v5 = vadd.f32 %v6790_v38, %v1718_v40  ;;  %v1720_v8 = vpop.f32.mrb[41].mxu0  ;;  %v2089_v0 = vadd.f32 %v2088_v47, %v2058_v4 }
 0x354   : > { %v2060_v21 = vmul.f32 %v6977_v5, %v6977_v5  ;;  %v2090_v38 = vadd.f32 %v2089_v0, %v2059_v54  ;;  %v2021_v39 = vadd.f32 %v2020_v11, %v6977_v5 }
 0x355   : > { %v1723_v59 = vpop.f32.mrb[42].mxu0 }
 0x356   : > { %v6986_v61 = vadd.f32 %v6788_v41, %v1723_v59  ;;  %v1725_v26 = vpop.f32.mrb[43].mxu0  ;;  %v2091_v63 = vadd.f32 %v2090_v38, %v2060_v21 }
 0x358   : > { %v2061_v53 = vmul.f32 %v6986_v61, %v6986_v61  ;;  %v2022_v33 = vadd.f32 %v2021_v39, %v6986_v61 }
 0x359   : > { %v1728_v31 = vpop.f32.mrb[44].mxu0 }
 0x35a   : > { %v6993_v44 = vadd.f32 %v6794_v51, %v1728_v31  ;;  %v1730_v62 = vpop.f32.mrb[45].mxu0  ;;  %v2092_v7 = vadd.f32 %v2091_v63, %v2061_v53 }
 0x35c   : > { %v2023_v40 = vadd.f32 %v2022_v33, %v6993_v44  ;;  %v2062_v41 = vmul.f32 %v6993_v44, %v6993_v44 }
 0x35d   : > { %v1733_v13 = vpop.f32.mrb[46].mxu0 }
 0x35e   : > { %v2093_v25 = vadd.f32 %v2092_v7, %v2062_v41  ;;  %v6999_v4 = vadd.f32 %v6792_v32, %v1733_v13  ;;  %v1735_v8 = vpop.f32.mrb[47].mxu0 }
 0x360   : > { %v2024_v47 = vadd.f32 %v2023_v40, %v6999_v4  ;;  %v2063_v23 = vmul.f32 %v6999_v4, %v6999_v4 }
 0x361   : > { %v1738_v51 = vpop.f32.mrb[48].mxu0 }
 0x362   : > { %v2094_v54 = vadd.f32 %v2093_v25, %v2063_v23  ;;  %v7005_v59 = vadd.f32 %v6798_v24, %v1738_v51  ;;  %v1740_v0 = vpop.f32.mrb[49].mxu0 }
 0x364   : > { %v2025_v11 = vadd.f32 %v2024_v47, %v7005_v59  ;;  %v2064_v21 = vmul.f32 %v7005_v59, %v7005_v59 }
 0x365   : > { %v1743_v26 = vpop.f32.mrb[50].mxu0 }
 0x366   : > { %v2095_v32 = vadd.f32 %v2094_v54, %v2064_v21  ;;  %v7011_v38 = vadd.f32 %v6796_v18, %v1743_v26  ;;  %v1745_v39 = vpop.f32.mrb[51].mxu0 }
 0x368   : > { %v2026_v53 = vadd.f32 %v2025_v11, %v7011_v38  ;;  %v2065_v31 = vmul.f32 %v7011_v38, %v7011_v38 }
 0x369   : > { %v1748_v63 = vpop.f32.mrb[52].mxu0 }
 0x36a   : > { %v2096_v24 = vadd.f32 %v2095_v32, %v2065_v31  ;;  %v7017_v33 = vadd.f32 %v6802_v29, %v1748_v63  ;;  %v1750_v62 = vpop.f32.mrb[53].mxu0 }
 0x36c   : > { %v2027_v7 = vadd.f32 %v2026_v53, %v7017_v33  ;;  %v2066_v40 = vmul.f32 %v7017_v33, %v7017_v33 }
 0x36d   : > { %v1753_v41 = vpop.f32.mrb[54].mxu0 }
 0x36e   : > { %v2097_v18 = vadd.f32 %v2096_v24, %v2066_v40  ;;  %v7023_v13 = vadd.f32 %v6800_v50, %v1753_v41  ;;  %v1755_v25 = vpop.f32.mrb[55].mxu0 }
 0x370   : > { %v2028_v8 = vadd.f32 %v2027_v7, %v7023_v13  ;;  %v2067_v47 = vmul.f32 %v7023_v13, %v7023_v13 }
 0x371   : > { %v1758_v23 = vpop.f32.mrb[56].mxu0 }
 0x372   : > { %v2098_v29 = vadd.f32 %v2097_v18, %v2067_v47  ;;  %v7029_v51 = vadd.f32 %v6807_v10, %v1758_v23  ;;  %v1760_v54 = vpop.f32.mrb[57].mxu0 }
 0x374   : > { %v2029_v0 = vadd.f32 %v2028_v8, %v7029_v51  ;;  %v2068_v11 = vmul.f32 %v7029_v51, %v7029_v51 }
 0x375   : > { %v1763_v21 = vpop.f32.mrb[58].mxu0 }
 0x376   : > { %v2099_v50 = vadd.f32 %v2098_v29, %v2068_v11  ;;  %v7035_v26 = vadd.f32 %v6804_v42, %v1763_v21  ;;  %v1765_v32 = vpop.f32.mrb[59].mxu0 }
 0x378   : > { %v2030_v39 = vadd.f32 %v2029_v0, %v7035_v26  ;;  %v2069_v53 = vmul.f32 %v7035_v26, %v7035_v26 }
 0x379   : > { %v1768_v31 = vpop.f32.mrb[60].mxu0 }
 0x37a   : > { %v2100_v10 = vadd.f32 %v2099_v50, %v2069_v53  ;;  %v7041_v63 = vadd.f32 %v6813_v43, %v1768_v31  ;;  %v1770_v24 = vpop.f32.mrb[61].mxu0 }
 0x37c   : > { %v2031_v62 = vadd.f32 %v2030_v39, %v7041_v63  ;;  %v2070_v7 = vmul.f32 %v7041_v63, %v7041_v63 }
 0x37d   : > { %v1773_v40 = vpop.f32.mrb[62].mxu0 }
 0x37e   : > { %v2101_v42 = vadd.f32 %v2100_v10, %v2070_v7  ;;  %v1999_v41 = vadd.f32 %v6810_v35, %v1773_v40  ;;  %v1775_v18 = vpop.f32.mrb[63].mxu0 }
 0x380   : > { %v2032_v25 = vadd.f32 %v2031_v62, %v1999_v41  ;;  %v2071_v8 = vmul.f32 %v1999_v41, %v1999_v41 }
 0x382   : > { %v2033_v47 = vrot.slane %v2032_v25, 4  ;;  %v2102_v23 = vadd.f32 %v2101_v42, %v2071_v8 }
 0x384   : > { %v2034_v29 = vadd.f32 %v2033_v47, %v2032_v25  ;;  %v2103_v54 = vrot.slane %v2102_v23, 4 }
 0x386   : > { %v2035_v0 = vrot.slane %v2034_v29, 2  ;;  %v2104_v43 = vadd.f32 %v2103_v54, %v2102_v23 }
 0x388   : > { %v2036_v11 = vadd.f32 %v2035_v0, %v2034_v29  ;;  %v2105_v21 = vrot.slane %v2104_v43, 2 }
 0x38a   : > { %v2037_v50 = vrot.slane %v2036_v11, 1  ;;  %v2106_v32 = vadd.f32 %v2105_v21, %v2104_v43 }
 0x38c   : > { %v2038_v39 = vadd.f32 %v2037_v50, %v2036_v11  ;;  %v2107_v53 = vrot.slane %v2106_v32, 1 }
 0x38e   : > { %v7047_v31 = vmul.f32 0.00390625, %v2038_v39  ;;  %v2108_v10 = vadd.f32 %v2107_v53, %v2106_v32 }
 0x390   : > { %v2109_v24 = vmul.f32 0.00390625, %v2108_v10  ;;  %v2110_v35 = vmul.f32 %v7047_v31, %v7047_v31  ;;  %v2144_v62 = vsub.f32 %v1999_v41, %v7047_v31  ;;  %v2134_v18 = vsub.f32 %v6986_v61, %v7047_v31 }
 0x391   : > { %v2135_v25 = vsub.f32 %v6993_v44, %v7047_v31  ;;  %v2136_v8 = vsub.f32 %v6999_v4, %v7047_v31  ;;  %v2137_v47 = vsub.f32 %v7005_v59, %v7047_v31  ;;  %v2138_v23 = vsub.f32 %v7011_v38, %v7047_v31 }
 0x392   : > { %v2111_v7 = vsub.f32 %v2109_v24, %v2110_v35  ;;  %v2139_v41 = vsub.f32 %v7017_v33, %v7047_v31  ;;  %v2140_v29 = vsub.f32 %v7023_v13, %v7047_v31  ;;  %v2141_v61 = vsub.f32 %v7029_v51, %v7047_v31 }
 0x393   : > { %v2142_v44 = vsub.f32 %v7035_v26, %v7047_v31  ;;  %v2143_v4 = vsub.f32 %v7041_v63, %v7047_v31  ;;  %v2113_v59 = vsub.f32 %v6817_v30, %v7047_v31  ;;  %v2114_v38 = vsub.f32 %v6820_v27, %v7047_v31 }
 0x394   : > { %v2112_v40 = vmax.f32 %v2111_v7, 0.0  ;;  %v2115_v33 = vsub.f32 %v6823_v12, %v7047_v31  ;;  %v2116_v13 = vsub.f32 %v6826_v3, %v7047_v31  ;;  %v2117_v51 = vsub.f32 %v6829_v22, %v7047_v31 }
 0x395   : > { %v2118_v26 = vsub.f32 %v6832_v52, %v7047_v31  ;;  %v2119_v63 = vsub.f32 %v6835_v28, %v7047_v31  ;;  %v2120_v30 = vsub.f32 %v6839_v17, %v7047_v31  ;;  %v2121_v27 = vsub.f32 %v6843_v6, %v7047_v31 }
 0x396   : > { %v2145_v42 = vadd.f32 1e-05, %v2112_v40  ;;  %v2122_v12 = vsub.f32 %v6847_v46, %v7047_v31  ;;  %v2123_v3 = vsub.f32 %v6854_v55, %v7047_v31  ;;  %v2124_v22 = vsub.f32 %v6862_v34, %v7047_v31 }
 0x397   : > { %v2125_v52 = vsub.f32 %v6878_v15, %v7047_v31  ;;  %v2126_v28 = vsub.f32 %v6892_v37, %v7047_v31  ;;  %v2127_v17 = vsub.f32 %v6906_v49, %v7047_v31  ;;  %v2128_v6 = vsub.f32 %v6920_v36, %v7047_v31 }
 0x398   : > { %5503 = vrsqrt.f32 %v2145_v42  ;;  %v2129_v46 = vsub.f32 %v6934_v20, %v7047_v31  ;;  %v2130_v55 = vsub.f32 %v6948_v48, %v7047_v31  ;;  %v2131_v34 = vsub.f32 %v6959_v1, %v7047_v31 }
 0x399   : > { %v2132_v15 = vsub.f32 %v6968_v19, %v7047_v31  ;;  %v2133_v1 = vsub.f32 %v6977_v5, %v7047_v31 }
 0x3a2   : > { %v5504_v54 = vpop.eup %5503 }
 0x3a3   : > { %v7112_v37 = vmul.f32 %v5504_v54, %v2144_v62  ;;  %v7114_v0 = vmul.f32 %v5504_v54, %v2113_v59  ;;  %v7116_v49 = vmul.f32 %v5504_v54, %v2114_v38  ;;  %v7118_v36 = vmul.f32 %v5504_v54, %v2115_v33 }
 0x3a4   : > { %v7120_v43 = vmul.f32 %v5504_v54, %v2116_v13  ;;  %v7122_v20 = vmul.f32 %v5504_v54, %v2117_v51  ;;  %v7124_v11 = vmul.f32 %v5504_v54, %v2118_v26  ;;  %v7126_v48 = vmul.f32 %v5504_v54, %v2119_v63 }
 0x3a5   : > { %8928 = vst [vmem:[#allocation26_spill] sm:$0xff] %v7112_v37  ;;  %v7130_v19 = vmul.f32 %v5504_v54, %v2120_v30  ;;  %v7132_v21 = vmul.f32 %v5504_v54, %v2121_v27  ;;  %v7134_v50 = vmul.f32 %v5504_v54, %v2122_v12  ;;  %v7136_v32 = vmul.f32 %v5504_v54, %v2123_v3 }
 0x3a6   : > { %v7138_v39 = vmul.f32 %v5504_v54, %v2124_v22  ;;  %v7140_v53 = vmul.f32 %v5504_v54, %v2125_v52  ;;  %v7142_v10 = vmul.f32 %v5504_v54, %v2126_v28  ;;  %v7144_v24 = vmul.f32 %v5504_v54, %v2127_v17 }
 0x3a7   : > { %v7146_v35 = vmul.f32 %v5504_v54, %v2128_v6  ;;  %v7148_v62 = vmul.f32 %v5504_v54, %v2129_v46  ;;  %v7150_v5 = vmul.f32 %v5504_v54, %v2130_v55  ;;  %v7152_v31 = vmul.f32 %v5504_v54, %v2131_v34 }
 0x3a8   : > { %v7154_v7 = vmul.f32 %v5504_v54, %v2132_v15  ;;  %v7156_v40 = vmul.f32 %v5504_v54, %v2133_v1  ;;  %v7158_v42 = vmul.f32 %v5504_v54, %v2134_v18  ;;  %v7160_v59 = vmul.f32 %v5504_v54, %v2135_v25  ;;  %v7178_v18 = vld [vmem:[#allocation7 + $0x100] sm:$0xff]  ;;  %v7180_v25 = vld [vmem:[#allocation7 + $0x108] sm:$0xff] }
 0x3a9   : > { %v7162_v38 = vmul.f32 %v5504_v54, %v2136_v8  ;;  %v7164_v33 = vmul.f32 %v5504_v54, %v2137_v47  ;;  %v7166_v13 = vmul.f32 %v5504_v54, %v2138_v23  ;;  %v7168_v51 = vmul.f32 %v5504_v54, %v2139_v41  ;;  %v7182_v8 = vld [vmem:[#allocation7 + $0x110] sm:$0xff]  ;;  %v7184_v47 = vld [vmem:[#allocation7 + $0x118] sm:$0xff]  ;;  %v7186_v23 = vld [vmem:[#allocation7 + $0x120] sm:$0xff] }
 0x3aa   : > { %v7170_v26 = vmul.f32 %v5504_v54, %v2140_v29  ;;  %v7172_v63 = vmul.f32 %v5504_v54, %v2141_v61  ;;  %v7174_v30 = vmul.f32 %v5504_v54, %v2142_v44  ;;  %v7176_v27 = vmul.f32 %v5504_v54, %v2143_v4  ;;  %v7188_v41 = vld [vmem:[#allocation7 + $0x128] sm:$0xff]  ;;  %v7190_v29 = vld [vmem:[#allocation7 + $0x130] sm:$0xff]  ;;  %v7192_v61 = vld [vmem:[#allocation7 + $0x138] sm:$0xff] }
 0x3ab   : > { %v7194_v44 = vld [vmem:[#allocation7 + $0x140] sm:$0xff]  ;;  %v7196_v4 = vld [vmem:[#allocation7 + $0x148] sm:$0xff]  ;;  %v2181_v12 = vmax.f32 %v7118_v36, 0.0  ;;  %v2182_v3 = vmax.f32 %v7120_v43, 0.0  ;;  %v2179_v54 = vmax.f32 %v7114_v0, 0.0  ;;  %v2180_v46 = vmax.f32 %v7116_v49, 0.0 }
 0x3ac   : > { %8929 = vst [vmem:[#allocation27_spill] sm:$0xff] %v7170_v26  ;;  %8930 = vst [vmem:[#allocation30_spill] sm:$0xff] %v7172_v63  ;;  %v2183_v55 = vmax.f32 %v7122_v20, 0.0  ;;  %v2184_v34 = vmax.f32 %v7124_v11, 0.0  ;;  %v2185_v15 = vmax.f32 %v7126_v48, 0.0  ;;  %v2186_v36 = vmax.f32 %v7130_v19, 0.0 }
 0x3ad   : > { %8931 = vst [vmem:[#allocation31_spill] sm:$0xff] %v7174_v30  ;;  %8932 = vst [vmem:[#allocation34_spill] sm:$0xff] %v7176_v27  ;;  %v2419_v43 = vrot.slane %v2181_v12, 7  ;;  %v2420_v1 = vrot.slane %v2182_v3, 7  ;;  %v2187_v28 = vmax.f32 %v7132_v21, 0.0  ;;  %v2188_v17 = vmax.f32 %v7134_v50, 0.0 }
 0x3ae   : > { %v2189_v6 = vmax.f32 %v7136_v32, 0.0  ;;  %v2190_v0 = vmax.f32 %v7138_v39, 0.0  ;;  %v2371_v49 = vrot.slane %v2181_v12, 1  ;;  %v2372_v57 = vrot.slane %v2179_v54, 1 }
 0x3af   : > { %v7224_v48 = vsel %vm458_vm0, %v2419_v43, %v2420_v1  ;;  %v2373_v2 = vrot.slane %v2183_v55, 1  ;;  %v2374_v19 = vrot.slane %v2185_v15, 1  ;;  %v7235_v16 = vrot.slane %v2187_v28, 1 }
 0x3b0   : > { %v7237_v52 = vrot.slane %v2189_v6, 1  ;;  %v2422_v21 = vrot.slane %v2179_v54, 7  ;;  %v2423_v50 = vrot.slane %v2180_v46, 7  ;;  %v2425_v14 = vrot.slane %v2183_v55, 7 }
 0x3b1   : > { %v8933_v32 = vmax.f32 %v7172_v63, 0.0  ;;  %v8935_v22 = vmax.f32 %v7174_v30, 0.0  ;;  %v2426_v11 = vrot.slane %v2184_v34, 7  ;;  %v2428_v12 = vrot.slane %v2185_v15, 7 }
 0x3b2   : > { %v2429_v60 = vrot.slane %v2186_v36, 7  ;;  %v2431_v9 = vrot.slane %v2187_v28, 7  ;;  %v2432_v45 = vrot.slane %v2188_v17, 7  ;;  %v7247_v56 = vrot.slane %v2189_v6, 7 }
 0x3b3   : > { %v7241_v39 = vrot.slane %v8933_v32, 7  ;;  %v7245_v20 = vrot.slane %v8935_v22, 7  ;;  %v2515_v55 = vrot.slane %v2182_v3, 5  ;;  %v7254_v37 = vrot.slane %v2190_v0, 7 }
 0x3b4   : > { %v8938_v32 = vmax.f32 %v7140_v53, 0.0  ;;  %v8939_v22 = vmax.f32 %v7142_v10, 0.0  ;;  %v2516_v28 = vrot.slane %v2180_v46, 5  ;;  %v2517_v30 = vrot.slane %v2184_v34, 5 }
 0x3b5   : > { %8934 = vst [vmem:[#allocation35_spill] sm:$0xff] %v7241_v39  ;;  %8936 = vst [vmem:[#allocation38_spill] sm:$0xff] %v7245_v20  ;;  %v7252_v54 = vsel %vm458_vm0, %v7241_v39, %v7245_v20  ;;  %v2518_v6 = vrot.slane %v2186_v36, 5  ;;  %v2519_v63 = vrot.slane %v2188_v17, 5  ;;  %v7265_v26 = vsel %vm458_vm0, %v2371_v49, %v2419_v43 }
 0x3b6   : > { %8937 = vst [vmem:[#allocation39_spill] sm:$0xff] %v7252_v54  ;;  %v7258_v27 = vrot.slane %v8938_v32, 7  ;;  %v7262_v15 = vrot.slane %v8939_v22, 7  ;;  %v7267_v20 = vrot.slane %v2190_v0, 5  ;;  %v2609_v3 = vrot.slane %v7265_v26, 1 }
 0x3b7   : > { %v2610_v54 = vrot.slane %v7224_v48, 1  ;;  %v2714_v32 = vrot.slane %v7265_v26, 2  ;;  %v2715_v39 = vrot.slane %v7224_v48, 2  ;;  %v2563_v22 = vsel %vm458_vm0, %v2420_v1, %v2515_v55 }
 0x3b8   : > { %v7275_v46 = vsel %vm458_vm0, %v2425_v14, %v2426_v11  ;;  %v7278_v17 = vsel %vm458_vm0, %v2373_v2, %v2425_v14  ;;  %v2717_v36 = vrot.slane %v2563_v22, 2  ;;  %v2612_v43 = vrot.slane %v2563_v22, 1 }
 0x3b9   : > { %v7281_v34 = vsel %vm649_vm1, %v2609_v3, %v2610_v54  ;;  %v2724_v0 = vrot.slane %v7278_v17, 2  ;;  %v7286_v49 = vsel %vm755_vm2, %v2714_v32, %v2715_v39  ;;  %v2725_v1 = vrot.slane %v7275_v46, 2 }
 0x3ba   : > { %8940 = vst [vmem:[#allocation42_spill] sm:$0xff] %v7281_v34  ;;  %2899 = vmatprep.mubr.f32.mxu1 %v7281_v34  ;;  %8941 = vst [vmem:[#allocation43_spill] sm:$0xff] %v7286_v49  ;;  %v7290_v55 = vsel %vm458_vm0, %v2426_v11, %v2517_v30  ;;  %v7293_v14 = vsel %vm458_vm0, %v2422_v21, %v2423_v50  ;;  %4535 = vmatprep.mubr.f32.mxu0 %v7286_v49 }
 0x3bb   : > { %2900 = vmatmul.mubr.f32.vlgmr.msra.gmra.mrb[32].mxu1 %v7265_v26  ;;  %v7298_v2 = vsel %vm755_vm2, %v2715_v39, %v2717_v36  ;;  %v7301_v3 = vsel %vm649_vm1, %v2610_v54, %v2612_v43  ;;  %v2727_v32 = vrot.slane %v7290_v55, 2  ;;  %v7305_v22 = vsel %vm458_vm0, %v2372_v57, %v2422_v21 }
 0x3bc   : > { %8942 = vst [vmem:[#allocation46_spill] sm:$0xff] %v7298_v2  ;;  %8943 = vst [vmem:[#allocation47_spill] sm:$0xff] %v7301_v3  ;;  %4536 = vmatmul.mubr.f32.vlgmr.msra.gmra.mrb[64].mxu0 %v7298_v2  ;;  %2904 = vmatprep.mubr.f32.mxu1 %v7301_v3  ;;  %v7310_v30 = vsel %vm755_vm2, %v2724_v0, %v2725_v1  ;;  %v2614_v11 = vrot.slane %v7305_v22, 1  ;;  %v2615_v39 = vrot.slane %v7293_v14, 1 }
 0x3bd   : > { %8944 = vst [vmem:[#allocation49_spill] sm:$0xff] %v7310_v30  ;;  %v7315_v36 = vsel %vm458_vm0, %v2428_v12, %v2429_v60  ;;  %v8946_v54 = vpack.c.bf16 %v7180_v25, %v7178_v18  ;;  %4538 = vmatprep.mubr.f32.mxu0 %v7310_v30  ;;  %v7322_v57 = vsel %vm755_vm2, %v2725_v1, %v2727_v32  ;;  %v8953_v1 = vmax.f32 %v7140_v53, 0.0 }
 0x3be   : > { %8945 = vst [vmem:[#allocation50_spill] sm:$0xff] %v7315_v36  ;;  %8947 = vst [vmem:[#allocation51_spill] sm:$0xff] %v7322_v57  ;;  %v7325_v21 = vsel %vm458_vm0, %v2374_v19, %v2428_v12  ;;  %v2730_v43 = vrot.slane %v7315_v36, 2  ;;  %v7329_v0 = vsel %vm458_vm0, %v2429_v60, %v2518_v6  ;;  %v7332_v2 = vsel %vm649_vm1, %v2614_v11, %v2615_v39 }
 0x3bf   : > { %4857 = vmatpush1.bf16.msra.mxu1 %v8946_v54  ;;  %8948 = vst [vmem:[#allocation13_spill] sm:$0xff] %v7325_v21  ;;  %8949 = vst [vmem:[#allocation12_spill] sm:$0xff] %v7332_v2  ;;  %v2729_v49 = vrot.slane %v7325_v21, 2  ;;  %v2732_v18 = vrot.slane %v7329_v0, 2  ;;  %v7338_v25 = vsel %vm458_vm0, %v2423_v50, %v2516_v28  ;;  %v7343_v12 = vsel %vm458_vm0, %v2431_v9, %v2432_v45 }
 0x3c0   : > { %4858 = vmatprep.subr.bf16.mxu1 %v8879_v58  ;;  %8950 = vst [vmem:[#allocation14_spill] sm:$0xff] %v7338_v25  ;;  %2905 = vmatmul.mubr.f32.gmra.mrb[34].mxu1 %v7224_v48  ;;  %v2617_v19 = vrot.slane %v7338_v25, 1  ;;  %8951 = vst [vmem:[#allocation15_spill] sm:$0xff] %v7343_v12  ;;  %v7347_v60 = vsel %vm458_vm0, %v7235_v16, %v2431_v9  ;;  %v7350_v6 = vsel %vm458_vm0, %v2432_v45, %v2519_v63 }
 0x3c1   : > { %8952 = vst [vmem:[#allocation18_spill] sm:$0xff] %v7347_v60  ;;  %v2377_v32 = vrot.slane %v8953_v1, 1  ;;  %4539 = vmatmul.mubr.f32.gmra.mrb[66].mxu0 %v7322_v57  ;;  %2909 = vmatprep.mubr.f32.mxu1 %v7332_v2  ;;  %v7357_v50 = vsel %vm755_vm2, %v2729_v49, %v2730_v43  ;;  %v2734_v28 = vrot.slane %v7347_v60, 2  ;;  %v2735_v11 = vrot.slane %v7343_v12, 2 }
 0x3c2   : > { %8954 = vst [vmem:[#allocation21_spill] sm:$0xff] %v7357_v50  ;;  %v8955_v9 = vmax.f32 %v7144_v24, 0.0  ;;  %v8956_v45 = vmax.f32 %v7146_v35, 0.0  ;;  %4541 = vmatprep.mubr.f32.mxu0 %v7357_v50  ;;  %v8957_v53 = vpack.c.bf16 %v7184_v47, %v7182_v8  ;;  %v7372_v49 = vsel %vm458_vm0, %v7247_v56, %v7254_v37 }
 0x3c3   : > { %8958 = vst [vmem:[#allocation29_spill] sm:$0xff] %v7372_v49  ;;  %v7377_v54 = vsel %vm458_vm0, %v7237_v52, %v7247_v56  ;;  %v8960_v1 = vmax.f32 %v7142_v10, 0.0  ;;  %v7385_v2 = vsel %vm649_vm1, %v2615_v39, %v2617_v19  ;;  %v2737_v8 = vrot.slane %v7350_v6, 2 }
 0x3c4   : > { %v2440_v16 = vrot.slane %v8955_v9, 7  ;;  %v2441_v63 = vrot.slane %v8956_v45, 7  ;;  %4860 = vmatpush1.bf16.msra.mxu1 %v8957_v53  ;;  %8959 = vst [vmem:[#allocation28_spill] sm:$0xff] %v7377_v54  ;;  %v7382_v45 = vsel %vm755_vm2, %v2730_v43, %v2732_v18  ;;  %8962 = vst [vmem:[#allocation32_spill] sm:$0xff] %v7385_v2  ;;  %v2739_v47 = vrot.slane %v7377_v54, 2 }
 0x3c5   : > { %v2521_v9 = vrot.slane %v8960_v1, 5  ;;  %8961 = vst [vmem:[#allocation33_spill] sm:$0xff] %v7382_v45  ;;  %4861 = vmatprep.subr.bf16.mxu1 %v8879_v58  ;;  %2910 = vmatmul.mubr.f32.gmra.mrb[36].mxu1 %v7305_v22  ;;  %v2740_v56 = vrot.slane %v7372_v49, 2  ;;  %v7395_v10 = vsel %vm458_vm0, %v7254_v37, %v7267_v20  ;;  %v7400_v52 = vsel %vm458_vm0, %v7258_v27, %v7262_v15 }
 0x3c6   : > { %v8963_v39 = vmax.f32 %v7144_v24, 0.0  ;;  %v8964_v18 = vmax.f32 %v7148_v62, 0.0  ;;  %v8965_v53 = vmax.f32 %v7150_v5, 0.0  ;;  %4542 = vmatmul.mubr.f32.gmra.mrb[68].mxu0 %v7382_v45  ;;  %2914 = vmatprep.mubr.f32.mxu1 %v7385_v2  ;;  %v7413_v37 = vsel %vm755_vm2, %v2734_v28, %v2735_v11 }
 0x3c7   : > { %8966 = vst [vmem:[#allocation37_spill] sm:$0xff] %v7413_v37  ;;  %4544 = vmatprep.mubr.f32.mxu0 %v7413_v37  ;;  %v8970_v20 = vmax.f32 %v7154_v7, 0.0  ;;  %v2742_v24 = vrot.slane %v7395_v10, 2  ;;  %v7436_v50 = vsel %vm458_vm0, %v2440_v16, %v2441_v63  ;;  %v8981_v37 = vmax.f32 %v7162_v38, 0.0 }
 0x3c8   : > { %v2378_v43 = vrot.slane %v8963_v39, 1  ;;  %v2443_v19 = vrot.slane %v8964_v18, 7  ;;  %v7408_v1 = vrot.slane %v8965_v53, 7  ;;  %v8967_v39 = vpack.c.bf16 %v7188_v41, %v7186_v23 }
 0x3c9   : > { %v7424_v18 = vsel %vm458_vm0, %v2377_v32, %v7258_v27  ;;  %v8969_v53 = vmax.f32 %v7152_v31, 0.0  ;;  %v7432_v2 = vrot.slane %v8970_v20, 7  ;;  %v8971_v23 = vmax.f32 %v7146_v35, 0.0  ;;  %2915 = vmatmul.mubr.f32.gmra.mrb[38].mxu1 %v7293_v14 }
 0x3ca   : > { %4863 = vmatpush1.bf16.msra.mxu1 %v8967_v39  ;;  %8968 = vst [vmem:[#allocation36_spill] sm:$0xff] %v7424_v18  ;;  %v7443_v27 = vsel %vm755_vm2, %v2735_v11, %v2737_v8  ;;  %v7446_v32 = vsel %vm755_vm2, %v2739_v47, %v2740_v56  ;;  %v7450_v20 = vsel %vm458_vm0, %v7262_v15, %v2521_v9  ;;  %v2744_v39 = vrot.slane %v7424_v18, 2  ;;  %v2253_v8 = vld [vmem:[#allocation7 + $0x150] sm:$0xff] }
 0x3cb   : > { %v7428_v28 = vrot.slane %v8969_v53, 7  ;;  %4864 = vmatprep.subr.bf16.mxu1 %v8879_v58  ;;  %v2522_v41 = vrot.slane %v8971_v23, 5  ;;  %8972 = vst [vmem:[#allocation41_spill] sm:$0xff] %v7443_v27  ;;  %8973 = vst [vmem:[#allocation40_spill] sm:$0xff] %v7446_v32  ;;  %4545 = vmatmul.mubr.f32.gmra.mrb[70].mxu0 %v7443_v27  ;;  %v2745_v35 = vrot.slane %v7400_v52, 2  ;;  %v7457_v53 = vsel %vm458_vm0, %v2378_v43, %v2440_v16 }
 0x3cc   : > { %2919 = vmatprep.mubr.f32.mxu1 %v7281_v34  ;;  %v7461_v11 = vsel %vm458_vm0, %v2443_v19, %v7408_v1  ;;  %v8974_v15 = vmax.f32 %v7148_v62, 0.0  ;;  %v8975_v47 = vmax.f32 %v7156_v40, 0.0  ;;  %v8976_v34 = vmax.f32 %v7158_v42, 0.0  ;;  %4547 = vmatprep.mubr.f32.mxu0 %v7446_v32 }
 0x3cd   : > { %v8977_v16 = vpack.c.bf16 %v7192_v61, %v7190_v29  ;;  %v7479_v43 = vsel %vm755_vm2, %v2740_v56, %v2742_v24  ;;  %v2747_v62 = vrot.slane %v7450_v20, 2  ;;  %2920 = vmatmul.mubr.f32.gmra.mrb[40].mxu1 %v7265_v26  ;;  %v2749_v32 = vrot.slane %v7457_v53, 2 }
 0x3ce   : > { %v2379_v9 = vrot.slane %v8974_v15, 1  ;;  %v7468_v23 = vrot.slane %v8975_v47, 7  ;;  %v7472_v27 = vrot.slane %v8976_v34, 7  ;;  %8978 = vst [vmem:[#allocation45_spill] sm:$0xff] %v7479_v43  ;;  %v2619_v15 = vrot.slane %v7278_v17, 1  ;;  %v2254_v34 = vld [vmem:[#allocation7 + $0x158] sm:$0xff]  ;;  %2924 = vmatprep.mubr.f32.mxu1 %v7301_v3 }
 0x3cf   : > { %4866 = vmatpush1.bf16.msra.mxu1 %v8977_v16  ;;  %v2620_v47 = vrot.slane %v7275_v46, 1  ;;  %v2750_v29 = vrot.slane %v7436_v50, 2  ;;  %v7489_v61 = vsel %vm458_vm0, %v2441_v63, %v2522_v41  ;;  %v7494_v56 = vsel %vm458_vm0, %v7428_v28, %v7432_v2  ;;  %4548 = vmatmul.mubr.f32.gmra.mrb[72].mxu0 %v7479_v43  ;;  %v2260_v43 = vld [vmem:[#allocation7 + $0x188] sm:$0xff] }
 0x3d0   : > { %4867 = vmatprep.subr.bf16.mxu1 %v8879_v58  ;;  %8979 = vst [vmem:[#allocation44_spill] sm:$0xff] %v7494_v56  ;;  %v8980_v24 = vmax.f32 %v7160_v59, 0.0  ;;  %v7502_v45 = vrot.slane %v8981_v37, 7  ;;  %v8982_v57 = vmax.f32 %v7150_v5, 0.0  ;;  %v7509_v63 = vsel %vm755_vm2, %v2744_v39, %v2745_v35 }
 0x3d1   : > { %8983 = vst [vmem:[#allocation48_spill] sm:$0xff] %v7509_v63  ;;  %v8984_v41 = vmax.f32 %v7152_v31, 0.0  ;;  %4550 = vmatprep.mubr.f32.mxu0 %v7509_v63  ;;  %v8985_v37 = vpack.c.bf16 %v7196_v4, %v7194_v44  ;;  %v7523_v5 = vsel %vm458_vm0, %v7468_v23, %v7472_v27  ;;  %v8987_v39 = vmax.f32 %v7164_v33, 0.0  ;;  %v2255_v44 = vld [vmem:[#allocation7 + $0x160] sm:$0xff]  ;;  %v2256_v4 = vld [vmem:[#allocation7 + $0x168] sm:$0xff]  ;;  %2925 = vmatmul.mubr.f32.gmra.mrb[42].mxu1 %v7224_v48 }
 0x3d2   : > { %v7498_v16 = vrot.slane %v8980_v24, 7  ;;  %v2523_v30 = vrot.slane %v8982_v57, 5  ;;  %v7515_v24 = vsel %vm458_vm0, %v2379_v9, %v2443_v19  ;;  %8986 = vst [vmem:[#allocation52_spill] sm:$0xff] %v7523_v5  ;;  %v4871_v57 = vpack.c.bf16 %v2254_v34, %v2253_v8 }
 0x3d3   : > { %v2380_v25 = vrot.slane %v8984_v41, 1  ;;  %4869 = vmatpush1.bf16.msra.mxu1 %v8985_v37  ;;  %v7527_v3 = vrot.slane %v8987_v39, 7  ;;  %v8988_v31 = vmax.f32 %v7166_v13, 0.0  ;;  %v2752_v19 = vrot.slane %v7489_v61, 2 }
 0x3d4   : > { %v2622_v9 = vrot.slane %v7290_v55, 1  ;;  %4870 = vmatprep.subr.bf16.mxu1 %v8879_v58  ;;  %v8989_v37 = vmax.f32 %v7154_v7, 0.0  ;;  %v7540_v8 = vsel %vm755_vm2, %v2745_v35, %v2747_v62  ;;  %v7543_v34 = vsel %vm649_vm1, %v2619_v15, %v2620_v47 }
 0x3d5   : > { %v7531_v41 = vrot.slane %v8988_v31, 7  ;;  %8990 = vst [vmem:[#allocation53_spill] sm:$0xff] %v7540_v8  ;;  %8991 = vst [vmem:[#allocation54_spill] sm:$0xff] %v7543_v34  ;;  %v7546_v39 = vsel %vm755_vm2, %v2749_v32, %v2750_v29  ;;  %4551 = vmatmul.mubr.f32.gmra.mrb[74].mxu0 %v7540_v8  ;;  %2929 = vmatprep.mubr.f32.mxu1 %v7543_v34  ;;  %v2754_v55 = vrot.slane %v7515_v24, 2  ;;  %v2755_v7 = vrot.slane %v7461_v11, 2 }
 0x3d6   : > { %v2524_v63 = vrot.slane %v8989_v37, 5  ;;  %8992 = vst [vmem:[#allocation55_spill] sm:$0xff] %v7546_v39  ;;  %v7554_v31 = vsel %vm458_vm0, %v7408_v1, %v2523_v30  ;;  %v7559_v35 = vsel %vm458_vm0, %v7498_v16, %v7502_v45  ;;  %v8994_v32 = vmax.f32 %v7156_v40, 0.0  ;;  %4553 = vmatprep.mubr.f32.mxu0 %v7546_v39  ;;  %v2257_v40 = vld [vmem:[#allocation7 + $0x170] sm:$0xff]  ;;  %2930 = vmatmul.mubr.f32.gmra.mrb[44].mxu1 %v7278_v17 }
 0x3d7   : > { %8993 = vst [vmem:[#allocation56_spill] sm:$0xff] %v7559_v35  ;;  %v7566_v15 = vsel %vm458_vm0, %v2380_v25, %v7428_v28  ;;  %4872 = vmatpush1.bf16.msra.mxu1 %v4871_v57  ;;  %v4874_v37 = vpack.c.bf16 %v2256_v4, %v2255_v44  ;;  %v7569_v34 = vsel %vm755_vm2, %v2750_v29, %v2752_v19  ;;  %v2757_v25 = vrot.slane %v7554_v31, 2 }
 0x3d8   : > { %v2381_v62 = vrot.slane %v8994_v32, 1  ;;  %8995 = vst [vmem:[#allocation57_spill] sm:$0xff] %v7566_v15  ;;  %8996 = vst [vmem:[#allocation58_spill] sm:$0xff] %v7569_v34  ;;  %v7572_v30 = vsel %vm649_vm1, %v2620_v47, %v2622_v9  ;;  %v7577_v1 = vsel %vm458_vm0, %v7527_v3, %v7531_v41  ;;  %4873 = vmatprep.subr.bf16.mxu1 %v8879_v58  ;;  %v2258_v32 = vld [vmem:[#allocation7 + $0x178] sm:$0xff]  ;;  %v2624_v28 = vrot.slane %v7325_v21, 1 }
 0x3d9   : > { %8997 = vst [vmem:[#allocation59_spill] sm:$0xff] %v7572_v30  ;;  %8998 = vst [vmem:[#allocation60_spill] sm:$0xff] %v7577_v1  ;;  %v2625_v29 = vrot.slane %v7315_v36, 1  ;;  %v7586_v47 = vsel %vm458_vm0, %v7432_v2, %v2524_v63  ;;  %v8999_v57 = vmax.f32 %v7158_v42, 0.0  ;;  %4554 = vmatmul.mubr.f32.gmra.mrb[76].mxu0 %v7569_v34  ;;  %2934 = vmatprep.mubr.f32.mxu1 %v7572_v30  ;;  %v2759_v44 = vrot.slane %v7566_v15, 2  ;;  %v2259_v34 = vld [vmem:[#allocation7 + $0x180] sm:$0xff] }
 0x3da   : > { %v7593_v9 = vsel %vm755_vm2, %v2754_v55, %v2755_v7  ;;  %v2760_v4 = vrot.slane %v7494_v56, 2  ;;  %v9000_v39 = vmax.f32 %v7160_v59, 0.0  ;;  %v7602_v42 = vsel %vm458_vm0, %v2381_v62, %v7468_v23  ;;  %2935 = vmatmul.mubr.f32.gmra.mrb[46].mxu1 %v7275_v46 }
 0x3db   : > { %v2525_v19 = vrot.slane %v8999_v57, 5  ;;  %4556 = vmatprep.mubr.f32.mxu0 %v7593_v9  ;;  %9001 = vst [vmem:[#allocation61_spill] sm:$0xff] %v7602_v42  ;;  %4875 = vmatpush1.bf16.msra.mxu1 %v4874_v37  ;;  %v4877_v2 = vpack.c.bf16 %v2258_v32, %v2257_v40  ;;  %v8778_v63 = vmax.f32 %v7168_v51, 0.0  ;;  %v9002_v57 = vld [vmem:[#allocation27_spill] sm:$0xff]  ;;  %v2762_v30 = vrot.slane %v7586_v47, 2 }
 0x3dc   : > { %v2382_v8 = vrot.slane %v9000_v39, 1  ;;  %v8777_v55 = vmax.f32 %v9002_v57, 0.0  ;;  %4876 = vmatprep.subr.bf16.mxu1 %v8879_v58  ;;  %v9003_v59 = vmax.f32 %v7162_v38, 0.0  ;;  %v7612_v23 = vsel %vm755_vm2, %v2755_v7, %v2757_v25 }
 0x3dd   : > { %v7615_v62 = vsel %vm649_vm1, %v2624_v28, %v2625_v29  ;;  %v2627_v37 = vrot.slane %v7329_v0, 1  ;;  %4557 = vmatmul.mubr.f32.gmra.mrb[78].mxu0 %v7612_v23  ;;  %v7621_v40 = vsel %vm755_vm2, %v2759_v44, %v2760_v4  ;;  %v2764_v38 = vrot.slane %v7602_v42, 2 }
 0x3de   : > { %v2526_v39 = vrot.slane %v9003_v59, 5  ;;  %9004 = vst [vmem:[#allocation27_spill] sm:$0xff] %v7615_v62  ;;  %2939 = vmatprep.mubr.f32.mxu1 %v7615_v62  ;;  %v2765_v32 = vrot.slane %v7523_v5, 2  ;;  %v7627_v7 = vsel %vm458_vm0, %v7472_v27, %v2525_v19  ;;  %v9005_v25 = vmax.f32 %v7164_v33, 0.0  ;;  %4559 = vmatprep.mubr.f32.mxu0 %v7621_v40 }
 0x3df   : > { %v7634_v0 = vsel %vm458_vm0, %v2382_v8, %v7498_v16  ;;  %4878 = vmatpush1.bf16.msra.mxu1 %v4877_v2  ;;  %v4880_v44 = vpack.c.bf16 %v2260_v43, %v2259_v34  ;;  %v7638_v59 = vrot.slane %v8778_v63, 7  ;;  %v7642_v62 = vrot.slane %v8777_v55, 7  ;;  %v2261_v16 = vld [vmem:[#allocation7 + $0x190] sm:$0xff]  ;;  %v2262_v8 = vld [vmem:[#allocation7 + $0x198] sm:$0xff]  ;;  %v2264_v63 = vld [vmem:[#allocation7 + $0x1a8] sm:$0xff] }
 0x3e0   : > { %v2383_v28 = vrot.slane %v9005_v25, 1  ;;  %9006 = vst [vmem:[#allocation62_spill] sm:$0xff] %v7634_v0  ;;  %v9007_v27 = vmax.f32 %v7166_v13, 0.0  ;;  %v7647_v19 = vsel %vm755_vm2, %v2760_v4, %v2762_v30  ;;  %4879 = vmatprep.subr.bf16.mxu1 %v8879_v58  ;;  %2940 = vmatmul.mubr.f32.gmra.mrb[48].mxu1 %v7325_v21  ;;  %v7652_v43 = vsel %vm649_vm1, %v2625_v29, %v2627_v37 }
 0x3e1   : > { %9008 = vst [vmem:[#allocation63_spill] sm:$0xff] %v7652_v43  ;;  %v2767_v34 = vrot.slane %v7627_v7, 2  ;;  %v2629_v2 = vrot.slane %v7347_v60, 1  ;;  %v2630_v25 = vrot.slane %v7343_v12, 1  ;;  %4560 = vmatmul.mubr.f32.gmra.mrb[80].mxu0 %v7647_v19  ;;  %2944 = vmatprep.mubr.f32.mxu1 %v7652_v43  ;;  %v7660_v13 = vsel %vm755_vm2, %v2764_v38, %v2765_v32  ;;  %v2263_v38 = vld [vmem:[#allocation7 + $0x1a0] sm:$0xff] }
 0x3e2   : > { %v2527_v33 = vrot.slane %v9007_v27, 5  ;;  %v2769_v30 = vrot.slane %v7634_v0, 2  ;;  %v2770_v4 = vrot.slane %v7559_v35, 2  ;;  %v7666_v29 = vsel %vm458_vm0, %v7502_v45, %v2526_v39  ;;  %4562 = vmatprep.mubr.f32.mxu0 %v7660_v13 }
 0x3e3   : > { %v7671_v37 = vsel %vm458_vm0, %v2383_v28, %v7527_v3  ;;  %4881 = vmatpush1.bf16.msra.mxu1 %v4880_v44  ;;  %v4883_v27 = vpack.c.bf16 %v2262_v8, %v2261_v16  ;;  %v2632_v55 = vrot.slane %v7350_v6, 1  ;;  %v7677_v43 = vsel %vm755_vm2, %v2765_v32, %v2767_v34  ;;  %v2265_v34 = vld [vmem:[#allocation7 + $0x1b0] sm:$0xff] }
 0x3e4   : > { %9009 = vst [vmem:[#allocation64_spill] sm:$0xff] %v7671_v37  ;;  %4882 = vmatprep.subr.bf16.mxu1 %v8879_v58  ;;  %2945 = vmatmul.mubr.f32.gmra.mrb[50].mxu1 %v7315_v36  ;;  %v7680_v45 = vsel %vm649_vm1, %v2629_v2, %v2630_v25  ;;  %v2772_v39 = vrot.slane %v7666_v29, 2  ;;  %v7686_v3 = vsel %vm458_vm0, %v7638_v59, %v7642_v62  ;;  %v2774_v32 = vrot.slane %v7671_v37, 2  ;;  %v2266_v2 = vld [vmem:[#allocation7 + $0x1b8] sm:$0xff] }
 0x3e5   : > { %9010 = vst [vmem:[#allocation65_spill] sm:$0xff] %v7680_v45  ;;  %9011 = vst [vmem:[#allocation66_spill] sm:$0xff] %v7686_v3  ;;  %4563 = vmatmul.mubr.f32.gmra.mrb[82].mxu0 %v7677_v43  ;;  %2949 = vmatprep.mubr.f32.mxu1 %v7680_v45  ;;  %v7691_v6 = vsel %vm755_vm2, %v2769_v30, %v2770_v4  ;;  %v2775_v28 = vrot.slane %v7577_v1, 2  ;;  %v7697_v44 = vsel %vm458_vm0, %v7531_v41, %v2527_v33 }
 0x3e6   : > { %4565 = vmatprep.mubr.f32.mxu0 %v7691_v6  ;;  %v4886_v16 = vpack.c.bf16 %v2264_v63, %v2263_v38  ;;  %v7701_v8 = vsel %vm649_vm1, %v2630_v25, %v2632_v55  ;;  %v7706_v30 = vsel %vm755_vm2, %v2770_v4, %v2772_v39  ;;  %v2777_v45 = vrot.slane %v7697_v44, 2  ;;  %v2267_v25 = vld [vmem:[#allocation7 + $0x1c0] sm:$0xff]  ;;  %v2268_v4 = vld [vmem:[#allocation7 + $0x1c8] sm:$0xff] }
 0x3e7   : > { %4884 = vmatpush1.bf16.msra.mxu1 %v4883_v27  ;;  %v2634_v41 = vrot.slane %v7377_v54, 1  ;;  %v2635_v33 = vrot.slane %v7372_v49, 1  ;;  %v7714_v63 = vsel %vm755_vm2, %v2774_v32, %v2775_v28  ;;  %v4889_v55 = vpack.c.bf16 %v2266_v2, %v2265_v34  ;;  %v2270_v34 = vld [vmem:[#allocation7 + $0x1d8] sm:$0xff] }
 0x3e8   : > { %4885 = vmatprep.subr.bf16.mxu1 %v8879_v58  ;;  %2950 = vmatmul.mubr.f32.gmra.mrb[52].mxu1 %v7347_v60  ;;  %v7720_v27 = vsel %vm755_vm2, %v2775_v28, %v2777_v45  ;;  %v2637_v39 = vrot.slane %v7395_v10, 1  ;;  %v4892_v32 = vpack.c.bf16 %v2268_v4, %v2267_v25  ;;  %v2639_v28 = vrot.slane %v7424_v18, 1 }
 0x3e9   : > { %4566 = vmatmul.mubr.f32.gmra.mrb[84].mxu0 %v7706_v30  ;;  %2954 = vmatprep.mubr.f32.mxu1 %v7701_v8  ;;  %v7723_v38 = vsel %vm649_vm1, %v2634_v41, %v2635_v33  ;;  %v2640_v2 = vrot.slane %v7400_v52, 1  ;;  %v2271_v41 = vld [vmem:[#allocation7 + $0x1e0] sm:$0xff] }
 0x3ea   : > { %4568 = vmatprep.mubr.f32.mxu0 %v7714_v63  ;;  %v7731_v45 = vsel %vm649_vm1, %v2635_v33, %v2637_v39  ;;  %v2642_v33 = vrot.slane %v7450_v20, 1  ;;  %v2273_v39 = vld [vmem:[#allocation7 + $0x1f0] sm:$0xff] }
 0x3eb   : > { %4887 = vmatpush1.bf16.msra.mxu1 %v4886_v16  ;;  %v2269_v16 = vld [vmem:[#allocation7 + $0x1d0] sm:$0xff]  ;;  %v7739_v25 = vsel %vm649_vm1, %v2639_v28, %v2640_v2  ;;  %v2645_v28 = vrot.slane %v7436_v50, 1 }
 0x3ec   : > { %4888 = vmatprep.subr.bf16.mxu1 %v8879_v58  ;;  %2955 = vmatmul.mubr.f32.gmra.mrb[54].mxu1 %v7343_v12  ;;  %v4895_v10 = vpack.c.bf16 %v2270_v34, %v2269_v16  ;;  %v7746_v16 = vsel %vm649_vm1, %v2640_v2, %v2642_v33  ;;  %v2644_v34 = vrot.slane %v7457_v53, 1  ;;  %v2650_v33 = vrot.slane %v7461_v11, 1 }
 0x3ed   : > { %4569 = vmatmul.mubr.f32.gmra.mrb[86].mxu0 %v7720_v27  ;;  %2959 = vmatprep.mubr.f32.mxu1 %v7723_v38 }
 0x3ef   : > { %4890 = vmatpush1.bf16.msra.mxu1 %v4889_v55  ;;  %v2272_v55 = vld [vmem:[#allocation7 + $0x1e8] sm:$0xff] }
 0x3f0   : > { %4891 = vmatprep.subr.bf16.mxu1 %v8879_v58  ;;  %2960 = vmatmul.mubr.f32.gmra.mrb[56].mxu1 %v7377_v54  ;;  %v4898_v4 = vpack.c.bf16 %v2272_v55, %v2271_v41  ;;  %v2647_v41 = vrot.slane %v7489_v61, 1  ;;  %v2649_v55 = vrot.slane %v7515_v24, 1 }
 0x3f1   : > { %2964 = vmatprep.mubr.f32.mxu1 %v7731_v45 }
 0x3f2   : > { %v7761_v2 = vsel %vm649_vm1, %v2645_v28, %v2647_v41  ;;  %v7768_v61 = vsel %vm649_vm1, %v2649_v55, %v2650_v33  ;;  %v2659_v41 = vrot.slane %v7602_v42, 1  ;;  %v2660_v55 = vrot.slane %v7523_v5, 1 }
 0x3f3   : > { %4893 = vmatpush1.bf16.msra.mxu1 %v4892_v32  ;;  %v2274_v32 = vld [vmem:[#allocation7 + $0x1f8] sm:$0xff] }
 0x3f4   : > { %4894 = vmatprep.subr.bf16.mxu1 %v8879_v58  ;;  %2965 = vmatmul.mubr.f32.gmra.mrb[58].mxu1 %v7372_v49  ;;  %v4901_v20 = vpack.c.bf16 %v2274_v32, %v2273_v39  ;;  %v2654_v32 = vrot.slane %v7566_v15, 1 }
 0x3f5   : > { %2969 = vmatprep.mubr.f32.mxu1 %v7739_v25 }
 0x3f7   : > { %4896 = vmatpush1.bf16.msra.mxu1 %v4895_v10  ;;  %v7754_v10 = vsel %vm649_vm1, %v2644_v34, %v2645_v28  ;;  %v2655_v34 = vrot.slane %v7494_v56, 1 }
 0x3f8   : > { %4897 = vmatprep.subr.bf16.mxu1 %v8879_v58  ;;  %2970 = vmatmul.mubr.f32.gmra.mrb[60].mxu1 %v7424_v18 }
 0x3f9   : > { %2974 = vmatprep.mubr.f32.mxu1 %v7746_v16  ;;  %v7781_v28 = vsel %vm649_vm1, %v2654_v32, %v2655_v34  ;;  %v2664_v32 = vrot.slane %v7634_v0, 1 }
 0x3fa   : > { %9013 = vst [vmem:[#allocation68_spill] sm:$0xff] %v7781_v28 }
 0x3fb   : > { %4899 = vmatpush1.bf16.msra.mxu1 %v4898_v4  ;;  %v2652_v4 = vrot.slane %v7554_v31, 1  ;;  %v2657_v31 = vrot.slane %v7586_v47, 1  ;;  %v2662_v47 = vrot.slane %v7627_v7, 1  ;;  %v2667_v7 = vrot.slane %v7666_v29, 1 }
 0x3fc   : > { %4900 = vmatprep.subr.bf16.mxu1 %v8879_v58  ;;  %2975 = vmatmul.mubr.f32.gmra.mrb[62].mxu1 %v7400_v52 }
 0x3fd   : > { %2979 = vmatprep.mubr.f32.mxu1 %v7754_v10  ;;  %v7774_v39 = vsel %vm649_vm1, %v2650_v33, %v2652_v4  ;;  %v7794_v33 = vsel %vm649_vm1, %v2659_v41, %v2660_v55  ;;  %v7800_v4 = vsel %vm649_vm1, %v2660_v55, %v2662_v47  ;;  %v2669_v55 = vrot.slane %v7671_v37, 1 }
 0x3fe   : > { %9012 = vst [vmem:[#allocation67_spill] sm:$0xff] %v7774_v39  ;;  %9015 = vst [vmem:[#allocation70_spill] sm:$0xff] %v7794_v33  ;;  %v2670_v47 = vrot.slane %v7577_v1, 1 }
 0x3ff   : > { %4902 = vmatpush1.bf16.msra.mxu1 %v4901_v20  ;;  %v7787_v20 = vsel %vm649_vm1, %v2655_v34, %v2657_v31  ;;  %9016 = vst [vmem:[#allocation71_spill] sm:$0xff] %v7800_v4  ;;  %v2665_v34 = vrot.slane %v7559_v35, 1 }
 0x400   : > { %4903 = vmatprep.subr.bf16.mxu1 %v8879_v58  ;;  %2980 = vmatmul.mubr.f32.gmra.mrb[64].mxu1 %v7457_v53  ;;  %9014 = vst [vmem:[#allocation69_spill] sm:$0xff] %v7787_v20  ;;  %v7822_v29 = vsel %vm649_vm1, %v2669_v55, %v2670_v47  ;;  %v2675_v55 = vrot.slane %v7686_v3, 1 }
 0x401   : > { %2984 = vmatprep.mubr.f32.mxu1 %v7761_v2  ;;  %v7807_v31 = vsel %vm649_vm1, %v2664_v32, %v2665_v34  ;;  %v7813_v41 = vsel %vm649_vm1, %v2665_v34, %v2667_v7  ;;  %9020 = vst [vmem:[#allocation74_spill] sm:$0xff] %v7822_v29  ;;  %v2672_v32 = vrot.slane %v7697_v44, 1 }
 0x402   : > { %9017 = vst [vmem:[#allocation72_spill] sm:$0xff] %v7807_v31  ;;  %9018 = vst [vmem:[#allocation73_spill] sm:$0xff] %v7813_v41 }
 0x404   : > { %2985 = vmatmul.mubr.f32.gmra.mrb[66].mxu1 %v7436_v50 }
 0x405   : > { %2989 = vmatprep.mubr.f32.mxu1 %v7768_v61 }
 0x408   : > { %2990 = vmatmul.mubr.f32.gmra.mrb[68].mxu1 %v7515_v24 }
 0x409   : > { %2994 = vmatprep.mubr.f32.mxu1 %v7774_v39  ;;  %v2282_v39 = vld [vmem:[#allocation7 + $0x238] sm:$0xff] }
 0x40c   : > { %2995 = vmatmul.mubr.f32.gmra.mrb[70].mxu1 %v7461_v11 }
 0x40d   : > { %2999 = vmatprep.mubr.f32.mxu1 %v7781_v28  ;;  %v9037_v28 = vld [vmem:[#allocation46_spill] sm:$0xff] }
 0x410   : > { %3000 = vmatmul.mubr.f32.gmra.mrb[72].mxu1 %v7566_v15 }
 0x411   : > { %3004 = vmatprep.mubr.f32.mxu1 %v7787_v20 }
 0x414   : > { %3005 = vmatmul.mubr.f32.gmra.mrb[74].mxu1 %v7494_v56 }
 0x415   : > { %3009 = vmatprep.mubr.f32.mxu1 %v7794_v33 }
 0x418   : > { %3010 = vmatmul.mubr.f32.gmra.mrb[76].mxu1 %v7602_v42 }
 0x419   : > { %3014 = vmatprep.mubr.f32.mxu1 %v7800_v4  ;;  %v9019_v4 = vmax.f32 %v7168_v51, 0.0  ;;  %v7834_v51 = vsel %vm649_vm1, %v2670_v47, %v2672_v32 }
 0x41a   : > { %9023 = vst [vmem:[#allocation76_spill] sm:$0xff] %v7834_v51 }
 0x41b   : > { %v2384_v33 = vrot.slane %v9019_v4, 1 }
 0x41c   : > { %3015 = vmatmul.mubr.f32.gmra.mrb[78].mxu1 %v7523_v5 }
 0x41d   : > { %3019 = vmatprep.mubr.f32.mxu1 %v7807_v31  ;;  %v9021_v31 = vmax.f32 %v9002_v57, 0.0  ;;  %v7830_v7 = vsel %vm458_vm0, %v2384_v33, %v7638_v59 }
 0x41e   : > { %9022 = vst [vmem:[#allocation75_spill] sm:$0xff] %v7830_v7  ;;  %v2674_v4 = vrot.slane %v7830_v7, 1 }
 0x41f   : > { %v2528_v34 = vrot.slane %v9021_v31, 5  ;;  %v9027_v31 = vld [vmem:[#allocation31_spill] sm:$0xff] }
 0x420   : > { %3020 = vmatmul.mubr.f32.gmra.mrb[80].mxu1 %v7634_v0  ;;  %v7847_v59 = vsel %vm649_vm1, %v2674_v4, %v2675_v55  ;;  %v9028_v47 = vmax.f32 %v9027_v31, 0.0  ;;  %v9032_v4 = vld [vmem:[#allocation39_spill] sm:$0xff] }
 0x421   : > { %3024 = vmatprep.mubr.f32.mxu1 %v7813_v41  ;;  %v9024_v41 = vld [vmem:[#allocation30_spill] sm:$0xff]  ;;  %v7843_v57 = vsel %vm458_vm0, %v7642_v62, %v2528_v34 }
 0x422   : > { %v9025_v44 = vmax.f32 %v9024_v41, 0.0  ;;  %9026 = vst [vmem:[#allocation30_spill] sm:$0xff] %v7847_v59  ;;  %v2677_v33 = vrot.slane %v7843_v57, 1  ;;  %v2529_v32 = vrot.slane %v9028_v47, 5  ;;  %v2276_v47 = vld [vmem:[#allocation7 + $0x208] sm:$0xff] }
 0x424   : > { %3025 = vmatmul.mubr.f32.gmra.mrb[82].mxu1 %v7559_v35  ;;  %v2385_v20 = vrot.slane %v9025_v44, 1  ;;  %v7859_v62 = vsel %vm649_vm1, %v2675_v55, %v2677_v33  ;;  %v2680_v44 = vrot.slane %v9032_v4, 1  ;;  %v2275_v33 = vld [vmem:[#allocation7 + $0x200] sm:$0xff] }
 0x425   : > { %3029 = vmatprep.mubr.f32.mxu1 %v7822_v29  ;;  %v9029_v29 = vld [vmem:[#allocation35_spill] sm:$0xff] }
 0x426   : > { %v7854_v41 = vsel %vm458_vm0, %v2385_v20, %v9029_v29  ;;  %9031 = vst [vmem:[#allocation35_spill] sm:$0xff] %v7859_v62 }
 0x427   : > { %9030 = vst [vmem:[#allocation31_spill] sm:$0xff] %v7854_v41  ;;  %v2679_v34 = vrot.slane %v7854_v41, 1 }
 0x428   : > { %3030 = vmatmul.mubr.f32.gmra.mrb[84].mxu1 %v7671_v37 }
 0x429   : > { %3034 = vmatprep.mubr.f32.mxu1 %v7834_v51  ;;  %v9033_v51 = vld [vmem:[#allocation38_spill] sm:$0xff]  ;;  %v7870_v20 = vsel %vm649_vm1, %v2679_v34, %v2680_v44  ;;  %v2278_v34 = vld [vmem:[#allocation7 + $0x218] sm:$0xff] }
 0x42a   : > { %v7866_v31 = vsel %vm458_vm0, %v9033_v51, %v2529_v32  ;;  %9034 = vst [vmem:[#allocation38_spill] sm:$0xff] %v7870_v20  ;;  %v4904_v51 = vpack.c.bf16 %v2276_v47, %v2275_v33  ;;  %v2277_v32 = vld [vmem:[#allocation7 + $0x210] sm:$0xff] }
 0x42b   : > { %v2682_v29 = vrot.slane %v7866_v31, 1  ;;  %v2281_v47 = vld [vmem:[#allocation7 + $0x230] sm:$0xff] }
 0x42c   : > { %3035 = vmatmul.mubr.f32.gmra.mrb[86].mxu1 %v7577_v1 }
 0x42d   : > { %3039 = vmatprep.mubr.f32.mxu1 %v7847_v59  ;;  %v7876_v55 = vsel %vm649_vm1, %v2680_v44, %v2682_v29  ;;  %v2279_v44 = vld [vmem:[#allocation7 + $0x220] sm:$0xff]  ;;  %v2280_v29 = vld [vmem:[#allocation7 + $0x228] sm:$0xff]  ;;  %v2720_v59 = vrot.slane %v7293_v14, 2 }
 0x42e   : > { %9035 = vst [vmem:[#allocation77_spill] sm:$0xff] %v7876_v55  ;;  %v4910_v33 = vpack.c.bf16 %v2280_v29, %v2279_v44  ;;  %v2285_v29 = vld [vmem:[#allocation7 + $0x250] sm:$0xff] }
 0x430   : > { %3040 = vmatmul.mubr.f32.gmra.mrb[88].mxu1 %v7830_v7 }
 0x431   : > { %3044 = vmatprep.mubr.f32.mxu1 %v7859_v62  ;;  %v9036_v62 = vld [vmem:[#allocation43_spill] sm:$0xff] }
 0x434   : > { %3045 = vmatmul.mubr.f32.gmra.mrb[90].mxu1 %v7686_v3 }
 0x435   : > { %3049 = vmatprep.mubr.f32.mxu1 %v7870_v20  ;;  %v4907_v20 = vpack.c.bf16 %v2278_v34, %v2277_v32  ;;  %v9038_v32 = vld [vmem:[#allocation14_spill] sm:$0xff] }
 0x436   : > { %v2722_v34 = vrot.slane %v9038_v32, 2  ;;  %v2286_v32 = vld [vmem:[#allocation7 + $0x258] sm:$0xff] }
 0x438   : > { %3050 = vmatmul.mubr.f32.gmra.mrb[92].mxu1 %v7854_v41  ;;  %v7897_v44 = vsel %vm755_vm2, %v2720_v59, %v2722_v34  ;;  %v2289_v34 = vld [vmem:[#allocation7 + $0x270] sm:$0xff] }
 0x439   : > { %3054 = vmatprep.mubr.f32.mxu1 %v7876_v55  ;;  %v2719_v55 = vrot.slane %v7305_v22, 2 }
 0x43c   : > { %3055 = vmatmul.mubr.f32.gmra.mrb[94].mxu1 %v9032_v4 }
 0x43d   : > { %3124 = vmatprep.mubr.f32.mxu1 %v7305_v22  ;;  %v2283_v22 = vld [vmem:[#allocation7 + $0x240] sm:$0xff] }
 0x440   : > { %3125 = vmatmul.mubr.f32.vlgmr.msra.gmra.mrb[32].mxu1 %v9036_v62 }
 0x441   : > { %3129 = vmatprep.mubr.f32.mxu1 %v7293_v14  ;;  %4905 = vmatpush1.bf16.msra.mxu1 %v4904_v51  ;;  %v7890_v51 = vsel %vm755_vm2, %v2719_v55, %v2720_v59  ;;  %v4913_v14 = vpack.c.bf16 %v2282_v39, %v2281_v47  ;;  %v4919_v39 = vpack.c.bf16 %v2286_v32, %v2285_v29  ;;  %v2287_v59 = vld [vmem:[#allocation7 + $0x260] sm:$0xff]  ;;  %v2292_v29 = vld [vmem:[#allocation7 + $0x288] sm:$0xff]  ;;  %v9040_v32 = vld [vmem:[#allocation51_spill] sm:$0xff] }
 0x442   : > { %4906 = vmatprep.subr.bf16.mxu1 %v8879_v58 }
 0x444   : > { %3130 = vmatmul.mubr.f32.gmra.mrb[34].mxu1 %v9037_v28 }
 0x445   : > { %3134 = vmatprep.mubr.f32.mxu1 %v7265_v26  ;;  %4908 = vmatpush1.bf16.msra.mxu1 %v4907_v20  ;;  %v2284_v20 = vld [vmem:[#allocation7 + $0x248] sm:$0xff] }
 0x446   : > { %4909 = vmatprep.subr.bf16.mxu1 %v8879_v58  ;;  %v4916_v55 = vpack.c.bf16 %v2284_v20, %v2283_v22  ;;  %v9039_v22 = vld [vmem:[#allocation49_spill] sm:$0xff] }
 0x448   : > { %3135 = vmatmul.mubr.f32.gmra.mrb[36].mxu1 %v7890_v51 }
 0x449   : > { %3139 = vmatprep.mubr.f32.mxu1 %v7224_v48  ;;  %4911 = vmatpush1.bf16.msra.mxu1 %v4910_v33  ;;  %v2288_v33 = vld [vmem:[#allocation7 + $0x268] sm:$0xff] }
 0x44a   : > { %4912 = vmatprep.subr.bf16.mxu1 %v8879_v58  ;;  %v4922_v47 = vpack.c.bf16 %v2288_v33, %v2287_v59  ;;  %v2293_v59 = vld [vmem:[#allocation7 + $0x290] sm:$0xff]  ;;  %v2294_v33 = vld [vmem:[#allocation7 + $0x298] sm:$0xff] }
 0x44c   : > { %3140 = vmatmul.mubr.f32.gmra.mrb[38].mxu1 %v7897_v44 }
 0x44d   : > { %3144 = vmatprep.mubr.f32.mxu1 %v7278_v17  ;;  %4914 = vmatpush1.bf16.msra.mxu1 %v4913_v14  ;;  %v2290_v14 = vld [vmem:[#allocation7 + $0x278] sm:$0xff] }
 0x44e   : > { %4915 = vmatprep.subr.bf16.mxu1 %v8879_v58  ;;  %v4925_v20 = vpack.c.bf16 %v2290_v14, %v2289_v34  ;;  %v2295_v34 = vld [vmem:[#allocation7 + $0x2a0] sm:$0xff]  ;;  %v2296_v14 = vld [vmem:[#allocation7 + $0x2a8] sm:$0xff] }
 0x450   : > { %3145 = vmatmul.mubr.f32.gmra.mrb[40].mxu1 %v9036_v62 }
 0x451   : > { %3149 = vmatprep.mubr.f32.mxu1 %v7275_v46  ;;  %4917 = vmatpush1.bf16.msra.mxu1 %v4916_v55  ;;  %v2291_v55 = vld [vmem:[#allocation7 + $0x280] sm:$0xff] }
 0x452   : > { %4918 = vmatprep.subr.bf16.mxu1 %v8879_v58 }
 0x454   : > { %3150 = vmatmul.mubr.f32.gmra.mrb[42].mxu1 %v9037_v28 }
 0x455   : > { %3154 = vmatprep.mubr.f32.mxu1 %v7325_v21  ;;  %4920 = vmatpush1.bf16.msra.mxu1 %v4919_v39  ;;  %v4928_v39 = vpack.c.bf16 %v2292_v29, %v2291_v55  ;;  %v9041_v21 = vld [vmem:[#allocation21_spill] sm:$0xff]  ;;  %v2297_v55 = vld [vmem:[#allocation7 + $0x2b0] sm:$0xff]  ;;  %v2298_v29 = vld [vmem:[#allocation7 + $0x2b8] sm:$0xff] }
 0x456   : > { %4921 = vmatprep.subr.bf16.mxu1 %v8879_v58 }
 0x458   : > { %3155 = vmatmul.mubr.f32.gmra.mrb[44].mxu1 %v9039_v22 }
 0x459   : > { %3159 = vmatprep.mubr.f32.mxu1 %v7315_v36  ;;  %4923 = vmatpush1.bf16.msra.mxu1 %v4922_v47  ;;  %v4931_v47 = vpack.c.bf16 %v2294_v33, %v2293_v59  ;;  %v9042_v36 = vld [vmem:[#allocation33_spill] sm:$0xff]  ;;  %v2299_v59 = vld [vmem:[#allocation7 + $0x2c0] sm:$0xff] }
 0x45a   : > { %4924 = vmatprep.subr.bf16.mxu1 %v8879_v58  ;;  %v2300_v33 = vld [vmem:[#allocation7 + $0x2c8] sm:$0xff] }
 0x45c   : > { %3160 = vmatmul.mubr.f32.gmra.mrb[46].mxu1 %v9040_v32 }
 0x45d   : > { %3164 = vmatprep.mubr.f32.mxu1 %v7347_v60  ;;  %4926 = vmatpush1.bf16.msra.mxu1 %v4925_v20  ;;  %v4934_v20 = vpack.c.bf16 %v2296_v14, %v2295_v34  ;;  %v9043_v60 = vld [vmem:[#allocation37_spill] sm:$0xff]  ;;  %v2301_v34 = vld [vmem:[#allocation7 + $0x2d0] sm:$0xff]  ;;  %v2302_v14 = vld [vmem:[#allocation7 + $0x2d8] sm:$0xff] }
 0x45e   : > { %4927 = vmatprep.subr.bf16.mxu1 %v8879_v58 }
 0x460   : > { %3165 = vmatmul.mubr.f32.gmra.mrb[48].mxu1 %v9041_v21 }
 0x461   : > { %3169 = vmatprep.mubr.f32.mxu1 %v7343_v12  ;;  %4929 = vmatpush1.bf16.msra.mxu1 %v4928_v39  ;;  %v4937_v39 = vpack.c.bf16 %v2298_v29, %v2297_v55  ;;  %v9044_v12 = vld [vmem:[#allocation41_spill] sm:$0xff]  ;;  %v2303_v55 = vld [vmem:[#allocation7 + $0x2e0] sm:$0xff] }
 0x462   : > { %4930 = vmatprep.subr.bf16.mxu1 %v8879_v58  ;;  %v2304_v29 = vld [vmem:[#allocation7 + $0x2e8] sm:$0xff] }
 0x464   : > { %3170 = vmatmul.mubr.f32.gmra.mrb[50].mxu1 %v9042_v36 }
 0x465   : > { %3174 = vmatprep.mubr.f32.mxu1 %v7377_v54  ;;  %4932 = vmatpush1.bf16.msra.mxu1 %v4931_v47  ;;  %v4940_v47 = vpack.c.bf16 %v2300_v33, %v2299_v59  ;;  %v9045_v54 = vld [vmem:[#allocation40_spill] sm:$0xff]  ;;  %v2305_v59 = vld [vmem:[#allocation7 + $0x2f0] sm:$0xff]  ;;  %v2306_v33 = vld [vmem:[#allocation7 + $0x2f8] sm:$0xff] }
 0x466   : > { %4933 = vmatprep.subr.bf16.mxu1 %v8879_v58 }
 0x468   : > { %3175 = vmatmul.mubr.f32.gmra.mrb[52].mxu1 %v9043_v60 }
 0x469   : > { %3179 = vmatprep.mubr.f32.mxu1 %v7372_v49  ;;  %4935 = vmatpush1.bf16.msra.mxu1 %v4934_v20  ;;  %v4943_v20 = vpack.c.bf16 %v2302_v14, %v2301_v34  ;;  %v9046_v49 = vld [vmem:[#allocation45_spill] sm:$0xff]  ;;  %v9049_v14 = vld [vmem:[#allocation55_spill] sm:$0xff] }
 0x46a   : > { %4936 = vmatprep.subr.bf16.mxu1 %v8879_v58  ;;  %v9048_v34 = vld [vmem:[#allocation53_spill] sm:$0xff] }
 0x46c   : > { %3180 = vmatmul.mubr.f32.gmra.mrb[54].mxu1 %v9044_v12 }
 0x46d   : > { %3184 = vmatprep.mubr.f32.mxu1 %v7424_v18  ;;  %4938 = vmatpush1.bf16.msra.mxu1 %v4937_v39  ;;  %v4946_v39 = vpack.c.bf16 %v2304_v29, %v2303_v55  ;;  %v9047_v18 = vld [vmem:[#allocation48_spill] sm:$0xff] }
 0x46e   : > { %4939 = vmatprep.subr.bf16.mxu1 %v8879_v58 }
 0x470   : > { %3185 = vmatmul.mubr.f32.gmra.mrb[56].mxu1 %v9045_v54 }
 0x471   : > { %3189 = vmatprep.mubr.f32.mxu1 %v7400_v52  ;;  %4941 = vmatpush1.bf16.msra.mxu1 %v4940_v47  ;;  %v4949_v47 = vpack.c.bf16 %v2306_v33, %v2305_v59 }
 0x472   : > { %4942 = vmatprep.subr.bf16.mxu1 %v8879_v58 }
 0x474   : > { %3190 = vmatmul.mubr.f32.gmra.mrb[58].mxu1 %v9046_v49 }
 0x475   : > { %3194 = vmatprep.mubr.f32.mxu1 %v7457_v53  ;;  %4944 = vmatpush1.bf16.msra.mxu1 %v4943_v20  ;;  %v9050_v20 = vld [vmem:[#allocation58_spill] sm:$0xff] }
 0x476   : > { %4945 = vmatprep.subr.bf16.mxu1 %v8879_v58 }
 0x478   : > { %3195 = vmatmul.mubr.f32.gmra.mrb[60].mxu1 %v9047_v18 }
 0x479   : > { %3199 = vmatprep.mubr.f32.mxu1 %v7436_v50  ;;  %4947 = vmatpush1.bf16.msra.mxu1 %v4946_v39 }
 0x47a   : > { %4948 = vmatprep.subr.bf16.mxu1 %v8879_v58 }
 0x47c   : > { %3200 = vmatmul.mubr.f32.gmra.mrb[62].mxu1 %v9048_v34 }
 0x47d   : > { %3204 = vmatprep.mubr.f32.mxu1 %v7515_v24  ;;  %4950 = vmatpush1.bf16.msra.mxu1 %v4949_v47 }
 0x47e   : > { %4951 = vmatprep.subr.bf16.mxu1 %v8879_v58 }
 0x480   : > { %3205 = vmatmul.mubr.f32.gmra.mrb[64].mxu1 %v9049_v14 }
 0x481   : > { %3209 = vmatprep.mubr.f32.mxu1 %v7461_v11 }
 0x484   : > { %3210 = vmatmul.mubr.f32.gmra.mrb[66].mxu1 %v9050_v20 }
 0x485   : > { %3214 = vmatprep.mubr.f32.mxu1 %v7566_v15 }
 0x488   : > { %3215 = vmatmul.mubr.f32.gmra.mrb[68].mxu1 %v7593_v9 }
 0x489   : > { %3219 = vmatprep.mubr.f32.mxu1 %v7494_v56 }
 0x48c   : > { %3220 = vmatmul.mubr.f32.gmra.mrb[70].mxu1 %v7612_v23 }
 0x48d   : > { %3224 = vmatprep.mubr.f32.mxu1 %v7602_v42  ;;  %v2310_v42 = vld [vmem:[#allocation7 + $0x318] sm:$0xff] }
 0x48f   : > { %v7948_v55 = vpop.f32.mrb[64].mxu0 }
 0x490   : > { %3225 = vmatmul.mubr.f32.gmra.mrb[72].mxu1 %v7621_v40  ;;  %9051 = vst [vmem:[#allocation43_spill] sm:$0xff] %v7948_v55  ;;  %v7951_v29 = vpop.f32.mrb[65].mxu0 }
 0x491   : > { %3229 = vmatprep.mubr.f32.mxu1 %v7523_v5  ;;  %9052 = vst [vmem:[#allocation46_spill] sm:$0xff] %v7951_v29  ;;  %v2785_v5 = vrot.slane %v9032_v4, 2 }
 0x494   : > { %3230 = vmatmul.mubr.f32.gmra.mrb[74].mxu1 %v7647_v19  ;;  %v7954_v39 = vpop.f32.mrb[66].mxu0 }
 0x495   : > { %3234 = vmatprep.mubr.f32.mxu1 %v7634_v0  ;;  %9053 = vst [vmem:[#allocation14_spill] sm:$0xff] %v7954_v39  ;;  %v7957_v59 = vpop.f32.mrb[67].mxu0 }
 0x496   : > { %9054 = vst [vmem:[#allocation49_spill] sm:$0xff] %v7957_v59 }
 0x498   : > { %3235 = vmatmul.mubr.f32.gmra.mrb[76].mxu1 %v7660_v13 }
 0x499   : > { %3239 = vmatprep.mubr.f32.mxu1 %v7559_v35  ;;  %v7960_v33 = vpop.f32.mrb[68].mxu0  ;;  %v9066_v35 = vld [vmem:[#allocation26_spill] sm:$0xff] }
 0x49a   : > { %9055 = vst [vmem:[#allocation51_spill] sm:$0xff] %v7960_v33  ;;  %v7963_v47 = vpop.f32.mrb[69].mxu0 }
 0x49b   : > { %9056 = vst [vmem:[#allocation21_spill] sm:$0xff] %v7963_v47 }
 0x49c   : > { %3240 = vmatmul.mubr.f32.gmra.mrb[78].mxu1 %v7677_v43 }
 0x49d   : > { %3244 = vmatprep.mubr.f32.mxu1 %v7671_v37 }
 0x49e   : > { %v7966_v55 = vpop.f32.mrb[70].mxu0 }
 0x49f   : > { %9057 = vst [vmem:[#allocation33_spill] sm:$0xff] %v7966_v55  ;;  %v7969_v29 = vpop.f32.mrb[71].mxu0  ;;  %v2779_v55 = vrot.slane %v7830_v7, 2 }
 0x4a0   : > { %3245 = vmatmul.mubr.f32.gmra.mrb[80].mxu1 %v7691_v6  ;;  %9058 = vst [vmem:[#allocation37_spill] sm:$0xff] %v7969_v29  ;;  %v2780_v29 = vrot.slane %v7686_v3, 2 }
 0x4a1   : > { %3249 = vmatprep.mubr.f32.mxu1 %v7577_v1  ;;  %v9063_v1 = vld [vmem:[#allocation34_spill] sm:$0xff] }
 0x4a2   : > { %v7972_v39 = vpop.f32.mrb[72].mxu0 }
 0x4a3   : > { %9059 = vst [vmem:[#allocation41_spill] sm:$0xff] %v7972_v39  ;;  %v7975_v59 = vpop.f32.mrb[73].mxu0  ;;  %v2209_v39 = vmax.f32 %v9063_v1, 0.0 }
 0x4a4   : > { %3250 = vmatmul.mubr.f32.gmra.mrb[82].mxu1 %v7706_v30  ;;  %9060 = vst [vmem:[#allocation40_spill] sm:$0xff] %v7975_v59 }
 0x4a5   : > { %3254 = vmatprep.mubr.f32.mxu1 %v7830_v7  ;;  %v2386_v1 = vrot.slane %v2209_v39, 1 }
 0x4a8   : > { %v7978_v33 = vpop.f32.mrb[74].mxu0  ;;  %3255 = vmatmul.mubr.f32.gmra.mrb[84].mxu1 %v7714_v63 }
 0x4a9   : > { %9061 = vst [vmem:[#allocation45_spill] sm:$0xff] %v7978_v33  ;;  %v7981_v47 = vpop.f32.mrb[75].mxu0  ;;  %3259 = vmatprep.mubr.f32.mxu1 %v7686_v3  ;;  %v7994_v33 = vsel %vm755_vm2, %v2779_v55, %v2780_v29  ;;  %v2464_v3 = vrot.slane %v2209_v39, 7  ;;  %v2784_v55 = vrot.slane %v7854_v41, 2  ;;  %v9070_v39 = vmax.f32 %v9066_v35, 0.0 }
 0x4aa   : > { %9062 = vst [vmem:[#allocation48_spill] sm:$0xff] %v7981_v47  ;;  %v2782_v47 = vrot.slane %v7843_v57, 2 }
 0x4ab   : > { %v8013_v0 = vsel %vm458_vm0, %v2386_v1, %v2464_v3 }
 0x4ac   : > { %v7987_v37 = vpop.f32.mrb[76].mxu0  ;;  %3260 = vmatmul.mubr.f32.gmra.mrb[86].mxu1 %v7720_v27 }
 0x4ad   : > { %9064 = vst [vmem:[#allocation53_spill] sm:$0xff] %v7987_v37  ;;  %v7990_v59 = vpop.f32.mrb[77].mxu0  ;;  %3264 = vmatprep.mubr.f32.mxu1 %v7854_v41 }
 0x4ae   : > { %9065 = vst [vmem:[#allocation55_spill] sm:$0xff] %v7990_v59  ;;  %v8005_v59 = vsel %vm755_vm2, %v2780_v29, %v2782_v47  ;;  %v8023_v29 = vsel %vm755_vm2, %v2784_v55, %v2785_v5  ;;  %v2787_v47 = vrot.slane %v7866_v31, 2 }
 0x4b0   : > { %v7998_v7 = vpop.f32.mrb[78].mxu0  ;;  %3265 = vmatmul.mubr.f32.gmra.mrb[88].mxu1 %v7994_v33  ;;  %v8037_v41 = vsel %vm755_vm2, %v2785_v5, %v2787_v47  ;;  %v2311_v47 = vld [vmem:[#allocation7 + $0x320] sm:$0xff] }
 0x4b1   : > { %9067 = vst [vmem:[#allocation58_spill] sm:$0xff] %v7998_v7  ;;  %v8001_v37 = vpop.f32.mrb[79].mxu0  ;;  %3269 = vmatprep.mubr.f32.mxu1 %v9032_v4  ;;  %v8017_v7 = vrot.slane %v9070_v39, 7  ;;  %v2307_v39 = vld [vmem:[#allocation7 + $0x300] sm:$0xff] }
 0x4b2   : > { %9068 = vst [vmem:[#allocation34_spill] sm:$0xff] %v8001_v37 }
 0x4b3   : > { %v8031_v1 = vsel %vm458_vm0, %v2464_v3, %v8017_v7  ;;  %v2309_v3 = vld [vmem:[#allocation7 + $0x310] sm:$0xff] }
 0x4b4   : > { %v8009_v57 = vpop.f32.mrb[80].mxu0  ;;  %3270 = vmatmul.mubr.f32.gmra.mrb[90].mxu1 %v8005_v59  ;;  %v4955_v5 = vpack.c.bf16 %v2310_v42, %v2309_v3  ;;  %v9079_v3 = vld [vmem:[#allocation47_spill] sm:$0xff] }
 0x4b5   : > { %9069 = vst [vmem:[#allocation26_spill] sm:$0xff] %v8009_v57  ;;  %v8019_v37 = vpop.f32.mrb[81].mxu0  ;;  %3274 = vmatprep.mubr.f32.mxu1 %v8013_v0 }
 0x4b6   : > { %9071 = vst [vmem:[#allocation78_spill] sm:$0xff] %v8019_v37  ;;  %v2308_v37 = vld [vmem:[#allocation7 + $0x308] sm:$0xff] }
 0x4b8   : > { %v8026_v4 = vpop.f32.mrb[82].mxu0  ;;  %3275 = vmatmul.mubr.f32.gmra.mrb[92].mxu1 %v8023_v29 }
 0x4b9   : > { %9072 = vst [vmem:[#allocation79_spill] sm:$0xff] %v8026_v4  ;;  %v8033_v57 = vpop.f32.mrb[83].mxu0  ;;  %3279 = vmatprep.mubr.f32.mxu1 %v8031_v1  ;;  %v4952_v4 = vpack.c.bf16 %v2308_v37, %v2307_v39  ;;  %v9078_v39 = vld [vmem:[#allocation42_spill] sm:$0xff] }
 0x4ba   : > { %9073 = vst [vmem:[#allocation80_spill] sm:$0xff] %v8033_v57  ;;  %v9076_v57 = vld [vmem:[#allocation12_spill] sm:$0xff] }
 0x4bc   : > { %v8039_v55 = vpop.f32.mrb[84].mxu0  ;;  %3280 = vmatmul.mubr.f32.gmra.mrb[94].mxu1 %v8037_v41 }
 0x4bd   : > { %9074 = vst [vmem:[#allocation81_spill] sm:$0xff] %v8039_v55  ;;  %v8042_v31 = vpop.f32.mrb[85].mxu0  ;;  %3349 = vmatprep.mubr.f32.mxu1 %v7890_v51  ;;  %v2312_v55 = vld [vmem:[#allocation7 + $0x328] sm:$0xff]  ;;  %v2313_v51 = vld [vmem:[#allocation7 + $0x330] sm:$0xff] }
 0x4be   : > { %9075 = vst [vmem:[#allocation82_spill] sm:$0xff] %v8042_v31  ;;  %v9077_v31 = vld [vmem:[#allocation32_spill] sm:$0xff]  ;;  %v4958_v37 = vpack.c.bf16 %v2312_v55, %v2311_v47  ;;  %v2317_v55 = vld [vmem:[#allocation7 + $0x350] sm:$0xff] }
 0x4bf   : > { %v2319_v47 = vld [vmem:[#allocation7 + $0x360] sm:$0xff] }
 0x4c0   : > { %v8045_v56 = vpop.f32.mrb[86].mxu0  ;;  %3350 = vmatmul.mubr.f32.vlgmr.msra.gmra.mrb[32].mxu1 %v9076_v57  ;;  %v2314_v57 = vld [vmem:[#allocation7 + $0x338] sm:$0xff] }
 0x4c1   : > { %v8048_v15 = vpop.f32.mrb[87].mxu0  ;;  %3354 = vmatprep.mubr.f32.mxu1 %v7897_v44  ;;  %4953 = vmatpush1.bf16.msra.mxu1 %v4952_v4  ;;  %v4961_v42 = vpack.c.bf16 %v2314_v57, %v2313_v51  ;;  %v2315_v4 = vld [vmem:[#allocation7 + $0x340] sm:$0xff]  ;;  %v2316_v44 = vld [vmem:[#allocation7 + $0x348] sm:$0xff]  ;;  %v9081_v51 = vld [vmem:[#allocation59_spill] sm:$0xff] }
 0x4c2   : > { %4954 = vmatprep.subr.bf16.mxu1 %v8879_v58  ;;  %v2321_v57 = vld [vmem:[#allocation7 + $0x370] sm:$0xff] }
 0x4c4   : > { %3355 = vmatmul.mubr.f32.gmra.mrb[34].mxu1 %v9077_v31  ;;  %v2318_v31 = vld [vmem:[#allocation7 + $0x358] sm:$0xff] }
 0x4c5   : > { %3359 = vmatprep.mubr.f32.mxu1 %v9036_v62  ;;  %4956 = vmatpush1.bf16.msra.mxu1 %v4955_v5  ;;  %v4964_v62 = vpack.c.bf16 %v2316_v44, %v2315_v4  ;;  %v9080_v5 = vld [vmem:[#allocation54_spill] sm:$0xff]  ;;  %v9082_v4 = vld [vmem:[#allocation27_spill] sm:$0xff]  ;;  %v2323_v44 = vld [vmem:[#allocation7 + $0x380] sm:$0xff] }
 0x4c6   : > { %4957 = vmatprep.subr.bf16.mxu1 %v8879_v58 }
 0x4c8   : > { %3360 = vmatmul.mubr.f32.gmra.mrb[36].mxu1 %v9078_v39 }
 0x4c9   : > { %3364 = vmatprep.mubr.f32.mxu1 %v9037_v28  ;;  %4959 = vmatpush1.bf16.msra.mxu1 %v4958_v37  ;;  %v4967_v28 = vpack.c.bf16 %v2318_v31, %v2317_v55  ;;  %v2320_v37 = vld [vmem:[#allocation7 + $0x368] sm:$0xff]  ;;  %v9083_v55 = vld [vmem:[#allocation63_spill] sm:$0xff]  ;;  %v2325_v31 = vld [vmem:[#allocation7 + $0x390] sm:$0xff] }
 0x4ca   : > { %4960 = vmatprep.subr.bf16.mxu1 %v8879_v58 }
 0x4cc   : > { %3365 = vmatmul.mubr.f32.gmra.mrb[38].mxu1 %v9079_v3 }
 0x4cd   : > { %3369 = vmatprep.mubr.f32.mxu1 %v9039_v22  ;;  %4962 = vmatpush1.bf16.msra.mxu1 %v4961_v42  ;;  %v4970_v22 = vpack.c.bf16 %v2320_v37, %v2319_v47  ;;  %v2322_v42 = vld [vmem:[#allocation7 + $0x378] sm:$0xff]  ;;  %v9084_v47 = vld [vmem:[#allocation65_spill] sm:$0xff]  ;;  %v2327_v37 = vld [vmem:[#allocation7 + $0x3a0] sm:$0xff] }
 0x4ce   : > { %4963 = vmatprep.subr.bf16.mxu1 %v8879_v58 }
 0x4d0   : > { %3370 = vmatmul.mubr.f32.gmra.mrb[40].mxu1 %v9080_v5 }
 0x4d1   : > { %3374 = vmatprep.mubr.f32.mxu1 %v9040_v32  ;;  %4965 = vmatpush1.bf16.msra.mxu1 %v4964_v62  ;;  %v4973_v32 = vpack.c.bf16 %v2322_v42, %v2321_v57  ;;  %v2324_v62 = vld [vmem:[#allocation7 + $0x388] sm:$0xff]  ;;  %v2329_v57 = vld [vmem:[#allocation7 + $0x3b0] sm:$0xff]  ;;  %v2330_v42 = vld [vmem:[#allocation7 + $0x3b8] sm:$0xff] }
 0x4d2   : > { %4966 = vmatprep.subr.bf16.mxu1 %v8879_v58 }
 0x4d4   : > { %3375 = vmatmul.mubr.f32.gmra.mrb[42].mxu1 %v9081_v51 }
 0x4d5   : > { %3379 = vmatprep.mubr.f32.mxu1 %v9041_v21  ;;  %4968 = vmatpush1.bf16.msra.mxu1 %v4967_v28  ;;  %v4976_v21 = vpack.c.bf16 %v2324_v62, %v2323_v44  ;;  %v2326_v28 = vld [vmem:[#allocation7 + $0x398] sm:$0xff]  ;;  %v2332_v44 = vld [vmem:[#allocation7 + $0x3c8] sm:$0xff]  ;;  %v2333_v62 = vld [vmem:[#allocation7 + $0x3d0] sm:$0xff] }
 0x4d6   : > { %4969 = vmatprep.subr.bf16.mxu1 %v8879_v58 }
 0x4d8   : > { %3380 = vmatmul.mubr.f32.gmra.mrb[44].mxu1 %v9082_v4 }
 0x4d9   : > { %3384 = vmatprep.mubr.f32.mxu1 %v9042_v36  ;;  %4971 = vmatpush1.bf16.msra.mxu1 %v4970_v22  ;;  %v4979_v36 = vpack.c.bf16 %v2326_v28, %v2325_v31  ;;  %v2328_v22 = vld [vmem:[#allocation7 + $0x3a8] sm:$0xff]  ;;  %v2335_v31 = vld [vmem:[#allocation7 + $0x3e0] sm:$0xff] }
 0x4da   : > { %4972 = vmatprep.subr.bf16.mxu1 %v8879_v58  ;;  %v2336_v28 = vld [vmem:[#allocation7 + $0x3e8] sm:$0xff] }
 0x4dc   : > { %3385 = vmatmul.mubr.f32.gmra.mrb[46].mxu1 %v9083_v55 }
 0x4dd   : > { %3389 = vmatprep.mubr.f32.mxu1 %v9043_v60  ;;  %4974 = vmatpush1.bf16.msra.mxu1 %v4973_v32  ;;  %v4982_v60 = vpack.c.bf16 %v2328_v22, %v2327_v37  ;;  %v2331_v32 = vld [vmem:[#allocation7 + $0x3c0] sm:$0xff]  ;;  %v2338_v37 = vld [vmem:[#allocation7 + $0x3f8] sm:$0xff] }
 0x4de   : > { %4975 = vmatprep.subr.bf16.mxu1 %v8879_v58  ;;  %v9086_v22 = vld [vmem:[#allocation67_spill] sm:$0xff] }
 0x4e0   : > { %3390 = vmatmul.mubr.f32.gmra.mrb[48].mxu1 %v9084_v47 }
 0x4e1   : > { %3394 = vmatprep.mubr.f32.mxu1 %v9044_v12  ;;  %4977 = vmatpush1.bf16.msra.mxu1 %v4976_v21  ;;  %v4985_v12 = vpack.c.bf16 %v2330_v42, %v2329_v57  ;;  %v2334_v21 = vld [vmem:[#allocation7 + $0x3d8] sm:$0xff]  ;;  %v2828_v42 = vrot.slane %v8013_v0, 2 }
 0x4e2   : > { %4978 = vmatprep.subr.bf16.mxu1 %v8879_v58 }
 0x4e4   : > { %3395 = vmatmul.mubr.f32.gmra.mrb[50].mxu1 %v7701_v8 }
 0x4e5   : > { %3399 = vmatprep.mubr.f32.mxu1 %v9045_v54  ;;  %4980 = vmatpush1.bf16.msra.mxu1 %v4979_v36  ;;  %v4988_v54 = vpack.c.bf16 %v2332_v44, %v2331_v32  ;;  %v2337_v36 = vld [vmem:[#allocation7 + $0x3f0] sm:$0xff]  ;;  %v2821_v32 = vrot.slane %v8013_v0, 1  ;;  %v2822_v44 = vrot.slane %v8031_v1, 1 }
 0x4e6   : > { %4981 = vmatprep.subr.bf16.mxu1 %v8879_v58 }
 0x4e8   : > { %3400 = vmatmul.mubr.f32.gmra.mrb[52].mxu1 %v7723_v38 }
 0x4e9   : > { %3404 = vmatprep.mubr.f32.mxu1 %v9046_v49  ;;  %4983 = vmatpush1.bf16.msra.mxu1 %v4982_v60  ;;  %v4991_v49 = vpack.c.bf16 %v2334_v21, %v2333_v62  ;;  %v9090_v60 = vld [vmem:[#allocation71_spill] sm:$0xff]  ;;  %v8137_v21 = vsel %vm649_vm1, %v2821_v32, %v2822_v44 }
 0x4ea   : > { %4984 = vmatprep.subr.bf16.mxu1 %v8879_v58 }
 0x4ec   : > { %3405 = vmatmul.mubr.f32.gmra.mrb[54].mxu1 %v7731_v45 }
 0x4ed   : > { %3409 = vmatprep.mubr.f32.mxu1 %v9047_v18  ;;  %4986 = vmatpush1.bf16.msra.mxu1 %v4985_v12  ;;  %v4994_v18 = vpack.c.bf16 %v2336_v28, %v2335_v31  ;;  %v9100_v28 = vld [vmem:[#allocation17_spill] sm:$0xff] }
 0x4ee   : > { %4987 = vmatprep.subr.bf16.mxu1 %v8879_v58 }
 0x4f0   : > { %3410 = vmatmul.mubr.f32.gmra.mrb[56].mxu1 %v7739_v25 }
 0x4f1   : > { %3414 = vmatprep.mubr.f32.mxu1 %v9048_v34  ;;  %4989 = vmatpush1.bf16.msra.mxu1 %v4988_v54  ;;  %v4997_v34 = vpack.c.bf16 %v2338_v37, %v2337_v36  ;;  %v9099_v54 = vld [vmem:[#allocation77_spill] sm:$0xff]  ;;  %v9113_v36 = vld [vmem:[#allocation36_spill] sm:$0xff] }
 0x4f2   : > { %4990 = vmatprep.subr.bf16.mxu1 %v8879_v58 }
 0x4f4   : > { %3415 = vmatmul.mubr.f32.gmra.mrb[58].mxu1 %v7746_v16 }
 0x4f5   : > { %3419 = vmatprep.mubr.f32.mxu1 %v9049_v14  ;;  %4992 = vmatpush1.bf16.msra.mxu1 %v4991_v49  ;;  %v9085_v14 = vld [vmem:[#allocation16_spill] sm:$0xff] }
 0x4f6   : > { %4993 = vmatprep.subr.bf16.mxu1 %v8879_v58 }
 0x4f8   : > { %3420 = vmatmul.mubr.f32.gmra.mrb[60].mxu1 %v7754_v10 }
 0x4f9   : > { %3424 = vmatprep.mubr.f32.mxu1 %v9050_v20  ;;  %4995 = vmatpush1.bf16.msra.mxu1 %v4994_v18  ;;  %v9087_v20 = vld [vmem:[#allocation68_spill] sm:$0xff]  ;;  %v9101_v18 = vld [vmem:[#allocation19_spill] sm:$0xff] }
 0x4fa   : > { %4996 = vmatprep.subr.bf16.mxu1 %v8879_v58  ;;  %v9088_v58 = vld [vmem:[#allocation69_spill] sm:$0xff] }
 0x4fc   : > { %3425 = vmatmul.mubr.f32.gmra.mrb[62].mxu1 %v7761_v2 }
 0x4fd   : > { %3429 = vmatprep.mubr.f32.mxu1 %v7593_v9  ;;  %4998 = vmatpush1.bf16.msra.mxu1 %v4997_v34  ;;  %v9089_v9 = vld [vmem:[#allocation70_spill] sm:$0xff]  ;;  %v9127_v34 = vld [vmem:[#allocation43_spill] sm:$0xff] }
 0x4fe   : > { %5031 = vmatprep.subr.bf16.mxu1 %v9085_v14 }
 0x500   : > { %3430 = vmatmul.mubr.f32.gmra.mrb[64].mxu1 %v7768_v61 }
 0x501   : > { %3434 = vmatprep.mubr.f32.mxu1 %v7612_v23  ;;  %v9091_v23 = vld [vmem:[#allocation72_spill] sm:$0xff] }
 0x504   : > { %3435 = vmatmul.mubr.f32.gmra.mrb[66].mxu1 %v9086_v22 }
 0x505   : > { %3439 = vmatprep.mubr.f32.mxu1 %v7621_v40  ;;  %v9092_v40 = vld [vmem:[#allocation73_spill] sm:$0xff] }
 0x508   : > { %3440 = vmatmul.mubr.f32.gmra.mrb[68].mxu1 %v9087_v20 }
 0x509   : > { %3444 = vmatprep.mubr.f32.mxu1 %v7647_v19  ;;  %v9093_v19 = vld [vmem:[#allocation74_spill] sm:$0xff] }
 0x50c   : > { %3445 = vmatmul.mubr.f32.gmra.mrb[70].mxu1 %v9088_v58 }
 0x50d   : > { %3449 = vmatprep.mubr.f32.mxu1 %v7660_v13  ;;  %v9094_v13 = vld [vmem:[#allocation76_spill] sm:$0xff] }
 0x510   : > { %3450 = vmatmul.mubr.f32.gmra.mrb[72].mxu1 %v9089_v9 }
 0x511   : > { %3454 = vmatprep.mubr.f32.mxu1 %v7677_v43  ;;  %v9095_v43 = vld [vmem:[#allocation30_spill] sm:$0xff] }
 0x514   : > { %3455 = vmatmul.mubr.f32.gmra.mrb[74].mxu1 %v9090_v60 }
 0x515   : > { %3459 = vmatprep.mubr.f32.mxu1 %v7691_v6  ;;  %v9096_v6 = vld [vmem:[#allocation35_spill] sm:$0xff] }
 0x518   : > { %3460 = vmatmul.mubr.f32.gmra.mrb[76].mxu1 %v9091_v23 }
 0x519   : > { %3464 = vmatprep.mubr.f32.mxu1 %v7706_v30  ;;  %v9097_v30 = vmax.f32 %v9066_v35, 0.0 }
 0x51b   : > { %v2530_v57 = vrot.slane %v9097_v30, 5  ;;  %v9131_v30 = vld [vmem:[#allocation51_spill] sm:$0xff] }
 0x51c   : > { %3465 = vmatmul.mubr.f32.gmra.mrb[78].mxu1 %v9092_v40 }
 0x51d   : > { %3469 = vmatprep.mubr.f32.mxu1 %v7714_v63  ;;  %v9098_v63 = vld [vmem:[#allocation38_spill] sm:$0xff]  ;;  %v2578_v12 = vsel %vm458_vm0, %v8017_v7, %v2530_v57 }
 0x51e   : > { %v2831_v62 = vrot.slane %v2578_v12, 2  ;;  %v2824_v49 = vrot.slane %v2578_v12, 1 }
 0x520   : > { %3470 = vmatmul.mubr.f32.gmra.mrb[80].mxu1 %v9093_v19  ;;  %v8145_v31 = vsel %vm649_vm1, %v2822_v44, %v2824_v49  ;;  %v9134_v49 = vld [vmem:[#allocation40_spill] sm:$0xff] }
 0x521   : > { %3474 = vmatprep.mubr.f32.mxu1 %v7720_v27  ;;  %v2829_v27 = vrot.slane %v8031_v1, 2 }
 0x523   : > { %v8133_v35 = vsel %vm755_vm2, %v2828_v42, %v2829_v27  ;;  %v8141_v7 = vsel %vm755_vm2, %v2829_v27, %v2831_v62  ;;  %v9132_v27 = vld [vmem:[#allocation37_spill] sm:$0xff] }
 0x524   : > { %3475 = vmatmul.mubr.f32.gmra.mrb[82].mxu1 %v9094_v13 }
 0x525   : > { %3479 = vmatprep.mubr.f32.mxu1 %v7994_v33 }
 0x528   : > { %3480 = vmatmul.mubr.f32.gmra.mrb[84].mxu1 %v9095_v43 }
 0x529   : > { %3484 = vmatprep.mubr.f32.mxu1 %v8005_v59 }
 0x52c   : > { %3485 = vmatmul.mubr.f32.gmra.mrb[86].mxu1 %v9096_v6 }
 0x52d   : > { %3489 = vmatprep.mubr.f32.mxu1 %v8023_v29 }
 0x530   : > { %3490 = vmatmul.mubr.f32.gmra.mrb[88].mxu1 %v9098_v63 }
 0x531   : > { %3494 = vmatprep.mubr.f32.mxu1 %v8037_v41 }
 0x534   : > { %3495 = vmatmul.mubr.f32.gmra.mrb[90].mxu1 %v9099_v54 }
 0x535   : > { %3499 = vmatprep.mubr.f32.mxu1 %v8133_v35 }
 0x538   : > { %3500 = vmatmul.mubr.f32.gmra.mrb[92].mxu1 %v8137_v21 }
 0x539   : > { %3504 = vmatprep.mubr.f32.mxu1 %v8141_v7 }
 0x53c   : > { %3505 = vmatmul.mubr.f32.gmra.mrb[94].mxu1 %v8145_v31 }
 0x53d   : > { %3574 = vmatprep.mubr.f32.mxu1 %v9078_v39  ;;  %v9104_v39 = vld [vmem:[#allocation13_spill] sm:$0xff] }
 0x540   : > { %3575 = vmatmul.mubr.f32.vlgmr.msra.gmra.mrb[32].mxu1 %v7265_v26  ;;  %v9102_v26 = vld [vmem:[#allocation20_spill] sm:$0xff] }
 0x541   : > { %3579 = vmatprep.mubr.f32.mxu1 %v9079_v3  ;;  %5039 = vmatpush3.bf16.msra.mxu1 %v9085_v14  ;;  %v9106_v3 = vld [vmem:[#allocation50_spill] sm:$0xff] }
 0x542   : > { %5032 = vmatprep.subr.bf16.mxu1 %v9100_v28 }
 0x544   : > { %3580 = vmatmul.mubr.f32.gmra.mrb[34].mxu1 %v7224_v48  ;;  %v9103_v48 = vld [vmem:[#allocation22_spill] sm:$0xff] }
 0x545   : > { %3584 = vmatprep.mubr.f32.mxu1 %v9080_v5  ;;  %5040 = vmatpush3.bf16.msra.mxu1 %v9100_v28  ;;  %v9108_v5 = vld [vmem:[#allocation18_spill] sm:$0xff] }
 0x546   : > { %5033 = vmatprep.subr.bf16.mxu1 %v9101_v18 }
 0x548   : > { %3585 = vmatmul.mubr.f32.gmra.mrb[36].mxu1 %v7278_v17  ;;  %v9105_v17 = vld [vmem:[#allocation23_spill] sm:$0xff] }
 0x549   : > { %3589 = vmatprep.mubr.f32.mxu1 %v9081_v51  ;;  %5041 = vmatpush3.bf16.msra.mxu1 %v9101_v18  ;;  %v9109_v51 = vld [vmem:[#allocation25_spill] sm:$0xff] }
 0x54a   : > { %5034 = vmatprep.subr.bf16.mxu1 %v9102_v26  ;;  %v9135_v18 = vld [vmem:[#allocation41_spill] sm:$0xff] }
 0x54c   : > { %3590 = vmatmul.mubr.f32.gmra.mrb[38].mxu1 %v7275_v46  ;;  %v9107_v46 = vld [vmem:[#allocation24_spill] sm:$0xff] }
 0x54d   : > { %3594 = vmatprep.mubr.f32.mxu1 %v9082_v4  ;;  %5042 = vmatpush3.bf16.msra.mxu1 %v9102_v26  ;;  %v9110_v4 = vld [vmem:[#allocation15_spill] sm:$0xff] }
 0x54e   : > { %5035 = vmatprep.subr.bf16.mxu1 %v9103_v48 }
 0x550   : > { %3595 = vmatmul.mubr.f32.gmra.mrb[40].mxu1 %v9104_v39 }
 0x551   : > { %3599 = vmatprep.mubr.f32.mxu1 %v9083_v55  ;;  %5043 = vmatpush3.bf16.msra.mxu1 %v9103_v48  ;;  %v9111_v55 = vld [vmem:[#allocation28_spill] sm:$0xff] }
 0x552   : > { %5036 = vmatprep.subr.bf16.mxu1 %v9105_v17 }
 0x554   : > { %3600 = vmatmul.mubr.f32.gmra.mrb[42].mxu1 %v9106_v3 }
 0x555   : > { %3604 = vmatprep.mubr.f32.mxu1 %v9084_v47  ;;  %5044 = vmatpush3.bf16.msra.mxu1 %v9105_v17  ;;  %v9112_v47 = vld [vmem:[#allocation29_spill] sm:$0xff]  ;;  %v9136_v17 = vld [vmem:[#allocation48_spill] sm:$0xff] }
 0x556   : > { %5037 = vmatprep.subr.bf16.mxu1 %v9107_v46 }
 0x558   : > { %3605 = vmatmul.mubr.f32.gmra.mrb[44].mxu1 %v9108_v5 }
 0x559   : > { %3609 = vmatprep.mubr.f32.mxu1 %v7701_v8  ;;  %5045 = vmatpush3.bf16.msra.mxu1 %v9107_v46  ;;  %v9114_v8 = vld [vmem:[#allocation57_spill] sm:$0xff] }
 0x55a   : > { %5038 = vmatprep.subr.bf16.mxu1 %v9109_v51 }
 0x55c   : > { %3610 = vmatmul.mubr.f32.gmra.mrb[46].mxu1 %v9110_v4 }
 0x55d   : > { %3614 = vmatprep.mubr.f32.mxu1 %v7723_v38  ;;  %5046 = vmatpush3.bf16.msra.mxu1 %v9109_v51  ;;  %v9120_v38 = vld [vmem:[#allocation64_spill] sm:$0xff]  ;;  %v9137_v51 = vld [vmem:[#allocation45_spill] sm:$0xff] }
 0x560   : > { %3615 = vmatmul.mubr.f32.gmra.mrb[48].mxu1 %v9111_v55 }
 0x561   : > { %3619 = vmatprep.mubr.f32.mxu1 %v7731_v45  ;;  %v9121_v45 = vld [vmem:[#allocation60_spill] sm:$0xff] }
 0x564   : > { %3620 = vmatmul.mubr.f32.gmra.mrb[50].mxu1 %v9112_v47 }
 0x565   : > { %3624 = vmatprep.mubr.f32.mxu1 %v7739_v25  ;;  %v9122_v25 = vld [vmem:[#allocation75_spill] sm:$0xff] }
 0x568   : > { %3625 = vmatmul.mubr.f32.gmra.mrb[52].mxu1 %v9113_v36 }
 0x569   : > { %3629 = vmatprep.mubr.f32.mxu1 %v7746_v16  ;;  %v9123_v16 = vld [vmem:[#allocation66_spill] sm:$0xff] }
 0x56c   : > { %3630 = vmatmul.mubr.f32.gmra.mrb[54].mxu1 %v7400_v52  ;;  %v9115_v52 = vld [vmem:[#allocation44_spill] sm:$0xff] }
 0x56d   : > { %3634 = vmatprep.mubr.f32.mxu1 %v7754_v10  ;;  %v9124_v10 = vld [vmem:[#allocation31_spill] sm:$0xff] }
 0x570   : > { %3635 = vmatmul.mubr.f32.gmra.mrb[56].mxu1 %v7457_v53  ;;  %v9116_v53 = vld [vmem:[#allocation61_spill] sm:$0xff] }
 0x571   : > { %3639 = vmatprep.mubr.f32.mxu1 %v7761_v2  ;;  %v9125_v2 = vld [vmem:[#allocation39_spill] sm:$0xff] }
 0x574   : > { %3640 = vmatmul.mubr.f32.gmra.mrb[58].mxu1 %v7436_v50  ;;  %v9117_v50 = vld [vmem:[#allocation52_spill] sm:$0xff] }
 0x575   : > { %3644 = vmatprep.mubr.f32.mxu1 %v7768_v61  ;;  %v9126_v61 = vld [vmem:[#allocation46_spill] sm:$0xff] }
 0x578   : > { %3645 = vmatmul.mubr.f32.gmra.mrb[60].mxu1 %v7515_v24  ;;  %v9118_v24 = vld [vmem:[#allocation62_spill] sm:$0xff] }
 0x579   : > { %3649 = vmatprep.mubr.f32.mxu1 %v9086_v22 }
 0x57c   : > { %3650 = vmatmul.mubr.f32.gmra.mrb[62].mxu1 %v7461_v11  ;;  %v9119_v11 = vld [vmem:[#allocation56_spill] sm:$0xff] }
 0x57d   : > { %3654 = vmatprep.mubr.f32.mxu1 %v9087_v20  ;;  %v9128_v20 = vld [vmem:[#allocation49_spill] sm:$0xff] }
 0x580   : > { %3655 = vmatmul.mubr.f32.gmra.mrb[64].mxu1 %v9114_v8 }
 0x581   : > { %3659 = vmatprep.mubr.f32.mxu1 %v9088_v58 }
 0x584   : > { %3660 = vmatmul.mubr.f32.gmra.mrb[66].mxu1 %v9115_v52 }
 0x585   : > { %3664 = vmatprep.mubr.f32.mxu1 %v9089_v9 }
 0x588   : > { %3665 = vmatmul.mubr.f32.gmra.mrb[68].mxu1 %v9116_v53 }
 0x589   : > { %3669 = vmatprep.mubr.f32.mxu1 %v9090_v60 }
 0x58c   : > { %3670 = vmatmul.mubr.f32.gmra.mrb[70].mxu1 %v9117_v50  ;;  %v9138_v50 = vld [vmem:[#allocation55_spill] sm:$0xff] }
 0x58d   : > { %3674 = vmatprep.mubr.f32.mxu1 %v9091_v23  ;;  %v9129_v23 = vld [vmem:[#allocation14_spill] sm:$0xff] }
 0x590   : > { %3675 = vmatmul.mubr.f32.gmra.mrb[72].mxu1 %v9118_v24 }
 0x591   : > { %3679 = vmatprep.mubr.f32.mxu1 %v9092_v40 }
 0x594   : > { %3680 = vmatmul.mubr.f32.gmra.mrb[74].mxu1 %v9119_v11 }
 0x595   : > { %3684 = vmatprep.mubr.f32.mxu1 %v9093_v19  ;;  %v9130_v19 = vld [vmem:[#allocation21_spill] sm:$0xff] }
 0x598   : > { %3685 = vmatmul.mubr.f32.gmra.mrb[76].mxu1 %v9120_v38 }
 0x599   : > { %3689 = vmatprep.mubr.f32.mxu1 %v9094_v13 }
 0x59c   : > { %3690 = vmatmul.mubr.f32.gmra.mrb[78].mxu1 %v9121_v45 }
 0x59d   : > { %3694 = vmatprep.mubr.f32.mxu1 %v9095_v43 }
 0x5a0   : > { %3695 = vmatmul.mubr.f32.gmra.mrb[80].mxu1 %v9122_v25 }
 0x5a1   : > { %3699 = vmatprep.mubr.f32.mxu1 %v9096_v6 }
 0x5a4   : > { %3700 = vmatmul.mubr.f32.gmra.mrb[82].mxu1 %v9123_v16 }
 0x5a5   : > { %3704 = vmatprep.mubr.f32.mxu1 %v9098_v63 }
 0x5a8   : > { %3705 = vmatmul.mubr.f32.gmra.mrb[84].mxu1 %v9124_v10 }
 0x5a9   : > { %3709 = vmatprep.mubr.f32.mxu1 %v9099_v54 }
 0x5ac   : > { %3710 = vmatmul.mubr.f32.gmra.mrb[86].mxu1 %v9125_v2 }
 0x5ad   : > { %3714 = vmatprep.mubr.f32.mxu1 %v8137_v21 }
 0x5b0   : > { %3715 = vmatmul.mubr.f32.gmra.mrb[88].mxu1 %v8013_v0 }
 0x5b1   : > { %3719 = vmatprep.mubr.f32.mxu1 %v8145_v31 }
 0x5b4   : > { %3720 = vmatmul.mubr.f32.gmra.mrb[90].mxu1 %v8031_v1 }
 0x5b5   : > { %3724 = vmatprep.mubr.f32.mxu1 %v9098_v63 }
 0x5b8   : > { %3725 = vmatmul.mubr.f32.gmra.mrb[92].mxu1 %v9124_v10 }
 0x5b9   : > { %3729 = vmatprep.mubr.f32.mxu1 %v9099_v54  ;;  %v9133_v54 = vld [vmem:[#allocation33_spill] sm:$0xff] }
 0x5bc   : > { %3730 = vmatmul.mubr.f32.gmra.mrb[94].mxu1 %v9125_v2 }
 0x5bd   : > { %4571 = vmatprep.mubr.f32.mxu1 %v7994_v33 }
 0x5c0   : > { %4572 = vmatmul.mubr.f32.vlgmr.msra.gmra.mrb[96].mxu1 %v8005_v59 }
 0x5c1   : > { %4574 = vmatprep.mubr.f32.mxu1 %v8023_v29 }
 0x5c4   : > { %4575 = vmatmul.mubr.f32.gmra.mrb[98].mxu1 %v8037_v41 }
 0x5c5   : > { %4577 = vmatprep.mubr.f32.mxu1 %v8133_v35 }
 0x5c8   : > { %4578 = vmatmul.mubr.f32.gmra.mrb[100].mxu1 %v8141_v7 }
 0x5c9   : > { %4580 = vmatprep.mubr.f32.mxu1 %v8023_v29 }
 0x5cc   : > { %4581 = vmatmul.mubr.f32.gmra.mrb[102].mxu1 %v8037_v41 }
 0x613   : > { %v3576_v0 = vpop.f32.mrb[32].mxu1 }
 0x614   : > { %v8236_v1 = vadd.f32 %v9126_v61, %v3576_v0  ;;  %v3578_v37 = vpop.f32.mrb[33].mxu1  ;;  %v9139_v61 = vld [vmem:[#allocation53_spill] sm:$0xff] }
 0x616   : > { %v3998_v8 = vmul.f32 %v8236_v1, %v8236_v1 }
 0x617   : > { %v3581_v33 = vpop.f32.mrb[34].mxu1 }
 0x618   : > { %v8239_v59 = vadd.f32 %v9127_v34, %v3581_v33  ;;  %v3583_v14 = vpop.f32.mrb[35].mxu1 }
 0x61a   : > { %v3999_v47 = vmul.f32 %v8239_v59, %v8239_v59  ;;  %v3960_v52 = vadd.f32 %v8239_v59, %v8236_v1 }
 0x61b   : > { %v3586_v22 = vpop.f32.mrb[36].mxu1 }
 0x61c   : > { %v8242_v58 = vadd.f32 %v9128_v20, %v3586_v22  ;;  %v3588_v9 = vpop.f32.mrb[37].mxu1  ;;  %v4030_v38 = vadd.f32 %v3999_v47, %v3998_v8 }
 0x61e   : > { %v4000_v53 = vmul.f32 %v8242_v58, %v8242_v58  ;;  %v3961_v45 = vadd.f32 %v3960_v52, %v8242_v58 }
 0x61f   : > { %v3591_v60 = vpop.f32.mrb[38].mxu1 }
 0x620   : > { %v8245_v29 = vadd.f32 %v9129_v23, %v3591_v60  ;;  %v3593_v41 = vpop.f32.mrb[39].mxu1  ;;  %v4031_v10 = vadd.f32 %v4030_v38, %v4000_v53 }
 0x621   : > { %v9140_v41 = vld [vmem:[#allocation34_spill] sm:$0xff] }
 0x622   : > { %v4001_v25 = vmul.f32 %v8245_v29, %v8245_v29  ;;  %v3962_v2 = vadd.f32 %v3961_v45, %v8245_v29 }
 0x623   : > { %v3596_v40 = vpop.f32.mrb[40].mxu1 }
 0x624   : > { %v8248_v13 = vadd.f32 %v9130_v19, %v3596_v40  ;;  %v3598_v43 = vpop.f32.mrb[41].mxu1  ;;  %v4032_v34 = vadd.f32 %v4031_v10, %v4001_v25 }
 0x626   : > { %v4002_v0 = vmul.f32 %v8248_v13, %v8248_v13  ;;  %v3963_v14 = vadd.f32 %v3962_v2, %v8248_v13 }
 0x627   : > { %v3601_v6 = vpop.f32.mrb[42].mxu1 }
 0x628   : > { %v8251_v57 = vadd.f32 %v9131_v30, %v3601_v6  ;;  %v3603_v63 = vpop.f32.mrb[43].mxu1  ;;  %v4033_v9 = vadd.f32 %v4032_v34, %v4002_v0 }
 0x62a   : > { %v4003_v22 = vmul.f32 %v8251_v57, %v8251_v57  ;;  %v3964_v60 = vadd.f32 %v3963_v14, %v8251_v57 }
 0x62b   : > { %v3606_v42 = vpop.f32.mrb[44].mxu1 }
 0x62c   : > { %v8254_v12 = vadd.f32 %v9132_v27, %v3606_v42  ;;  %v3608_v32 = vpop.f32.mrb[45].mxu1  ;;  %v4034_v43 = vadd.f32 %v4033_v9, %v4003_v22 }
 0x62e   : > { %v4004_v23 = vmul.f32 %v8254_v12, %v8254_v12  ;;  %v3965_v6 = vadd.f32 %v3964_v60, %v8254_v12 }
 0x62f   : > { %v3611_v44 = vpop.f32.mrb[46].mxu1 }
 0x630   : > { %v8257_v35 = vadd.f32 %v9133_v54, %v3611_v44  ;;  %v3613_v62 = vpop.f32.mrb[47].mxu1  ;;  %v4035_v42 = vadd.f32 %v4034_v43, %v4004_v23  ;;  %v9141_v44 = vld [vmem:[#allocation58_spill] sm:$0xff]  ;;  %v9145_v43 = vld [vmem:[#allocation79_spill] sm:$0xff] }
 0x632   : > { %v4005_v30 = vmul.f32 %v8257_v35, %v8257_v35  ;;  %v3966_v27 = vadd.f32 %v3965_v6, %v8257_v35 }
 0x633   : > { %v3616_v21 = vpop.f32.mrb[48].mxu1 }
 0x634   : > { %v8260_v7 = vadd.f32 %v9134_v49, %v3616_v21  ;;  %v3618_v31 = vpop.f32.mrb[49].mxu1  ;;  %v4036_v21 = vadd.f32 %v4035_v42, %v4005_v30 }
 0x636   : > { %v4006_v32 = vmul.f32 %v8260_v7, %v8260_v7  ;;  %v3967_v49 = vadd.f32 %v3966_v27, %v8260_v7 }
 0x637   : > { %v3621_v28 = vpop.f32.mrb[50].mxu1 }
 0x638   : > { %v8263_v26 = vadd.f32 %v9135_v18, %v3621_v28  ;;  %v3623_v48 = vpop.f32.mrb[51].mxu1  ;;  %v4037_v18 = vadd.f32 %v4036_v21, %v4006_v32 }
 0x63a   : > { %v4007_v31 = vmul.f32 %v8263_v26, %v8263_v26  ;;  %v3968_v48 = vadd.f32 %v3967_v49, %v8263_v26  ;;  %v9146_v49 = vld [vmem:[#allocation82_spill] sm:$0xff] }
 0x63b   : > { %v3626_v39 = vpop.f32.mrb[52].mxu1 }
 0x63c   : > { %v8266_v3 = vadd.f32 %v9136_v17, %v3626_v39  ;;  %v3628_v46 = vpop.f32.mrb[53].mxu1  ;;  %v9142_v17 = vld [vmem:[#allocation78_spill] sm:$0xff] }
 0x63e   : > { %v4008_v39 = vmul.f32 %v8266_v3, %v8266_v3 }
 0x63f   : > { %v3631_v5 = vpop.f32.mrb[54].mxu1 }
 0x640   : > { %v8269_v4 = vadd.f32 %v9137_v51, %v3631_v5  ;;  %v3633_v55 = vpop.f32.mrb[55].mxu1  ;;  %v4038_v51 = vadd.f32 %v4037_v18, %v4007_v31 }
 0x641   : > { %v3969_v55 = vadd.f32 %v3968_v48, %v8266_v3 }
 0x642   : > { %v4009_v47 = vmul.f32 %v8269_v4, %v8269_v4  ;;  %v4039_v8 = vadd.f32 %v4038_v51, %v4008_v39 }
 0x643   : > { %v3636_v36 = vpop.f32.mrb[56].mxu1  ;;  %v3970_v52 = vadd.f32 %v3969_v55, %v8269_v4 }
 0x644   : > { %v8280_v24 = vadd.f32 %v9138_v50, %v3636_v36  ;;  %v3638_v11 = vpop.f32.mrb[57].mxu1  ;;  %v9143_v50 = vld [vmem:[#allocation26_spill] sm:$0xff]  ;;  %v4040_v45 = vadd.f32 %v4039_v8, %v4009_v47  ;;  %v9147_v47 = vld [vmem:[#allocation81_spill] sm:$0xff] }
 0x646   : > { %v4010_v53 = vmul.f32 %v8280_v24, %v8280_v24  ;;  %v3971_v25 = vadd.f32 %v3970_v52, %v8280_v24 }
 0x647   : > { %v3641_v16 = vpop.f32.mrb[58].mxu1 }
 0x648   : > { %v8289_v37 = vadd.f32 %v9139_v61, %v3641_v16  ;;  %v3643_v33 = vpop.f32.mrb[59].mxu1  ;;  %v4041_v2 = vadd.f32 %v4040_v45, %v4010_v53 }
 0x649   : > { %v9144_v33 = vld [vmem:[#allocation80_spill] sm:$0xff] }
 0x64a   : > { %v4011_v16 = vmul.f32 %v8289_v37, %v8289_v37  ;;  %v3972_v0 = vadd.f32 %v3971_v25, %v8289_v37 }
 0x64b   : > { %v3646_v20 = vpop.f32.mrb[60].mxu1 }
 0x64c   : > { %v8298_v40 = vadd.f32 %v9140_v41, %v3646_v20  ;;  %v3648_v19 = vpop.f32.mrb[61].mxu1  ;;  %v4042_v22 = vadd.f32 %v4041_v2, %v4011_v16 }
 0x64e   : > { %v4012_v61 = vmul.f32 %v8298_v40, %v8298_v40  ;;  %v3973_v20 = vadd.f32 %v3972_v0, %v8298_v40 }
 0x64f   : > { %v3651_v63 = vpop.f32.mrb[62].mxu1 }
 0x650   : > { %v8307_v54 = vadd.f32 %v9141_v44, %v3651_v63  ;;  %v3653_v62 = vpop.f32.mrb[63].mxu1  ;;  %v4043_v23 = vadd.f32 %v4042_v22, %v4012_v61 }
 0x652   : > { %v4013_v9 = vmul.f32 %v8307_v54, %v8307_v54  ;;  %v3974_v41 = vadd.f32 %v3973_v20, %v8307_v54 }
 0x653   : > { %v3656_v28 = vpop.f32.mrb[64].mxu1 }
 0x654   : > { %v8316_v46 = vadd.f32 %v9142_v17, %v3656_v28  ;;  %v3658_v5 = vpop.f32.mrb[65].mxu1  ;;  %v4044_v63 = vadd.f32 %v4043_v23, %v4013_v9 }
 0x656   : > { %v4014_v19 = vmul.f32 %v8316_v46, %v8316_v46  ;;  %v3975_v42 = vadd.f32 %v3974_v41, %v8316_v46 }
 0x657   : > { %v3661_v36 = vpop.f32.mrb[66].mxu1 }
 0x658   : > { %v8325_v11 = vadd.f32 %v9143_v50, %v3661_v36  ;;  %v3663_v38 = vpop.f32.mrb[67].mxu1  ;;  %v4045_v44 = vadd.f32 %v4044_v63, %v4014_v19 }
 0x65a   : > { %v4015_v27 = vmul.f32 %v8325_v11, %v8325_v11  ;;  %v3976_v62 = vadd.f32 %v3975_v42, %v8325_v11 }
 0x65b   : > { %v3666_v10 = vpop.f32.mrb[68].mxu1 }
 0x65c   : > { %v8334_v34 = vadd.f32 %v9144_v33, %v3666_v10  ;;  %v3668_v14 = vpop.f32.mrb[69].mxu1  ;;  %v4046_v18 = vadd.f32 %v4045_v44, %v4015_v27 }
 0x65e   : > { %v4016_v21 = vmul.f32 %v8334_v34, %v8334_v34  ;;  %v3977_v48 = vadd.f32 %v3976_v62, %v8334_v34 }
 0x65f   : > { %v3671_v60 = vpop.f32.mrb[70].mxu1 }
 0x660   : > { %v8343_v6 = vadd.f32 %v9145_v43, %v3671_v60  ;;  %v3673_v30 = vpop.f32.mrb[71].mxu1  ;;  %v4047_v5 = vadd.f32 %v4046_v18, %v4016_v21 }
 0x662   : > { %v4017_v39 = vmul.f32 %v8343_v6, %v8343_v6  ;;  %v3978_v51 = vadd.f32 %v3977_v48, %v8343_v6 }
 0x663   : > { %v3676_v32 = vpop.f32.mrb[72].mxu1 }
 0x664   : > { %v8352_v31 = vadd.f32 %v9146_v49, %v3676_v32  ;;  %v3678_v28 = vpop.f32.mrb[73].mxu1  ;;  %v4048_v52 = vadd.f32 %v4047_v5, %v4017_v39 }
 0x666   : > { %v4018_v55 = vmul.f32 %v8352_v31, %v8352_v31  ;;  %v3979_v53 = vadd.f32 %v3978_v51, %v8352_v31 }
 0x667   : > { %v3681_v17 = vpop.f32.mrb[74].mxu1 }
 0x668   : > { %v8361_v36 = vadd.f32 %v9147_v47, %v3681_v17  ;;  %v3683_v8 = vpop.f32.mrb[75].mxu1  ;;  %v4049_v45 = vadd.f32 %v4048_v52, %v4018_v55 }
 0x66a   : > { %v4019_v50 = vmul.f32 %v8361_v36, %v8361_v36  ;;  %v3980_v25 = vadd.f32 %v3979_v53, %v8361_v36 }
 0x66b   : > { %v3686_v38 = vpop.f32.mrb[76].mxu1 }
 0x66c   : > { %v8368_v16 = vadd.f32 %v8048_v15, %v3686_v38  ;;  %v3688_v10 = vpop.f32.mrb[77].mxu1  ;;  %v4050_v2 = vadd.f32 %v4049_v45, %v4019_v50 }
 0x66e   : > { %v3981_v0 = vadd.f32 %v3980_v25, %v8368_v16  ;;  %v4020_v61 = vmul.f32 %v8368_v16, %v8368_v16 }
 0x66f   : > { %v3691_v33 = vpop.f32.mrb[78].mxu1 }
 0x670   : > { %v4051_v14 = vadd.f32 %v4050_v2, %v4020_v61  ;;  %v8374_v22 = vadd.f32 %v8045_v56, %v3691_v33  ;;  %v3693_v20 = vpop.f32.mrb[79].mxu1 }
 0x672   : > { %v3982_v9 = vadd.f32 %v3981_v0, %v8374_v22  ;;  %v4021_v60 = vmul.f32 %v8374_v22, %v8374_v22 }
 0x673   : > { %v3696_v15 = vpop.f32.mrb[80].mxu1 }
 0x674   : > { %v4052_v23 = vadd.f32 %v4051_v14, %v4021_v60  ;;  %v3698_v41 = vpop.f32.mrb[81].mxu1 }
 0x677   : > { %v3701_v19 = vpop.f32.mrb[82].mxu1 }
 0x678   : > { %v3703_v43 = vpop.f32.mrb[83].mxu1 }
 0x67b   : > { %v3706_v30 = vpop.f32.mrb[84].mxu1 }
 0x67c   : > { %v3708_v63 = vpop.f32.mrb[85].mxu1 }
 0x67f   : > { %v3711_v42 = vpop.f32.mrb[86].mxu1 }
 0x680   : > { %v3713_v27 = vpop.f32.mrb[87].mxu1 }
 0x683   : > { %v3716_v32 = vpop.f32.mrb[88].mxu1 }
 0x684   : > { %v3718_v44 = vpop.f32.mrb[89].mxu1 }
 0x687   : > { %v3721_v62 = vpop.f32.mrb[90].mxu1 }
 0x688   : > { %v3723_v56 = vpop.f32.mrb[91].mxu1 }
 0x68b   : > { %v3726_v21 = vpop.f32.mrb[92].mxu1 }
 0x68c   : > { %v3728_v49 = vpop.f32.mrb[93].mxu1 }
 0x68f   : > { %v3731_v28 = vpop.f32.mrb[94].mxu1 }
 0x690   : > { %v3733_v18 = vpop.f32.mrb[95].mxu1 }
 0x693   : > { %v4573_v48 = vpop.f32.mrb[96].mxu1 }
 0x694   : > { %v8379_v39 = vadd.f32 %v4573_v48, %v3701_v19  ;;  %v3921_v17 = vpop.f32.mrb[97].mxu1 }
 0x695   : > { %v8381_v5 = vadd.f32 %v3921_v17, %v3696_v15 }
 0x696   : > { %v4023_v53 = vmul.f32 %v8379_v39, %v8379_v39 }
 0x697   : > { %v3983_v51 = vadd.f32 %v3982_v9, %v8381_v5  ;;  %v4022_v55 = vmul.f32 %v8381_v5, %v8381_v5  ;;  %v4576_v47 = vpop.f32.mrb[98].mxu1 }
 0x698   : > { %v8386_v8 = vadd.f32 %v4576_v47, %v3711_v42  ;;  %v3931_v52 = vpop.f32.mrb[99].mxu1 }
 0x699   : > { %v4053_v50 = vadd.f32 %v4052_v23, %v4022_v55  ;;  %v8390_v38 = vadd.f32 %v3931_v52, %v3706_v30  ;;  %v3984_v45 = vadd.f32 %v3983_v51, %v8379_v39 }
 0x69a   : > { %v4025_v14 = vmul.f32 %v8386_v8, %v8386_v8 }
 0x69b   : > { %v3985_v25 = vadd.f32 %v3984_v45, %v8390_v38  ;;  %v4024_v10 = vmul.f32 %v8390_v38, %v8390_v38  ;;  %v4054_v2 = vadd.f32 %v4053_v50, %v4023_v53  ;;  %v4579_v0 = vpop.f32.mrb[100].mxu1 }
 0x69c   : > { %v8396_v61 = vadd.f32 %v4579_v0, %v3721_v62  ;;  %v3941_v33 = vpop.f32.mrb[101].mxu1 }
 0x69d   : > { %v4055_v20 = vadd.f32 %v4054_v2, %v4024_v10  ;;  %v8400_v9 = vadd.f32 %v3941_v33, %v3716_v32  ;;  %v3986_v60 = vadd.f32 %v3985_v25, %v8386_v8 }
 0x69e   : > { %v4027_v63 = vmul.f32 %v8396_v61, %v8396_v61 }
 0x69f   : > { %v3987_v15 = vadd.f32 %v3986_v60, %v8400_v9  ;;  %v4026_v23 = vmul.f32 %v8400_v9, %v8400_v9  ;;  %v4056_v41 = vadd.f32 %v4055_v20, %v4025_v14  ;;  %v4582_v19 = vpop.f32.mrb[102].mxu1 }
 0x6a0   : > { %v8406_v43 = vadd.f32 %v4582_v19, %v3731_v28  ;;  %v3951_v30 = vpop.f32.mrb[103].mxu1 }
 0x6a1   : > { %v4057_v42 = vadd.f32 %v4056_v41, %v4026_v23  ;;  %v3952_v27 = vadd.f32 %v3951_v30, %v3726_v21  ;;  %v3988_v32 = vadd.f32 %v3987_v15, %v8396_v61 }
 0x6a2   : > { %v4029_v49 = vmul.f32 %v8406_v43, %v8406_v43 }
 0x6a3   : > { %v3989_v44 = vadd.f32 %v3988_v32, %v3952_v27  ;;  %v4028_v62 = vmul.f32 %v3952_v27, %v3952_v27  ;;  %v4058_v56 = vadd.f32 %v4057_v42, %v4027_v63 }
 0x6a5   : > { %v3990_v18 = vadd.f32 %v3989_v44, %v8406_v43  ;;  %v4059_v48 = vadd.f32 %v4058_v56, %v4028_v62 }
 0x6a7   : > { %v3991_v17 = vrot.slane %v3990_v18, 4  ;;  %v4060_v28 = vadd.f32 %v4059_v48, %v4029_v49 }
 0x6a9   : > { %v3992_v51 = vadd.f32 %v3991_v17, %v3990_v18  ;;  %v4061_v55 = vrot.slane %v4060_v28, 4  ;;  %v5507_v17 = vld [vmem:[%s5913_s28 + $0xf0] sm:$0xff] }
 0x6ab   : > { %v3993_v47 = vrot.slane %v3992_v51, 2  ;;  %v4062_v52 = vadd.f32 %v4061_v55, %v4060_v28 }
 0x6ad   : > { %v3994_v53 = vadd.f32 %v3993_v47, %v3992_v51  ;;  %v4063_v50 = vrot.slane %v4062_v52, 2 }
 0x6af   : > { %v3995_v21 = vrot.slane %v3994_v53, 1  ;;  %v4064_v45 = vadd.f32 %v4063_v50, %v4062_v52 }
 0x6b1   : > { %v3996_v25 = vadd.f32 %v3995_v21, %v3994_v53  ;;  %v4065_v10 = vrot.slane %v4064_v45, 1 }
 0x6b3   : > { %v8414_v2 = vmul.f32 0.00390625, %v3996_v25  ;;  %v4066_v0 = vadd.f32 %v4065_v10, %v4064_v45 }
 0x6b5   : > { %v4067_v33 = vmul.f32 0.00390625, %v4066_v0  ;;  %v4068_v14 = vmul.f32 %v8414_v2, %v8414_v2  ;;  %v4101_v20 = vsub.f32 %v3952_v27, %v8414_v2  ;;  %v4092_v41 = vsub.f32 %v8361_v36, %v8414_v2 }
 0x6b6   : > { %v4093_v19 = vsub.f32 %v8368_v16, %v8414_v2  ;;  %v4094_v30 = vsub.f32 %v8374_v22, %v8414_v2  ;;  %v4095_v63 = vsub.f32 %v8381_v5, %v8414_v2  ;;  %v4096_v42 = vsub.f32 %v8379_v39, %v8414_v2 }
 0x6b7   : > { %v4069_v60 = vsub.f32 %v4067_v33, %v4068_v14  ;;  %v4097_v27 = vsub.f32 %v8390_v38, %v8414_v2  ;;  %v4098_v32 = vsub.f32 %v8386_v8, %v8414_v2  ;;  %v4099_v36 = vsub.f32 %v8400_v9, %v8414_v2 }
 0x6b8   : > { %v4100_v16 = vsub.f32 %v8396_v61, %v8414_v2  ;;  %v4102_v22 = vsub.f32 %v8406_v43, %v8414_v2  ;;  %v4071_v5 = vsub.f32 %v8236_v1, %v8414_v2  ;;  %v4072_v39 = vsub.f32 %v8239_v59, %v8414_v2 }
 0x6b9   : > { %v4070_v15 = vmax.f32 %v4069_v60, 0.0  ;;  %v4073_v38 = vsub.f32 %v8242_v58, %v8414_v2  ;;  %v4074_v8 = vsub.f32 %v8245_v29, %v8414_v2  ;;  %v4075_v9 = vsub.f32 %v8248_v13, %v8414_v2 }
 0x6ba   : > { %v4076_v61 = vsub.f32 %v8251_v57, %v8414_v2  ;;  %v4077_v43 = vsub.f32 %v8254_v12, %v8414_v2  ;;  %v4078_v1 = vsub.f32 %v8257_v35, %v8414_v2  ;;  %v4079_v59 = vsub.f32 %v8260_v7, %v8414_v2 }
 0x6bb   : > { %v4103_v23 = vadd.f32 1e-05, %v4070_v15  ;;  %v4080_v58 = vsub.f32 %v8263_v26, %v8414_v2  ;;  %v4081_v29 = vsub.f32 %v8266_v3, %v8414_v2  ;;  %v4082_v13 = vsub.f32 %v8269_v4, %v8414_v2 }
 0x6bc   : > { %v4083_v57 = vsub.f32 %v8280_v24, %v8414_v2  ;;  %v4084_v12 = vsub.f32 %v8289_v37, %v8414_v2  ;;  %v4085_v35 = vsub.f32 %v8298_v40, %v8414_v2  ;;  %v4086_v7 = vsub.f32 %v8307_v54, %v8414_v2 }
 0x6bd   : > { %5505 = vrsqrt.f32 %v4103_v23  ;;  %v4087_v26 = vsub.f32 %v8316_v46, %v8414_v2  ;;  %v4088_v4 = vsub.f32 %v8325_v11, %v8414_v2  ;;  %v4089_v24 = vsub.f32 %v8334_v34, %v8414_v2 }
 0x6be   : > { %v4090_v37 = vsub.f32 %v8343_v6, %v8414_v2  ;;  %v4091_v40 = vsub.f32 %v8352_v31, %v8414_v2 }
 0x6c7   : > { %v5506_v3 = vpop.eup %5505 }
 0x6c8   : > { %v4135_v44 = vmul.f32 %v5506_v3, %v4101_v20  ;;  %v4105_v62 = vmul.f32 %v5506_v3, %v4071_v5  ;;  %v4106_v54 = vmul.f32 %v5506_v3, %v4072_v39  ;;  %v4107_v56 = vmul.f32 %v5506_v3, %v4073_v38  ;;  %v5510_v39 = vld [vmem:[%s5913_s28 + $0x10] sm:$0xff]  ;;  %v5511_v38 = vld [vmem:[%s5913_s28 + $0x18] sm:$0xff] }
 0x6c9   : > { %v4108_v49 = vmul.f32 %v5506_v3, %v4074_v8  ;;  %v4109_v46 = vmul.f32 %v5506_v3, %v4075_v9  ;;  %v4110_v18 = vmul.f32 %v5506_v3, %v4076_v61  ;;  %v4111_v48 = vmul.f32 %v5506_v3, %v4077_v43  ;;  %v5513_v8 = vld [vmem:[%s5913_s28 + $0x28] sm:$0xff]  ;;  %v5514_v9 = vld [vmem:[%s5913_s28 + $0x30] sm:$0xff]  ;;  %v5515_v43 = vld [vmem:[%s5913_s28 + $0x38] sm:$0xff] }
 0x6ca   : > { %v4167_v11 = vadd.f32 %v5507_v17, %v4135_v44  ;;  %v4112_v28 = vmul.f32 %v5506_v3, %v4078_v1  ;;  %v4113_v51 = vmul.f32 %v5506_v3, %v4079_v59  ;;  %v4114_v34 = vmul.f32 %v5506_v3, %v4080_v58  ;;  %v5516_v59 = vld [vmem:[%s5913_s28 + $0x40] sm:$0xff]  ;;  %v5523_v44 = vld [vmem:[%s5913_s28 + $0x78] sm:$0xff] }
 0x6cb   : > { %v4115_v55 = vmul.f32 %v5506_v3, %v4081_v29  ;;  %v4116_v47 = vmul.f32 %v5506_v3, %v4082_v13  ;;  %v4117_v6 = vmul.f32 %v5506_v3, %v4083_v57  ;;  %v4118_v52 = vmul.f32 %v5506_v3, %v4084_v12  ;;  %v5517_v29 = vld [vmem:[%s5913_s28 + $0x48] sm:$0xff]  ;;  %v5518_v57 = vld [vmem:[%s5913_s28 + $0x50] sm:$0xff]  ;;  %v5527_v17 = vld [vmem:[%s5913_s28 + $0x98] sm:$0xff] }
 0x6cc   : > { %4199 = vst [vmem:[%s8484_s18 + $0xf0] sm:$0xff] %v4167_v11  ;;  %v4119_v31 = vmul.f32 %v5506_v3, %v4085_v35  ;;  %v4120_v53 = vmul.f32 %v5506_v3, %v4086_v7  ;;  %v4121_v50 = vmul.f32 %v5506_v3, %v4087_v26  ;;  %v4122_v21 = vmul.f32 %v5506_v3, %v4088_v4  ;;  %v5519_v35 = vld [vmem:[%s5913_s28 + $0x58] sm:$0xff]  ;;  %v5520_v26 = vld [vmem:[%s5913_s28 + $0x60] sm:$0xff]  ;;  %v5521_v4 = vld [vmem:[%s5913_s28 + $0x68] sm:$0xff] }
 0x6cd   : > { %v4123_v45 = vmul.f32 %v5506_v3, %v4089_v24  ;;  %v8487_v25 = vmul.f32 %v5506_v3, %v4090_v37  ;;  %v8489_v10 = vmul.f32 %v5506_v3, %v4091_v40  ;;  %v8491_v2 = vmul.f32 %v5506_v3, %v4092_v41  ;;  %v5522_v37 = vld [vmem:[%s5913_s28 + $0x70] sm:$0xff] }
 0x6ce   : > { %v8493_v0 = vmul.f32 %v5506_v3, %v4093_v19  ;;  %v8495_v33 = vmul.f32 %v5506_v3, %v4094_v30  ;;  %v8497_v14 = vmul.f32 %v5506_v3, %v4095_v63  ;;  %v8499_v20 = vmul.f32 %v5506_v3, %v4096_v42  ;;  %v5508_v30 = vld [vmem:[%s5913_s28] sm:$0xff]  ;;  %v5509_v63 = vld [vmem:[%s5913_s28 + $0x8] sm:$0xff] }
 0x6cf   : > { %v8501_v60 = vmul.f32 %v5506_v3, %v4097_v27  ;;  %v8503_v15 = vmul.f32 %v5506_v3, %v4098_v32  ;;  %v8505_v23 = vmul.f32 %v5506_v3, %v4099_v36  ;;  %v8507_v41 = vmul.f32 %v5506_v3, %v4100_v16  ;;  %v5512_v36 = vld [vmem:[%s5913_s28 + $0x20] sm:$0xff] }
 0x6d0   : > { %v8509_v19 = vmul.f32 %v5506_v3, %v4102_v22  ;;  %v4137_v5 = vadd.f32 %v5508_v30, %v4105_v62  ;;  %v4138_v42 = vadd.f32 %v5509_v63, %v4106_v54  ;;  %v4139_v27 = vadd.f32 %v5510_v39, %v4107_v56  ;;  %v5524_v54 = vld [vmem:[%s5913_s28 + $0x80] sm:$0xff]  ;;  %v5538_v30 = vld [vmem:[%s5913_s28 + $0xf8] sm:$0xff] }
 0x6d1   : > { %v4140_v32 = vadd.f32 %v5511_v38, %v4108_v49  ;;  %v4141_v16 = vadd.f32 %v5512_v36, %v4109_v46  ;;  %v4142_v22 = vadd.f32 %v5513_v8, %v4110_v18  ;;  %v4143_v61 = vadd.f32 %v5514_v9, %v4111_v48  ;;  %v5525_v49 = vld [vmem:[%s5913_s28 + $0x88] sm:$0xff]  ;;  %v5526_v18 = vld [vmem:[%s5913_s28 + $0x90] sm:$0xff] }
 0x6d2   : > { %v4144_v1 = vadd.f32 %v5515_v43, %v4112_v28  ;;  %v4145_v58 = vadd.f32 %v5516_v59, %v4113_v51  ;;  %v4146_v13 = vadd.f32 %v5517_v29, %v4114_v34  ;;  %v4147_v12 = vadd.f32 %v5518_v57, %v4115_v55  ;;  %4169 = vst [vmem:[%s8484_s18] sm:$0xff] %v4137_v5  ;;  %v5528_v28 = vld [vmem:[%s5913_s28 + $0xa0] sm:$0xff]  ;;  %v5529_v34 = vld [vmem:[%s5913_s28 + $0xa8] sm:$0xff] }
 0x6d3   : > { %4170 = vst [vmem:[%s8484_s18 + $0x8] sm:$0xff] %v4138_v42  ;;  %4171 = vst [vmem:[%s8484_s18 + $0x10] sm:$0xff] %v4139_v27  ;;  %v4148_v7 = vadd.f32 %v5519_v35, %v4116_v47  ;;  %v4149_v3 = vadd.f32 %v5520_v26, %v4117_v6  ;;  %v4150_v24 = vadd.f32 %v5521_v4, %v4118_v52  ;;  %v5530_v47 = vld [vmem:[%s5913_s28 + $0xb0] sm:$0xff]  ;;  %v5531_v52 = vld [vmem:[%s5913_s28 + $0xb8] sm:$0xff] }
 0x6d4   : > { %v4151_v40 = vadd.f32 %v5522_v37, %v4119_v31  ;;  %4172 = vst [vmem:[%s8484_s18 + $0x18] sm:$0xff] %v4140_v32  ;;  %4173 = vst [vmem:[%s8484_s18 + $0x20] sm:$0xff] %v4141_v16  ;;  %v4152_v62 = vadd.f32 %v5523_v44, %v4120_v53  ;;  %v4153_v56 = vadd.f32 %v5524_v54, %v4121_v50  ;;  %v5532_v53 = vld [vmem:[%s5913_s28 + $0xc0] sm:$0xff] }
 0x6d5   : > { %4174 = vst [vmem:[%s8484_s18 + $0x28] sm:$0xff] %v4142_v22  ;;  %4175 = vst [vmem:[%s8484_s18 + $0x30] sm:$0xff] %v4143_v61  ;;  %v4154_v46 = vadd.f32 %v5525_v49, %v4122_v21  ;;  %v4155_v48 = vadd.f32 %v5526_v18, %v4123_v45  ;;  %v4156_v11 = vadd.f32 %v5527_v17, %v8487_v25  ;;  %v5533_v21 = vld [vmem:[%s5913_s28 + $0xc8] sm:$0xff]  ;;  %v5534_v25 = vld [vmem:[%s5913_s28 + $0xd0] sm:$0xff] }
 0x6d6   : > { %4176 = vst [vmem:[%s8484_s18 + $0x38] sm:$0xff] %v4144_v1  ;;  %4177 = vst [vmem:[%s8484_s18 + $0x40] sm:$0xff] %v4145_v58  ;;  %v4157_v51 = vadd.f32 %v5528_v28, %v8489_v10  ;;  %v4158_v55 = vadd.f32 %v5529_v34, %v8491_v2  ;;  %v4159_v6 = vadd.f32 %v5530_v47, %v8493_v0  ;;  %v5535_v2 = vld [vmem:[%s5913_s28 + $0xd8] sm:$0xff] }
 0x6d7   : > { %4178 = vst [vmem:[%s8484_s18 + $0x48] sm:$0xff] %v4146_v13  ;;  %4179 = vst [vmem:[%s8484_s18 + $0x50] sm:$0xff] %v4147_v12  ;;  %v4160_v31 = vadd.f32 %v5531_v52, %v8495_v33  ;;  %v4161_v50 = vadd.f32 %v5532_v53, %v8497_v14  ;;  %v4162_v45 = vadd.f32 %v5533_v21, %v8499_v20  ;;  %v5536_v33 = vld [vmem:[%s5913_s28 + $0xe0] sm:$0xff]  ;;  %v5537_v20 = vld [vmem:[%s5913_s28 + $0xe8] sm:$0xff] }
 0x6d8   : > { %4180 = vst [vmem:[%s8484_s18 + $0x58] sm:$0xff] %v4148_v7  ;;  %4181 = vst [vmem:[%s8484_s18 + $0x60] sm:$0xff] %v4149_v3  ;;  %v4163_v10 = vadd.f32 %v5534_v25, %v8501_v60  ;;  %v4164_v0 = vadd.f32 %v5535_v2, %v8503_v15  ;;  %v4165_v14 = vadd.f32 %v5536_v33, %v8505_v23 }
 0x6d9   : > { %4182 = vst [vmem:[%s8484_s18 + $0x68] sm:$0xff] %v4150_v24  ;;  %4183 = vst [vmem:[%s8484_s18 + $0x70] sm:$0xff] %v4151_v40  ;;  %v4166_v60 = vadd.f32 %v5537_v20, %v8507_v41  ;;  %v4168_v5 = vadd.f32 %v5538_v30, %v8509_v19 }
 0x6da   : > { %4184 = vst [vmem:[%s8484_s18 + $0x78] sm:$0xff] %v4152_v62  ;;  %4185 = vst [vmem:[%s8484_s18 + $0x80] sm:$0xff] %v4153_v56 }
 0x6db   : > { %4186 = vst [vmem:[%s8484_s18 + $0x88] sm:$0xff] %v4154_v46  ;;  %4187 = vst [vmem:[%s8484_s18 + $0x90] sm:$0xff] %v4155_v48 }
 0x6dc   : > { %4188 = vst [vmem:[%s8484_s18 + $0x98] sm:$0xff] %v4156_v11  ;;  %4189 = vst [vmem:[%s8484_s18 + $0xa0] sm:$0xff] %v4157_v51 }
 0x6dd   : > { %4190 = vst [vmem:[%s8484_s18 + $0xa8] sm:$0xff] %v4158_v55  ;;  %4191 = vst [vmem:[%s8484_s18 + $0xb0] sm:$0xff] %v4159_v6 }
 0x6de   : > { %4192 = vst [vmem:[%s8484_s18 + $0xb8] sm:$0xff] %v4160_v31  ;;  %4193 = vst [vmem:[%s8484_s18 + $0xc0] sm:$0xff] %v4161_v50 }
 0x6df   : > { %4194 = vst [vmem:[%s8484_s18 + $0xc8] sm:$0xff] %v4162_v45  ;;  %4195 = vst [vmem:[%s8484_s18 + $0xd0] sm:$0xff] %v4163_v10 }
 0x6e0   : > { %4196 = vst [vmem:[%s8484_s18 + $0xd8] sm:$0xff] %v4164_v0  ;;  %4197 = vst [vmem:[%s8484_s18 + $0xe0] sm:$0xff] %v4165_v14 }
 0x6e1   : > { %4198 = vst [vmem:[%s8484_s18 + $0xe8] sm:$0xff] %v4166_v60  ;;  %4200 = vst [vmem:[%s8484_s18 + $0xf8] sm:$0xff] %v4168_v5 }
 0x6e2   : > { %5638 = shalt.err (!%p5635_p1)
}
 0x6e3   : > { %s5639_s10 = scalar_lea.hbm %s8572_s27, 4096  ;;  %s5643_s26 = scalar_lea.hbm %s8643_s3, 8192 }
 0x6e4   : > { %p5640_p13 = scmp.ne.s32.totalorder %s8572_s27, %s5639_s10  ;;  %p5644_p4 = scmp.lt.u32.totalorder %s8572_s27, %s8643_s3 }
 0x6e5   : > { %p5645_p5 = scmp.lt.u32.totalorder %s5643_s26, %s5639_s10  ;;  %p5647_p11 = scmp.lt.u32.totalorder %s5639_s10, %s8572_s27 }
 0x6e6   : > { %p5641_p6 = pnand %p5640_p13, %p9148_p0 }
 0x6e7   : > { %p5646_p8 = por %p5645_p5, %p5644_p4 }
 0x6e8   : > { %p5642_p10 = pneg %p5641_p6 }
 0x6e9   : > { %p5648_p2 = por %p5647_p11, %p5646_p8 }
 0x6eb   : > { %p5649_p3 = pnand %p5648_p2, %p5642_p10 }
 0x6ed   : > { %5652 = shalt.err (!%p5649_p3)
}
 0x6ee   : > { %s5704_s28 = smov 128   ;;  %s5705_s18 = smov 8  }
 0x6ef   : > { %5441 = dma.vmem_to_hbm [thread:$0]  (%p9148_p0), %s8576_s7, 4096, %s8572_s27, %s4202_s16, %s5704_s28, %s5704_s28, %s5705_s18  }
 0x6f0 PF: > { %s4230_s20 = sand.u32 1, %s5683_s12   ;;  %p9149_p7 = scmp.ne.s32.totalorder %s8830_s19, 0 }
 0x6f1   : > { %p9150_p9 = scmp.ge.s32.totalorder %s5695_s15, 2  ;;  %s4231_s8 = scalar_lea.sflag [#allocation4], %s4230_s20 }
 0x6f3   : > { %p5455_p12 = pnand %p9150_p9, %p9149_p7 }
 0x6f5   : > { %5678 = dma.done.wait (!%p5455_p12), %s4231_s8, 4096  }
 0x6f6   : > { %5680 = vsyncadd (!%p5455_p12), %s4231_s8, 4294963200  ;;  %p17_p1 = scmp.ge.s32.totalorder %s5842_s23, 4   ;;  %s9151_s12 = smov %s5687_s13 }
 0x6f7   : > { %s9152_s13 = smov %s5691_s14  ;;  %s9153_s14 = smov %s5858_s9 }
 0x6f8   : > { %s9154_s15 = smov %s5842_s23  ;;  %19 = sbr.rel (!%p17_p1) target bundleno = 6 (0x6), region = 85 }
 0x6ff   :  { %4236 = vsyncpa [#allocation3], 1 }
 0x700   :  { %4238 = vsyncpa [#allocation3 + $0x1], 1 }
 0x701   :  { %4239 = vsyncpa [#allocation6], 1 }
 0x702   :  { %4240 = vsyncpa [#allocation4], 1 }
 0x703   :  { %4242 = vsyncpa [#allocation4 + $0x1], 1 }

</bundles_post_ra>
